<compile_context>
chip_gen: v5e
topology: v5e:2x2
jax: 0.10.0
libtpu: 0.0.40
codegen_flags: <defaults>
</compile_context>

<pallas_src>
import functools

import numpy as np
import jax
import jax.numpy as jnp
from jax import lax
from jax.experimental import pallas as pl
from jax.experimental.pallas import tpu as pltpu


# ---------------------------------------------------------------------------
# Tiling helper: largest multiple of `align` that divides `dim` and is <= cap,
# else the full dim (which Pallas always accepts for the last two block dims).
# ---------------------------------------------------------------------------
def _pick_tile(dim, cap, align):
    if dim % align == 0:
        t = min(cap, dim)
        t -= t % align
        while t >= align:
            if dim % t == 0:
                return t
            t -= align
    return dim


# ---------------------------------------------------------------------------
# Generic tiled matmul + bias kernel: (M, K) @ (K, N) + (1, N), f32 accumulation,
# bf16 operands.  Used for the GRU input projections and the final FC.
# ---------------------------------------------------------------------------
def _matmul_bias_kernel(x_ref, w_ref, b_ref, o_ref, acc_ref):
    @pl.when(pl.program_id(2) == 0)
    def _():
        acc_ref[...] = jnp.zeros_like(acc_ref)

    acc_ref[...] += jnp.dot(x_ref[...], w_ref[...],
                            preferred_element_type=jnp.float32)

    @pl.when(pl.program_id(2) == pl.num_programs(2) - 1)
    def _():
        o_ref[...] = (acc_ref[...] + b_ref[...]).astype(o_ref.dtype)


def matmul_bias(x, w, b, *, tm_cap=256, tn_cap=512, tk_cap=512):
    """x: (M, K); w: (K, N); b: (1, N) (or (N,)).  Returns (M, N) f32.
    Operands are cast to bf16 (MXU-native on v6e/v7x); accumulation stays f32."""
    M, K = x.shape
    K2, N = w.shape
    assert K == K2
    tm = _pick_tile(M, tm_cap, 8)
    tn = _pick_tile(N, tn_cap, 128)
    tk = _pick_tile(K, tk_cap, 128)
    xb = x.astype(jnp.bfloat16)
    wb = w.astype(jnp.bfloat16)
    bf = jnp.reshape(b, (1, N)).astype(jnp.float32)
    return pl.pallas_call(
        _matmul_bias_kernel,
        out_shape=jax.ShapeDtypeStruct((M, N), jnp.float32),
        grid=(M // tm, N // tn, K // tk),
        in_specs=[
            pl.BlockSpec((tm, tk), lambda i, j, k: (i, k)),
            pl.BlockSpec((tk, tn), lambda i, j, k: (k, j)),
            pl.BlockSpec((1, tn), lambda i, j, k: (0, j)),
        ],
        out_specs=pl.BlockSpec((tm, tn), lambda i, j, k: (i, j)),
        scratch_shapes=[pltpu.VMEM((tm, tn), jnp.float32)],
        compiler_params=pltpu.CompilerParams(
            dimension_semantics=("parallel", "parallel", "arbitrary")),
    )(xb, wb, bf)


# ---------------------------------------------------------------------------
# Fused Conv3d(k=3, pad=1) + ReLU + MaxPool3d((1,2,2)).
# Kernel inputs are pre-im2col'd, lane-dense patches (4 pool positions x K x Q_tile);
# the pool is a VPU max over the 4 per-position matmuls (no XLU shuffles).
# ---------------------------------------------------------------------------
def _conv_mm_relu_pool_kernel(p_ref, w_ref, b_ref, o_ref):
    # p_ref: (4, K, Qt) bf16; w_ref: (cout, K) bf16; b_ref: (cout, 1) f32; o_ref: (cout, Qt)
    w = w_ref[...]
    m = jnp.dot(w, p_ref[0], preferred_element_type=jnp.float32)
    for i in range(1, 4):
        m = jnp.maximum(m, jnp.dot(w, p_ref[i], preferred_element_type=jnp.float32))
    # relu(max_i(conv_i) + b) == maxpool(relu(conv + b)) since bias is uniform per channel.
    o_ref[...] = jnp.maximum(m + b_ref[...], 0.0).astype(o_ref.dtype)


def _im2col_pool_patches(x):
    """x: (B, Cin, H, W, T) f32.  Returns bf16 patches (B, 4, 27*Cin, Q) where the K axis
    is ordered (dh, dw, dt, cin) (matching the weight reshape), the 4 axis is the 2x2 pool
    position (ph, pw), and Q = (H//2)*(W//2)*T ordered (h2, w2, t) — lane-dense."""
    B, cin, H, W, T = x.shape
    H2, W2 = H // 2, W // 2
    xp = jnp.pad(x, ((0, 0), (0, 0), (1, 1), (1, 1), (1, 1)))
    cols = []
    for dh in range(3):
        for dw in range(3):
            for dt in range(3):
                cols.append(xp[:, :, dh:dh + H, dw:dw + W, dt:dt + T])
    p = jnp.stack(cols, axis=1)                                # (B, 27, cin, H, W, T)
    p = p.reshape(B, 27 * cin, H2, 2, W2, 2, T)                # split pool positions
    p = jnp.transpose(p, (0, 3, 5, 1, 2, 4, 6))                # (B, ph, pw, K, H2, W2, T)
    return p.reshape(B, 4, 27 * cin, H2 * W2 * T).astype(jnp.bfloat16)


def conv_relu_pool(x, w, b, *, q_tile_cap=512):
    """x: (B, Cin, H, W, T) f32; w: (3,3,3,Cin,Cout); b: (1, Cout).
    Returns (B, Cout, H//2, W//2, T) f32."""
    B, cin, H, W, T = x.shape
    cout = w.shape[-1]
    H2, W2 = H // 2, W // 2
    Q = H2 * W2 * T
    K = 27 * cin

    patches = _im2col_pool_patches(x)                          # (B, 4, K, Q) bf16
    w_mat = jnp.reshape(w, (K, cout)).T.astype(jnp.bfloat16)   # (Cout, K); K order (dh,dw,dt,cin)
    b_col = jnp.reshape(b, (cout, 1)).astype(jnp.float32)

    Qt = _pick_tile(Q, q_tile_cap, 128)
    y = pl.pallas_call(
        _conv_mm_relu_pool_kernel,
        out_shape=jax.ShapeDtypeStruct((B, cout, Q), jnp.float32),
        grid=(B, Q // Qt),
        in_specs=[
            pl.BlockSpec((None, 4, K, Qt), lambda bi, qi: (bi, 0, 0, qi)),
            pl.BlockSpec((cout, K), lambda bi, qi: (0, 0)),
            pl.BlockSpec((cout, 1), lambda bi, qi: (0, 0)),
        ],
        out_specs=pl.BlockSpec((None, cout, Qt), lambda bi, qi: (bi, 0, qi)),
        compiler_params=pltpu.CompilerParams(
            dimension_semantics=("parallel", "parallel")),
    )(patches, w_mat, b_col)
    return y.reshape(B, cout, H2, W2, T)


# ---------------------------------------------------------------------------
# GRU recurrence kernel: one direction per grid step (size-2 "parallel" grid ->
# both v7x TensorCores busy).  The input projection (incl. bih) is already hoisted
# into `xp`; the serial loop does one (B, Hd) @ (Hd, 3*Hd) dot per step and writes
# its hidden state straight into its lane-half of the output.  PyTorch gate order (r,z,n).
# ---------------------------------------------------------------------------
def _gru_recurrence_kernel(xp_ref, whh_ref, bhh_ref, o_ref, *, unroll):
    d = pl.program_id(0)                 # 0 = forward in time, 1 = backward
    T, B, H3 = xp_ref.shape
    Hd = H3 // 3
    whh = whh_ref[...]                   # (Hd, 3*Hd) f32 (recurrence kept f32)
    bhh = bhh_ref[...]                   # (1, 3*Hd)

    def step(i, h):
        t = jnp.where(d == 0, i, T - 1 - i)
        gx = xp_ref[t]                                           # (B, 3Hd), bih folded in
        gh = jnp.dot(h, whh, preferred_element_type=jnp.float32) + bhh
        r = jax.nn.sigmoid(gx[:, 0 * Hd:1 * Hd] + gh[:, 0 * Hd:1 * Hd])
        z = jax.nn.sigmoid(gx[:, 1 * Hd:2 * Hd] + gh[:, 1 * Hd:2 * Hd])
        n = jnp.tanh(gx[:, 2 * Hd:3 * Hd] + r * gh[:, 2 * Hd:3 * Hd])
        h = (1.0 - z) * n + z * h
        o_ref[t] = h.astype(o_ref.dtype)
        return h

    lax.fori_loop(0, T, step, jnp.zeros((B, Hd), jnp.float32), unroll=unroll)


def bigru_layer(seq_tbf, wih, whh, bih, bhh):
    """seq_tbf: (T, B, F); wih: (F, 6*Hd) [fwd gates | bwd gates]; whh: (Hd, 6*Hd);
    biases (1, 6*Hd).  Returns (T, B, 2*Hd) = [fwd hidden | bwd hidden]."""
    T, B, F = seq_tbf.shape
    Hd = whh.shape[0]

    # Hoisted input projection for all timesteps/gates/directions: its own tiled MXU matmul.
    xp = matmul_bias(seq_tbf.reshape(T * B, F), wih, bih).reshape(T, B, 6 * Hd)

    # Full unroll only for tiny T; modest unroll at realistic sequence lengths.
    unroll = True if T <= 16 else 4
    kern = functools.partial(_gru_recurrence_kernel, unroll=unroll)
    return pl.pallas_call(
        kern,
        out_shape=jax.ShapeDtypeStruct((T, B, 2 * Hd), jnp.float32),
        grid=(2,),
        in_specs=[
            pl.BlockSpec((T, B, 3 * Hd), lambda d: (0, 0, d)),
            pl.BlockSpec((Hd, 3 * Hd), lambda d: (0, d)),
            pl.BlockSpec((1, 3 * Hd), lambda d: (0, d)),
        ],
        out_specs=pl.BlockSpec((T, B, Hd), lambda d: (0, 0, d)),
        compiler_params=pltpu.CompilerParams(dimension_semantics=("parallel",)),
    )(xp, whh.astype(jnp.float32), bhh.astype(jnp.float32))


# ---------------------------------------------------------------------------
# Weight packing (canonical per-gate params -> kernel layouts).
# ---------------------------------------------------------------------------
def _pack_gru_direction(wih, whh, bih, bhh):
    F, Hd = wih.shape[1], wih.shape[2]
    return (jnp.transpose(wih, (1, 0, 2)).reshape(F, 3 * Hd),
            jnp.transpose(whh, (1, 0, 2)).reshape(Hd, 3 * Hd),
            bih.reshape(1, 3 * Hd),
            bhh.reshape(1, 3 * Hd))


def _pack_gru_layer(layer):
    wf, uf, bf, cf = _pack_gru_direction(*layer["fwd"])
    wb, ub, bb, cb = _pack_gru_direction(*layer["bwd"])
    return (jnp.concatenate([wf, wb], axis=1),
            jnp.concatenate([uf, ub], axis=1),
            jnp.concatenate([bf, bb], axis=1),
            jnp.concatenate([cf, cb], axis=1))


# ---------------------------------------------------------------------------
# Full forward pass.
# ---------------------------------------------------------------------------
def lipnet_forward(x_ncthw, params):
    # NCDHW (B, 1, T, H, W) -> conv layout (B, C, H, W, T)
    x = jnp.transpose(x_ncthw, (0, 1, 3, 4, 2)).astype(jnp.float32)
    for w, b in params["convs"]:
        x = conv_relu_pool(x, w, b)

    # Replicate torch's `x.view(B, T, -1)` on the NCDHW conv output exactly
    # (the source module has no permute, so this mixes channel/time into features).
    B, C, Hs, Ws, T = x.shape
    feat = jnp.transpose(x, (0, 1, 4, 2, 3)).reshape(B, T, C * Hs * Ws)   # (B, T, F)
    seq = jnp.transpose(feat, (1, 0, 2))                                  # (T, B, F)

    for layer in params["gru"]:
        seq = bigru_layer(seq, *_pack_gru_layer(layer))

    # Final Linear: lane-dense (vocab padded to 128), tiled matmul kernel, sliced back.
    n_out = params["fc_w"].shape[-1]
    vp = ((n_out + 127) // 128) * 128
    fcw = jnp.pad(params["fc_w"], ((0, 0), (0, vp - n_out)))
    fcb = jnp.pad(params["fc_b"], ((0, 0), (0, vp - n_out)))
    Tt, Bb, F2 = seq.shape
    logits = matmul_bias(seq.reshape(Tt * Bb, F2), fcw, fcb).reshape(Tt, Bb, vp)
    return jnp.transpose(logits, (1, 0, 2))[:, :, :n_out]                 # (B, T, vocab+1)


# ---------------------------------------------------------------------------
# Pure-JAX f32 reference (same synthetic parameters) for a correctness check.
# ---------------------------------------------------------------------------
def reference_forward(x_ncthw, params):
    hi = lax.Precision.HIGHEST
    x = jnp.transpose(x_ncthw, (0, 3, 4, 2, 1)).astype(jnp.float32)       # (B, H, W, T, C)
    for w, b in params["convs"]:
        y = lax.conv_general_dilated(
            x, w, window_strides=(1, 1, 1),
            padding=((1, 1), (1, 1), (1, 1)),
            dimension_numbers=("NDHWC", "DHWIO", "NDHWC"),
            precision=hi)
        y = jax.nn.relu(y + b.reshape(1, 1, 1, 1, -1))
        B, Hc, Wc, Tc, Cc = y.shape
        x = y.reshape(B, Hc // 2, 2, Wc // 2, 2, Tc, Cc).max(axis=(2, 4))

    B, Hs, Ws, T, C = x.shape
    feat = jnp.transpose(x, (0, 4, 3, 1, 2)).reshape(B, T, C * Hs * Ws)
    seq = jnp.transpose(feat, (1, 0, 2))

    def gru_dir(s, wih, whh, bih, bhh, reverse):
        T_, B_, _ = s.shape
        Hd = whh.shape[-1]
        h = jnp.zeros((B_, Hd), jnp.float32)
        outs = [None] * T_
        order = range(T_ - 1, -1, -1) if reverse else range(T_)
        dot = lambda a, m: jnp.dot(a, m, precision=hi)
        for t in order:
            xt = s[t]
            r = jax.nn.sigmoid(dot(xt, wih[0]) + bih[0] + dot(h, whh[0]) + bhh[0])
            z = jax.nn.sigmoid(dot(xt, wih[1]) + bih[1] + dot(h, whh[1]) + bhh[1])
            n = jnp.tanh(dot(xt, wih[2]) + bih[2] + r * (dot(h, whh[2]) + bhh[2]))
            h = (1.0 - z) * n + z * h
            outs[t] = h
        return jnp.stack(outs, axis=0)

    for layer in params["gru"]:
        fwd = gru_dir(seq, *layer["fwd"], reverse=False)
        bwd = gru_dir(seq, *layer["bwd"], reverse=True)
        seq = jnp.concatenate([fwd, bwd], axis=-1)

    out = jnp.transpose(seq, (1, 0, 2))
    return jnp.dot(out, params["fc_w"], precision=hi) + params["fc_b"].reshape(1, 1, -1)


# ---------------------------------------------------------------------------
# Deterministic synthetic parameters (shapes mirror the module, conv channels scaled down).
# ---------------------------------------------------------------------------
def init_params(key, *, channels, feat, hidden, vocab):
    params = {"convs": [], "gru": []}
    for i in range(3):
        cin, cout = channels[i], channels[i + 1]
        key, k1, k2 = jax.random.split(key, 3)
        scale = 1.0 / np.sqrt(cin * 27)
        w = jax.random.normal(k1, (3, 3, 3, cin, cout), jnp.float32) * scale
        b = jax.random.normal(k2, (1, cout), jnp.float32) * 0.1
        params["convs"].append((w, b))

    in_sizes = (feat, 2 * hidden)
    for layer in range(2):
        layer_p = {}
        fin = in_sizes[layer]
        for d in ("fwd", "bwd"):
            key, k1, k2, k3, k4 = jax.random.split(key, 5)
            wih = jax.random.normal(k1, (3, fin, hidden), jnp.float32) / np.sqrt(fin)
            whh = jax.random.normal(k2, (3, hidden, hidden), jnp.float32) / np.sqrt(hidden)
            bih = jax.random.normal(k3, (3, 1, hidden), jnp.float32) * 0.1
            bhh = jax.random.normal(k4, (3, 1, hidden), jnp.float32) * 0.1
            layer_p[d] = (wih, whh, bih, bhh)
        params["gru"].append(layer_p)

    key, k1, k2 = jax.random.split(key, 3)
    params["fc_w"] = jax.random.normal(k1, (2 * hidden, vocab + 1), jnp.float32) / np.sqrt(2 * hidden)
    params["fc_b"] = jax.random.normal(k2, (1, vocab + 1), jnp.float32) * 0.1
    return params


if __name__ == "__main__":
    # Small shapes consistent with the module's forward:
    # input (B, 1, T, H, W); 3 conv+pool stages halve H, W three times.
    B, T, Himg, Wimg = 2, 8, 16, 16
    channels = (1, 8, 16, 12)        # mirrors 1 -> 128 -> 256 -> 75 (scaled)
    hidden = 128                     # actual module hidden size (keeps gate slices 128-aligned)
    vocab = 10
    feat = channels[-1] * (Himg // 8) * (Wimg // 8)   # mirrors 75 * 5 * 17 (scaled)

    key = jax.random.PRNGKey(0)
    key, kx = jax.random.split(key)
    x = jax.random.normal(kx, (B, 1, T, Himg, Wimg), jnp.float32)   # PyTorch NCDHW

    params = init_params(key, channels=channels, feat=feat, hidden=hidden, vocab=vocab)

    out = jax.block_until_ready(jax.jit(lipnet_forward)(x, params))
    assert out.shape == (B, T, vocab + 1), out.shape

    ref = jax.block_until_ready(reference_forward(x, params))
    # Tolerance accounts for bf16 MXU operands in the Pallas path vs f32 HIGHEST reference.
    if not np.allclose(np.asarray(out), np.asarray(ref), atol=5e-2, rtol=5e-2):
        err = float(np.max(np.abs(np.asarray(out) - np.asarray(ref))))
        raise AssertionError(f"Pallas output mismatch vs JAX reference (max abs err={err})")

    print("KERNEL_OK")
</pallas_src>

<mosaic_0001>
module attributes {stable_mosaic.version = 11 : i64} {
  func.func @_conv_mm_relu_pool_kernel(%arg0: i32, %arg1: i32, %arg2: memref<1x4x27x512xbf16, #tpu.memory_space<vmem>>, %arg3: memref<8x27xbf16, #tpu.memory_space<vmem>>, %arg4: memref<8x1xf32, #tpu.memory_space<vmem>>, %arg5: memref<1x8x512xf32, #tpu.memory_space<vmem>>) attributes {dimension_semantics = [#tpu.dimension_semantics<parallel>, #tpu.dimension_semantics<parallel>], iteration_bounds = array<i64: 2, 1>, scalar_prefetch = 0 : i64, scratch_operands = 0 : i64, tpu.core_type = #tpu.core_type<tc>, window_params = [{transform_indices = @transform_0, window_bounds = array<i64: 1, 4, 27, 512>}, {pipeline_mode = #tpu.pipeline_mode<synchronous>, transform_indices = @transform_1, window_bounds = array<i64: 8, 27>}, {pipeline_mode = #tpu.pipeline_mode<synchronous>, transform_indices = @transform_2, window_bounds = array<i64: 8, 1>}, {transform_indices = @transform_3, window_bounds = array<i64: 1, 8, 512>}]} {
    %c0 = arith.constant 0 : index
    %c0_0 = arith.constant 0 : index
    %0 = vector.load %arg3[%c0, %c0_0] : memref<8x27xbf16, #tpu.memory_space<vmem>>, vector<8x27xbf16>
    %c0_1 = arith.constant 0 : index
    %c0_2 = arith.constant 0 : index
    %c0_3 = arith.constant 0 : index
    %c0_4 = arith.constant 0 : index
    %1 = vector.load %arg2[%c0_1, %c0_2, %c0_3, %c0_4] : memref<1x4x27x512xbf16, #tpu.memory_space<vmem>>, vector<1x1x27x512xbf16>
    %2 = vector.shape_cast %1 : vector<1x1x27x512xbf16> to vector<27x512xbf16>
    %cst = arith.constant dense<0.000000e+00> : vector<8x512xf32>
    %3 = tpu.matmul %0, %2, %cst {dimension_numbers = #tpu.dot_dimension_numbers<[1], [0], [0], [1], [0, 0, 1, 1], [], []>} : vector<8x27xbf16>, vector<27x512xbf16>, vector<8x512xf32> -> vector<8x512xf32>
    %c0_5 = arith.constant 0 : index
    %c1 = arith.constant 1 : index
    %c0_6 = arith.constant 0 : index
    %c0_7 = arith.constant 0 : index
    %4 = vector.load %arg2[%c0_5, %c1, %c0_6, %c0_7] : memref<1x4x27x512xbf16, #tpu.memory_space<vmem>>, vector<1x1x27x512xbf16>
    %5 = vector.shape_cast %4 : vector<1x1x27x512xbf16> to vector<27x512xbf16>
    %cst_8 = arith.constant dense<0.000000e+00> : vector<8x512xf32>
    %6 = tpu.matmul %0, %5, %cst_8 {dimension_numbers = #tpu.dot_dimension_numbers<[1], [0], [0], [1], [0, 0, 1, 1], [], []>} : vector<8x27xbf16>, vector<27x512xbf16>, vector<8x512xf32> -> vector<8x512xf32>
    %7 = arith.maximumf %3, %6 : vector<8x512xf32>
    %c0_9 = arith.constant 0 : index
    %c2 = arith.constant 2 : index
    %c0_10 = arith.constant 0 : index
    %c0_11 = arith.constant 0 : index
    %8 = vector.load %arg2[%c0_9, %c2, %c0_10, %c0_11] : memref<1x4x27x512xbf16, #tpu.memory_space<vmem>>, vector<1x1x27x512xbf16>
    %9 = vector.shape_cast %8 : vector<1x1x27x512xbf16> to vector<27x512xbf16>
    %cst_12 = arith.constant dense<0.000000e+00> : vector<8x512xf32>
    %10 = tpu.matmul %0, %9, %cst_12 {dimension_numbers = #tpu.dot_dimension_numbers<[1], [0], [0], [1], [0, 0, 1, 1], [], []>} : vector<8x27xbf16>, vector<27x512xbf16>, vector<8x512xf32> -> vector<8x512xf32>
    %11 = arith.maximumf %7, %10 : vector<8x512xf32>
    %c0_13 = arith.constant 0 : index
    %c3 = arith.constant 3 : index
    %c0_14 = arith.constant 0 : index
    %c0_15 = arith.constant 0 : index
    %12 = vector.load %arg2[%c0_13, %c3, %c0_14, %c0_15] : memref<1x4x27x512xbf16, #tpu.memory_space<vmem>>, vector<1x1x27x512xbf16>
    %13 = vector.shape_cast %12 : vector<1x1x27x512xbf16> to vector<27x512xbf16>
    %cst_16 = arith.constant dense<0.000000e+00> : vector<8x512xf32>
    %14 = tpu.matmul %0, %13, %cst_16 {dimension_numbers = #tpu.dot_dimension_numbers<[1], [0], [0], [1], [0, 0, 1, 1], [], []>} : vector<8x27xbf16>, vector<27x512xbf16>, vector<8x512xf32> -> vector<8x512xf32>
    %15 = arith.maximumf %11, %14 : vector<8x512xf32>
    %c0_17 = arith.constant 0 : index
    %c0_18 = arith.constant 0 : index
    %16 = vector.load %arg4[%c0_17, %c0_18] : memref<8x1xf32, #tpu.memory_space<vmem>>, vector<8x1xf32>
    %17 = vector.broadcast %16 : vector<8x1xf32> to vector<8x512xf32>
    %18 = arith.addf %15, %17 : vector<8x512xf32>
    %cst_19 = arith.constant 0.000000e+00 : f32
    %19 = vector.broadcast %cst_19 : f32 to vector<8x512xf32>
    %20 = arith.maximumf %18, %19 : vector<8x512xf32>
    %c0_20 = arith.constant 0 : index
    %c0_21 = arith.constant 0 : index
    %c0_22 = arith.constant 0 : index
    %21 = vector.load %arg5[%c0_20, %c0_21, %c0_22] : memref<1x8x512xf32, #tpu.memory_space<vmem>>, vector<1x8x512xf32>
    %22 = vector.shape_cast %21 : vector<1x8x512xf32> to vector<8x512xf32>
    %23 = vector.shape_cast %20 : vector<8x512xf32> to vector<1x8x512xf32>
    tpu.vector_store %arg5[%c0_20, %c0_21, %c0_22], %23 {strides = array<i32>} : memref<1x8x512xf32, #tpu.memory_space<vmem>>, vector<1x8x512xf32>,
    return
  }
  func.func @transform_0(%arg0: i32, %arg1: i32) -> (i32, i32, i32, i32) {
    %c0_i32 = arith.constant 0 : i32
    %c0_i32_0 = arith.constant 0 : i32
    %c0_i32_1 = arith.constant 0 : i32
    return %arg0, %c0_i32, %c0_i32_0, %arg1 : i32, i32, i32, i32
  }
  func.func @transform_1(%arg0: i32, %arg1: i32) -> (i32, i32) {
    %c0_i32 = arith.constant 0 : i32
    %c0_i32_0 = arith.constant 0 : i32
    %c0_i32_1 = arith.constant 0 : i32
    return %c0_i32, %c0_i32_0 : i32, i32
  }
  func.func @transform_2(%arg0: i32, %arg1: i32) -> (i32, i32) {
    %c0_i32 = arith.constant 0 : i32
    %c0_i32_0 = arith.constant 0 : i32
    %c0_i32_1 = arith.constant 0 : i32
    return %c0_i32, %c0_i32_0 : i32, i32
  }
  func.func @transform_3(%arg0: i32, %arg1: i32) -> (i32, i32, i32) {
    %c0_i32 = arith.constant 0 : i32
    %c0_i32_0 = arith.constant 0 : i32
    return %arg0, %c0_i32, %arg1 : i32, i32, i32
  }
}

module attributes {stable_mosaic.version = 11 : i64} {
  func.func @_conv_mm_relu_pool_kernel(%arg0: i32, %arg1: i32, %arg2: memref<1x4x216x128xbf16, #tpu.memory_space<vmem>>, %arg3: memref<16x216xbf16, #tpu.memory_space<vmem>>, %arg4: memref<16x1xf32, #tpu.memory_space<vmem>>, %arg5: memref<1x16x128xf32, #tpu.memory_space<vmem>>) attributes {dimension_semantics = [#tpu.dimension_semantics<parallel>, #tpu.dimension_semantics<parallel>], iteration_bounds = array<i64: 2, 1>, scalar_prefetch = 0 : i64, scratch_operands = 0 : i64, tpu.core_type = #tpu.core_type<tc>, window_params = [{transform_indices = @transform_0, window_bounds = array<i64: 1, 4, 216, 128>}, {pipeline_mode = #tpu.pipeline_mode<synchronous>, transform_indices = @transform_1, window_bounds = array<i64: 16, 216>}, {pipeline_mode = #tpu.pipeline_mode<synchronous>, transform_indices = @transform_2, window_bounds = array<i64: 16, 1>}, {transform_indices = @transform_3, window_bounds = array<i64: 1, 16, 128>}]} {
    %c0 = arith.constant 0 : index
    %c0_0 = arith.constant 0 : index
    %0 = vector.load %arg3[%c0, %c0_0] : memref<16x216xbf16, #tpu.memory_space<vmem>>, vector<16x216xbf16>
    %c0_1 = arith.constant 0 : index
    %c0_2 = arith.constant 0 : index
    %c0_3 = arith.constant 0 : index
    %c0_4 = arith.constant 0 : index
    %1 = vector.load %arg2[%c0_1, %c0_2, %c0_3, %c0_4] : memref<1x4x216x128xbf16, #tpu.memory_space<vmem>>, vector<1x1x216x128xbf16>
    %2 = vector.shape_cast %1 : vector<1x1x216x128xbf16> to vector<216x128xbf16>
    %cst = arith.constant dense<0.000000e+00> : vector<16x128xf32>
    %3 = tpu.matmul %0, %2, %cst {dimension_numbers = #tpu.dot_dimension_numbers<[1], [0], [0], [1], [0, 0, 1, 1], [], []>} : vector<16x216xbf16>, vector<216x128xbf16>, vector<16x128xf32> -> vector<16x128xf32>
    %c0_5 = arith.constant 0 : index
    %c1 = arith.constant 1 : index
    %c0_6 = arith.constant 0 : index
    %c0_7 = arith.constant 0 : index
    %4 = vector.load %arg2[%c0_5, %c1, %c0_6, %c0_7] : memref<1x4x216x128xbf16, #tpu.memory_space<vmem>>, vector<1x1x216x128xbf16>
    %5 = vector.shape_cast %4 : vector<1x1x216x128xbf16> to vector<216x128xbf16>
    %cst_8 = arith.constant dense<0.000000e+00> : vector<16x128xf32>
    %6 = tpu.matmul %0, %5, %cst_8 {dimension_numbers = #tpu.dot_dimension_numbers<[1], [0], [0], [1], [0, 0, 1, 1], [], []>} : vector<16x216xbf16>, vector<216x128xbf16>, vector<16x128xf32> -> vector<16x128xf32>
    %7 = arith.maximumf %3, %6 : vector<16x128xf32>
    %c0_9 = arith.constant 0 : index
    %c2 = arith.constant 2 : index
    %c0_10 = arith.constant 0 : index
    %c0_11 = arith.constant 0 : index
    %8 = vector.load %arg2[%c0_9, %c2, %c0_10, %c0_11] : memref<1x4x216x128xbf16, #tpu.memory_space<vmem>>, vector<1x1x216x128xbf16>
    %9 = vector.shape_cast %8 : vector<1x1x216x128xbf16> to vector<216x128xbf16>
    %cst_12 = arith.constant dense<0.000000e+00> : vector<16x128xf32>
    %10 = tpu.matmul %0, %9, %cst_12 {dimension_numbers = #tpu.dot_dimension_numbers<[1], [0], [0], [1], [0, 0, 1, 1], [], []>} : vector<16x216xbf16>, vector<216x128xbf16>, vector<16x128xf32> -> vector<16x128xf32>
    %11 = arith.maximumf %7, %10 : vector<16x128xf32>
    %c0_13 = arith.constant 0 : index
    %c3 = arith.constant 3 : index
    %c0_14 = arith.constant 0 : index
    %c0_15 = arith.constant 0 : index
    %12 = vector.load %arg2[%c0_13, %c3, %c0_14, %c0_15] : memref<1x4x216x128xbf16, #tpu.memory_space<vmem>>, vector<1x1x216x128xbf16>
    %13 = vector.shape_cast %12 : vector<1x1x216x128xbf16> to vector<216x128xbf16>
    %cst_16 = arith.constant dense<0.000000e+00> : vector<16x128xf32>
    %14 = tpu.matmul %0, %13, %cst_16 {dimension_numbers = #tpu.dot_dimension_numbers<[1], [0], [0], [1], [0, 0, 1, 1], [], []>} : vector<16x216xbf16>, vector<216x128xbf16>, vector<16x128xf32> -> vector<16x128xf32>
    %15 = arith.maximumf %11, %14 : vector<16x128xf32>
    %c0_17 = arith.constant 0 : index
    %c0_18 = arith.constant 0 : index
    %16 = vector.load %arg4[%c0_17, %c0_18] : memref<16x1xf32, #tpu.memory_space<vmem>>, vector<16x1xf32>
    %17 = vector.broadcast %16 : vector<16x1xf32> to vector<16x128xf32>
    %18 = arith.addf %15, %17 : vector<16x128xf32>
    %cst_19 = arith.constant 0.000000e+00 : f32
    %19 = vector.broadcast %cst_19 : f32 to vector<16x128xf32>
    %20 = arith.maximumf %18, %19 : vector<16x128xf32>
    %c0_20 = arith.constant 0 : index
    %c0_21 = arith.constant 0 : index
    %c0_22 = arith.constant 0 : index
    %21 = vector.load %arg5[%c0_20, %c0_21, %c0_22] : memref<1x16x128xf32, #tpu.memory_space<vmem>>, vector<1x16x128xf32>
    %22 = vector.shape_cast %21 : vector<1x16x128xf32> to vector<16x128xf32>
    %23 = vector.shape_cast %20 : vector<16x128xf32> to vector<1x16x128xf32>
    tpu.vector_store %arg5[%c0_20, %c0_21, %c0_22], %23 {strides = array<i32>} : memref<1x16x128xf32, #tpu.memory_space<vmem>>, vector<1x16x128xf32>,
    return
  }
  func.func @transform_0(%arg0: i32, %arg1: i32) -> (i32, i32, i32, i32) {
    %c0_i32 = arith.constant 0 : i32
    %c0_i32_0 = arith.constant 0 : i32
    %c0_i32_1 = arith.constant 0 : i32
    return %arg0, %c0_i32, %c0_i32_0, %arg1 : i32, i32, i32, i32
  }
  func.func @transform_1(%arg0: i32, %arg1: i32) -> (i32, i32) {
    %c0_i32 = arith.constant 0 : i32
    %c0_i32_0 = arith.constant 0 : i32
    %c0_i32_1 = arith.constant 0 : i32
    return %c0_i32, %c0_i32_0 : i32, i32
  }
  func.func @transform_2(%arg0: i32, %arg1: i32) -> (i32, i32) {
    %c0_i32 = arith.constant 0 : i32
    %c0_i32_0 = arith.constant 0 : i32
    %c0_i32_1 = arith.constant 0 : i32
    return %c0_i32, %c0_i32_0 : i32, i32
  }
  func.func @transform_3(%arg0: i32, %arg1: i32) -> (i32, i32, i32) {
    %c0_i32 = arith.constant 0 : i32
    %c0_i32_0 = arith.constant 0 : i32
    return %arg0, %c0_i32, %arg1 : i32, i32, i32
  }
}

module attributes {stable_mosaic.version = 11 : i64} {
  func.func @_conv_mm_relu_pool_kernel(%arg0: i32, %arg1: i32, %arg2: memref<1x4x432x32xbf16, #tpu.memory_space<vmem>>, %arg3: memref<12x432xbf16, #tpu.memory_space<vmem>>, %arg4: memref<12x1xf32, #tpu.memory_space<vmem>>, %arg5: memref<1x12x32xf32, #tpu.memory_space<vmem>>) attributes {dimension_semantics = [#tpu.dimension_semantics<parallel>, #tpu.dimension_semantics<parallel>], iteration_bounds = array<i64: 2, 1>, scalar_prefetch = 0 : i64, scratch_operands = 0 : i64, tpu.core_type = #tpu.core_type<tc>, window_params = [{transform_indices = @transform_0, window_bounds = array<i64: 1, 4, 432, 32>}, {pipeline_mode = #tpu.pipeline_mode<synchronous>, transform_indices = @transform_1, window_bounds = array<i64: 12, 432>}, {pipeline_mode = #tpu.pipeline_mode<synchronous>, transform_indices = @transform_2, window_bounds = array<i64: 12, 1>}, {transform_indices = @transform_3, window_bounds = array<i64: 1, 12, 32>}]} {
    %c0 = arith.constant 0 : index
    %c0_0 = arith.constant 0 : index
    %0 = vector.load %arg3[%c0, %c0_0] : memref<12x432xbf16, #tpu.memory_space<vmem>>, vector<12x432xbf16>
    %c0_1 = arith.constant 0 : index
    %c0_2 = arith.constant 0 : index
    %c0_3 = arith.constant 0 : index
    %c0_4 = arith.constant 0 : index
    %1 = vector.load %arg2[%c0_1, %c0_2, %c0_3, %c0_4] : memref<1x4x432x32xbf16, #tpu.memory_space<vmem>>, vector<1x1x432x32xbf16>
    %2 = vector.shape_cast %1 : vector<1x1x432x32xbf16> to vector<432x32xbf16>
    %cst = arith.constant dense<0.000000e+00> : vector<12x32xf32>
    %3 = tpu.matmul %0, %2, %cst {dimension_numbers = #tpu.dot_dimension_numbers<[1], [0], [0], [1], [0, 0, 1, 1], [], []>} : vector<12x432xbf16>, vector<432x32xbf16>, vector<12x32xf32> -> vector<12x32xf32>
    %c0_5 = arith.constant 0 : index
    %c1 = arith.constant 1 : index
    %c0_6 = arith.constant 0 : index
    %c0_7 = arith.constant 0 : index
    %4 = vector.load %arg2[%c0_5, %c1, %c0_6, %c0_7] : memref<1x4x432x32xbf16, #tpu.memory_space<vmem>>, vector<1x1x432x32xbf16>
    %5 = vector.shape_cast %4 : vector<1x1x432x32xbf16> to vector<432x32xbf16>
    %cst_8 = arith.constant dense<0.000000e+00> : vector<12x32xf32>
    %6 = tpu.matmul %0, %5, %cst_8 {dimension_numbers = #tpu.dot_dimension_numbers<[1], [0], [0], [1], [0, 0, 1, 1], [], []>} : vector<12x432xbf16>, vector<432x32xbf16>, vector<12x32xf32> -> vector<12x32xf32>
    %7 = arith.maximumf %3, %6 : vector<12x32xf32>
    %c0_9 = arith.constant 0 : index
    %c2 = arith.constant 2 : index
    %c0_10 = arith.constant 0 : index
    %c0_11 = arith.constant 0 : index
    %8 = vector.load %arg2[%c0_9, %c2, %c0_10, %c0_11] : memref<1x4x432x32xbf16, #tpu.memory_space<vmem>>, vector<1x1x432x32xbf16>
    %9 = vector.shape_cast %8 : vector<1x1x432x32xbf16> to vector<432x32xbf16>
    %cst_12 = arith.constant dense<0.000000e+00> : vector<12x32xf32>
    %10 = tpu.matmul %0, %9, %cst_12 {dimension_numbers = #tpu.dot_dimension_numbers<[1], [0], [0], [1], [0, 0, 1, 1], [], []>} : vector<12x432xbf16>, vector<432x32xbf16>, vector<12x32xf32> -> vector<12x32xf32>
    %11 = arith.maximumf %7, %10 : vector<12x32xf32>
    %c0_13 = arith.constant 0 : index
    %c3 = arith.constant 3 : index
    %c0_14 = arith.constant 0 : index
    %c0_15 = arith.constant 0 : index
    %12 = vector.load %arg2[%c0_13, %c3, %c0_14, %c0_15] : memref<1x4x432x32xbf16, #tpu.memory_space<vmem>>, vector<1x1x432x32xbf16>
    %13 = vector.shape_cast %12 : vector<1x1x432x32xbf16> to vector<432x32xbf16>
    %cst_16 = arith.constant dense<0.000000e+00> : vector<12x32xf32>
    %14 = tpu.matmul %0, %13, %cst_16 {dimension_numbers = #tpu.dot_dimension_numbers<[1], [0], [0], [1], [0, 0, 1, 1], [], []>} : vector<12x432xbf16>, vector<432x32xbf16>, vector<12x32xf32> -> vector<12x32xf32>
    %15 = arith.maximumf %11, %14 : vector<12x32xf32>
    %c0_17 = arith.constant 0 : index
    %c0_18 = arith.constant 0 : index
    %16 = vector.load %arg4[%c0_17, %c0_18] : memref<12x1xf32, #tpu.memory_space<vmem>>, vector<12x1xf32>
    %17 = vector.broadcast %16 : vector<12x1xf32> to vector<12x32xf32>
    %18 = arith.addf %15, %17 : vector<12x32xf32>
    %cst_19 = arith.constant 0.000000e+00 : f32
    %19 = vector.broadcast %cst_19 : f32 to vector<12x32xf32>
    %20 = arith.maximumf %18, %19 : vector<12x32xf32>
    %c0_20 = arith.constant 0 : index
    %c0_21 = arith.constant 0 : index
    %c0_22 = arith.constant 0 : index
    %21 = vector.load %arg5[%c0_20, %c0_21, %c0_22] : memref<1x12x32xf32, #tpu.memory_space<vmem>>, vector<1x12x32xf32>
    %22 = vector.shape_cast %21 : vector<1x12x32xf32> to vector<12x32xf32>
    %23 = vector.shape_cast %20 : vector<12x32xf32> to vector<1x12x32xf32>
    tpu.vector_store %arg5[%c0_20, %c0_21, %c0_22], %23 {strides = array<i32>} : memref<1x12x32xf32, #tpu.memory_space<vmem>>, vector<1x12x32xf32>,
    return
  }
  func.func @transform_0(%arg0: i32, %arg1: i32) -> (i32, i32, i32, i32) {
    %c0_i32 = arith.constant 0 : i32
    %c0_i32_0 = arith.constant 0 : i32
    %c0_i32_1 = arith.constant 0 : i32
    return %arg0, %c0_i32, %c0_i32_0, %arg1 : i32, i32, i32, i32
  }
  func.func @transform_1(%arg0: i32, %arg1: i32) -> (i32, i32) {
    %c0_i32 = arith.constant 0 : i32
    %c0_i32_0 = arith.constant 0 : i32
    %c0_i32_1 = arith.constant 0 : i32
    return %c0_i32, %c0_i32_0 : i32, i32
  }
  func.func @transform_2(%arg0: i32, %arg1: i32) -> (i32, i32) {
    %c0_i32 = arith.constant 0 : i32
    %c0_i32_0 = arith.constant 0 : i32
    %c0_i32_1 = arith.constant 0 : i32
    return %c0_i32, %c0_i32_0 : i32, i32
  }
  func.func @transform_3(%arg0: i32, %arg1: i32) -> (i32, i32, i32) {
    %c0_i32 = arith.constant 0 : i32
    %c0_i32_0 = arith.constant 0 : i32
    return %arg0, %c0_i32, %arg1 : i32, i32, i32
  }
}

module attributes {stable_mosaic.version = 11 : i64} {
  func.func @_matmul_bias_kernel(%arg0: i32, %arg1: i32, %arg2: i32, %arg3: memref<16x48xbf16, #tpu.memory_space<vmem>>, %arg4: memref<48x384xbf16, #tpu.memory_space<vmem>>, %arg5: memref<1x384xf32, #tpu.memory_space<vmem>>, %arg6: memref<16x384xf32, #tpu.memory_space<vmem>>, %arg7: memref<16x384xf32, #tpu.memory_space<vmem>>) attributes {dimension_semantics = [#tpu.dimension_semantics<parallel>, #tpu.dimension_semantics<parallel>, #tpu.dimension_semantics<arbitrary>], iteration_bounds = array<i64: 1, 2, 1>, scalar_prefetch = 0 : i64, scratch_operands = 1 : i64, tpu.core_type = #tpu.core_type<tc>, window_params = [{transform_indices = @transform_0, window_bounds = array<i64: 16, 48>}, {transform_indices = @transform_1, window_bounds = array<i64: 48, 384>}, {transform_indices = @transform_2, window_bounds = array<i64: 1, 384>}, {transform_indices = @transform_3, window_bounds = array<i64: 16, 384>}]} {
    %c0_i32 = arith.constant 0 : i32
    %0 = arith.cmpi eq, %arg2, %c0_i32 : i32
    %1 = arith.extui %0 : i1 to i32
    %c0_i32_0 = arith.constant 0 : i32
    %2 = arith.cmpi ne, %1, %c0_i32_0 : i32
    scf.if %2 {
      %cst_10 = arith.constant 0.000000e+00 : f32
      %12 = vector.broadcast %cst_10 : f32 to vector<16x384xf32>
      %c0_11 = arith.constant 0 : index
      %c0_12 = arith.constant 0 : index
      %13 = vector.load %arg7[%c0_11, %c0_12] : memref<16x384xf32, #tpu.memory_space<vmem>>, vector<16x384xf32>
      tpu.vector_store %arg7[%c0_11, %c0_12], %12 {strides = array<i32>} : memref<16x384xf32, #tpu.memory_space<vmem>>, vector<16x384xf32>,
    } else {
    }
    %c0 = arith.constant 0 : index
    %c0_1 = arith.constant 0 : index
    %3 = vector.load %arg7[%c0, %c0_1] : memref<16x384xf32, #tpu.memory_space<vmem>>, vector<16x384xf32>
    %c0_2 = arith.constant 0 : index
    %c0_3 = arith.constant 0 : index
    %4 = vector.load %arg3[%c0_2, %c0_3] : memref<16x48xbf16, #tpu.memory_space<vmem>>, vector<16x48xbf16>
    %c0_4 = arith.constant 0 : index
    %c0_5 = arith.constant 0 : index
    %5 = vector.load %arg4[%c0_4, %c0_5] : memref<48x384xbf16, #tpu.memory_space<vmem>>, vector<48x384xbf16>
    %cst = arith.constant dense<0.000000e+00> : vector<16x384xf32>
    %6 = tpu.matmul %4, %5, %cst {dimension_numbers = #tpu.dot_dimension_numbers<[1], [0], [0], [1], [0, 0, 1, 1], [], []>} : vector<16x48xbf16>, vector<48x384xbf16>, vector<16x384xf32> -> vector<16x384xf32>
    %7 = arith.addf %3, %6 : vector<16x384xf32>
    %c0_6 = arith.constant 0 : index
    %c0_7 = arith.constant 0 : index
    %8 = vector.load %arg7[%c0_6, %c0_7] : memref<16x384xf32, #tpu.memory_space<vmem>>, vector<16x384xf32>
    tpu.vector_store %arg7[%c0_6, %c0_7], %7 {strides = array<i32>} : memref<16x384xf32, #tpu.memory_space<vmem>>, vector<16x384xf32>,
    %c0_i32_8 = arith.constant 0 : i32
    %9 = arith.cmpi eq, %arg2, %c0_i32_8 : i32
    %10 = arith.extui %9 : i1 to i32
    %c0_i32_9 = arith.constant 0 : i32
    %11 = arith.cmpi ne, %10, %c0_i32_9 : i32
    scf.if %11 {
      %c0_10 = arith.constant 0 : index
      %c0_11 = arith.constant 0 : index
      %12 = vector.load %arg7[%c0_10, %c0_11] : memref<16x384xf32, #tpu.memory_space<vmem>>, vector<16x384xf32>
      %c0_12 = arith.constant 0 : index
      %c0_13 = arith.constant 0 : index
      %13 = vector.load %arg5[%c0_12, %c0_13] : memref<1x384xf32, #tpu.memory_space<vmem>>, vector<1x384xf32>
      %14 = vector.broadcast %13 : vector<1x384xf32> to vector<16x384xf32>
      %15 = arith.addf %12, %14 : vector<16x384xf32>
      %c0_14 = arith.constant 0 : index
      %c0_15 = arith.constant 0 : index
      %16 = vector.load %arg6[%c0_14, %c0_15] : memref<16x384xf32, #tpu.memory_space<vmem>>, vector<16x384xf32>
      tpu.vector_store %arg6[%c0_14, %c0_15], %15 {strides = array<i32>} : memref<16x384xf32, #tpu.memory_space<vmem>>, vector<16x384xf32>,
    } else {
    }
    return
  }
  func.func @transform_0(%arg0: i32, %arg1: i32, %arg2: i32) -> (i32, i32) {
    %c0_i32 = arith.constant 0 : i32
    return %arg0, %arg2 : i32, i32
  }
  func.func @transform_1(%arg0: i32, %arg1: i32, %arg2: i32) -> (i32, i32) {
    %c0_i32 = arith.constant 0 : i32
    return %arg2, %arg1 : i32, i32
  }
  func.func @transform_2(%arg0: i32, %arg1: i32, %arg2: i32) -> (i32, i32) {
    %c0_i32 = arith.constant 0 : i32
    %c0_i32_0 = arith.constant 0 : i32
    return %c0_i32, %arg1 : i32, i32
  }
  func.func @transform_3(%arg0: i32, %arg1: i32, %arg2: i32) -> (i32, i32) {
    %c0_i32 = arith.constant 0 : i32
    return %arg0, %arg1 : i32, i32
  }
}

module attributes {stable_mosaic.version = 11 : i64} {
  func.func @_gru_recurrence_kernel(%arg0: i32, %arg1: memref<8x2x384xf32, #tpu.memory_space<vmem>>, %arg2: memref<128x384xf32, #tpu.memory_space<vmem>>, %arg3: memref<1x384xf32, #tpu.memory_space<vmem>>, %arg4: memref<8x2x128xf32, #tpu.memory_space<vmem>>) attributes {dimension_semantics = [#tpu.dimension_semantics<parallel>], iteration_bounds = array<i64: 2>, scalar_prefetch = 0 : i64, scratch_operands = 0 : i64, tpu.core_type = #tpu.core_type<tc>, window_params = [{transform_indices = @transform_0, window_bounds = array<i64: 8, 2, 384>}, {transform_indices = @transform_1, window_bounds = array<i64: 128, 384>}, {transform_indices = @transform_2, window_bounds = array<i64: 1, 384>}, {transform_indices = @transform_3, window_bounds = array<i64: 8, 2, 128>}]} {
    %c0 = arith.constant 0 : index
    %c0_0 = arith.constant 0 : index
    %0 = vector.load %arg2[%c0, %c0_0] : memref<128x384xf32, #tpu.memory_space<vmem>>, vector<128x384xf32>
    %c0_1 = arith.constant 0 : index
    %c0_2 = arith.constant 0 : index
    %1 = vector.load %arg3[%c0_1, %c0_2] : memref<1x384xf32, #tpu.memory_space<vmem>>, vector<1x384xf32>
    %cst = arith.constant 0.000000e+00 : f32
    %2 = vector.broadcast %cst : f32 to vector<2x128xf32>
    %c0_i32 = arith.constant 0 : i32
    %c0_i32_3 = arith.constant 0 : i32
    %3 = arith.cmpi eq, %arg0, %c0_i32_3 : i32
    %c7_i32 = arith.constant 7 : i32
    %4 = arith.subi %c7_i32, %c0_i32 : i32
    %5 = arith.select %3, %c0_i32, %4 : i32
    %6 = arith.index_cast %5 : i32 to index
    %c0_4 = arith.constant 0 : index
    %c0_5 = arith.constant 0 : index
    %7 = vector.load %arg1[%6, %c0_4, %c0_5] : memref<8x2x384xf32, #tpu.memory_space<vmem>>, vector<1x2x384xf32>
    %8 = vector.shape_cast %7 : vector<1x2x384xf32> to vector<2x384xf32>
    %cst_6 = arith.constant dense<0.000000e+00> : vector<2x384xf32>
    %9 = tpu.matmul %2, %0, %cst_6 {dimension_numbers = #tpu.dot_dimension_numbers<[1], [0], [0], [1], [0, 0, 1, 1], [], []>} : vector<2x128xf32>, vector<128x384xf32>, vector<2x384xf32> -> vector<2x384xf32>
    %10 = vector.broadcast %1 : vector<1x384xf32> to vector<2x384xf32>
    %11 = arith.addf %9, %10 : vector<2x384xf32>
    %12 = vector.extract_strided_slice %8 {offsets = [0, 0], sizes = [2, 128], strides = [1, 1]} : vector<2x384xf32> to vector<2x128xf32>
    %13 = vector.extract_strided_slice %11 {offsets = [0, 0], sizes = [2, 128], strides = [1, 1]} : vector<2x384xf32> to vector<2x128xf32>
    %14 = arith.addf %12, %13 : vector<2x128xf32>
    %15 = arith.negf %14 : vector<2x128xf32>
    %16 = math.exp %15 : vector<2x128xf32>
    %cst_7 = arith.constant 1.000000e+00 : f32
    %17 = vector.broadcast %cst_7 : f32 to vector<2x128xf32>
    %18 = arith.addf %17, %16 : vector<2x128xf32>
    %19 = arith.divf %17, %18 : vector<2x128xf32>
    %20 = vector.extract_strided_slice %8 {offsets = [0, 128], sizes = [2, 128], strides = [1, 1]} : vector<2x384xf32> to vector<2x128xf32>
    %21 = vector.extract_strided_slice %11 {offsets = [0, 128], sizes = [2, 128], strides = [1, 1]} : vector<2x384xf32> to vector<2x128xf32>
    %22 = arith.addf %20, %21 : vector<2x128xf32>
    %23 = arith.negf %22 : vector<2x128xf32>
    %24 = math.exp %23 : vector<2x128xf32>
    %cst_8 = arith.constant 1.000000e+00 : f32
    %25 = vector.broadcast %cst_8 : f32 to vector<2x128xf32>
    %26 = arith.addf %25, %24 : vector<2x128xf32>
    %27 = arith.divf %25, %26 : vector<2x128xf32>
    %28 = vector.extract_strided_slice %8 {offsets = [0, 256], sizes = [2, 128], strides = [1, 1]} : vector<2x384xf32> to vector<2x128xf32>
    %29 = vector.extract_strided_slice %11 {offsets = [0, 256], sizes = [2, 128], strides = [1, 1]} : vector<2x384xf32> to vector<2x128xf32>
    %30 = arith.mulf %19, %29 : vector<2x128xf32>
    %31 = arith.addf %28, %30 : vector<2x128xf32>
    %32 = math.tanh %31 : vector<2x128xf32>
    %cst_9 = arith.constant 1.000000e+00 : f32
    %33 = vector.broadcast %cst_9 : f32 to vector<2x128xf32>
    %34 = arith.subf %33, %27 : vector<2x128xf32>
    %35 = arith.mulf %34, %32 : vector<2x128xf32>
    %36 = arith.mulf %27, %2 : vector<2x128xf32>
    %37 = arith.addf %35, %36 : vector<2x128xf32>
    %38 = arith.index_cast %5 : i32 to index
    %c0_10 = arith.constant 0 : index
    %c0_11 = arith.constant 0 : index
    %39 = vector.load %arg4[%38, %c0_10, %c0_11] : memref<8x2x128xf32, #tpu.memory_space<vmem>>, vector<1x2x128xf32>
    %40 = vector.shape_cast %39 : vector<1x2x128xf32> to vector<2x128xf32>
    %41 = vector.shape_cast %37 : vector<2x128xf32> to vector<1x2x128xf32>
    tpu.vector_store %arg4[%38, %c0_10, %c0_11], %41 {strides = array<i32>} : memref<8x2x128xf32, #tpu.memory_space<vmem>>, vector<1x2x128xf32>,
    %c1_i32 = arith.constant 1 : i32
    %c0_i32_12 = arith.constant 0 : i32
    %42 = arith.cmpi eq, %arg0, %c0_i32_12 : i32
    %c7_i32_13 = arith.constant 7 : i32
    %43 = arith.subi %c7_i32_13, %c1_i32 : i32
    %44 = arith.select %42, %c1_i32, %43 : i32
    %45 = arith.index_cast %44 : i32 to index
    %c0_14 = arith.constant 0 : index
    %c0_15 = arith.constant 0 : index
    %46 = vector.load %arg1[%45, %c0_14, %c0_15] : memref<8x2x384xf32, #tpu.memory_space<vmem>>, vector<1x2x384xf32>
    %47 = vector.shape_cast %46 : vector<1x2x384xf32> to vector<2x384xf32>
    %cst_16 = arith.constant dense<0.000000e+00> : vector<2x384xf32>
    %48 = tpu.matmul %37, %0, %cst_16 {dimension_numbers = #tpu.dot_dimension_numbers<[1], [0], [0], [1], [0, 0, 1, 1], [], []>} : vector<2x128xf32>, vector<128x384xf32>, vector<2x384xf32> -> vector<2x384xf32>
    %49 = vector.broadcast %1 : vector<1x384xf32> to vector<2x384xf32>
    %50 = arith.addf %48, %49 : vector<2x384xf32>
    %51 = vector.extract_strided_slice %47 {offsets = [0, 0], sizes = [2, 128], strides = [1, 1]} : vector<2x384xf32> to vector<2x128xf32>
    %52 = vector.extract_strided_slice %50 {offsets = [0, 0], sizes = [2, 128], strides = [1, 1]} : vector<2x384xf32> to vector<2x128xf32>
    %53 = arith.addf %51, %52 : vector<2x128xf32>
    %54 = arith.negf %53 : vector<2x128xf32>
    %55 = math.exp %54 : vector<2x128xf32>
    %cst_17 = arith.constant 1.000000e+00 : f32
    %56 = vector.broadcast %cst_17 : f32 to vector<2x128xf32>
    %57 = arith.addf %56, %55 : vector<2x128xf32>
    %58 = arith.divf %56, %57 : vector<2x128xf32>
    %59 = vector.extract_strided_slice %47 {offsets = [0, 128], sizes = [2, 128], strides = [1, 1]} : vector<2x384xf32> to vector<2x128xf32>
    %60 = vector.extract_strided_slice %50 {offsets = [0, 128], sizes = [2, 128], strides = [1, 1]} : vector<2x384xf32> to vector<2x128xf32>
    %61 = arith.addf %59, %60 : vector<2x128xf32>
    %62 = arith.negf %61 : vector<2x128xf32>
    %63 = math.exp %62 : vector<2x128xf32>
    %cst_18 = arith.constant 1.000000e+00 : f32
    %64 = vector.broadcast %cst_18 : f32 to vector<2x128xf32>
    %65 = arith.addf %64, %63 : vector<2x128xf32>
    %66 = arith.divf %64, %65 : vector<2x128xf32>
    %67 = vector.extract_strided_slice %47 {offsets = [0, 256], sizes = [2, 128], strides = [1, 1]} : vector<2x384xf32> to vector<2x128xf32>
    %68 = vector.extract_strided_slice %50 {offsets = [0, 256], sizes = [2, 128], strides = [1, 1]} : vector<2x384xf32> to vector<2x128xf32>
    %69 = arith.mulf %58, %68 : vector<2x128xf32>
    %70 = arith.addf %67, %69 : vector<2x128xf32>
    %71 = math.tanh %70 : vector<2x128xf32>
    %cst_19 = arith.constant 1.000000e+00 : f32
    %72 = vector.broadcast %cst_19 : f32 to vector<2x128xf32>
    %73 = arith.subf %72, %66 : vector<2x128xf32>
    %74 = arith.mulf %73, %71 : vector<2x128xf32>
    %75 = arith.mulf %66, %37 : vector<2x128xf32>
    %76 = arith.addf %74, %75 : vector<2x128xf32>
    %77 = arith.index_cast %44 : i32 to index
    %c0_20 = arith.constant 0 : index
    %c0_21 = arith.constant 0 : index
    %78 = vector.load %arg4[%77, %c0_20, %c0_21] : memref<8x2x128xf32, #tpu.memory_space<vmem>>, vector<1x2x128xf32>
    %79 = vector.shape_cast %78 : vector<1x2x128xf32> to vector<2x128xf32>
    %80 = vector.shape_cast %76 : vector<2x128xf32> to vector<1x2x128xf32>
    tpu.vector_store %arg4[%77, %c0_20, %c0_21], %80 {strides = array<i32>} : memref<8x2x128xf32, #tpu.memory_space<vmem>>, vector<1x2x128xf32>,
    %c2_i32 = arith.constant 2 : i32
    %c0_i32_22 = arith.constant 0 : i32
    %81 = arith.cmpi eq, %arg0, %c0_i32_22 : i32
    %c7_i32_23 = arith.constant 7 : i32
    %82 = arith.subi %c7_i32_23, %c2_i32 : i32
    %83 = arith.select %81, %c2_i32, %82 : i32
    %84 = arith.index_cast %83 : i32 to index
    %c0_24 = arith.constant 0 : index
    %c0_25 = arith.constant 0 : index
    %85 = vector.load %arg1[%84, %c0_24, %c0_25] : memref<8x2x384xf32, #tpu.memory_space<vmem>>, vector<1x2x384xf32>
    %86 = vector.shape_cast %85 : vector<1x2x384xf32> to vector<2x384xf32>
    %cst_26 = arith.constant dense<0.000000e+00> : vector<2x384xf32>
    %87 = tpu.matmul %76, %0, %cst_26 {dimension_numbers = #tpu.dot_dimension_numbers<[1], [0], [0], [1], [0, 0, 1, 1], [], []>} : vector<2x128xf32>, vector<128x384xf32>, vector<2x384xf32> -> vector<2x384xf32>
    %88 = vector.broadcast %1 : vector<1x384xf32> to vector<2x384xf32>
    %89 = arith.addf %87, %88 : vector<2x384xf32>
    %90 = vector.extract_strided_slice %86 {offsets = [0, 0], sizes = [2, 128], strides = [1, 1]} : vector<2x384xf32> to vector<2x128xf32>
    %91 = vector.extract_strided_slice %89 {offsets = [0, 0], sizes = [2, 128], strides = [1, 1]} : vector<2x384xf32> to vector<2x128xf32>
    %92 = arith.addf %90, %91 : vector<2x128xf32>
    %93 = arith.negf %92 : vector<2x128xf32>
    %94 = math.exp %93 : vector<2x128xf32>
    %cst_27 = arith.constant 1.000000e+00 : f32
    %95 = vector.broadcast %cst_27 : f32 to vector<2x128xf32>
    %96 = arith.addf %95, %94 : vector<2x128xf32>
    %97 = arith.divf %95, %96 : vector<2x128xf32>
    %98 = vector.extract_strided_slice %86 {offsets = [0, 128], sizes = [2, 128], strides = [1, 1]} : vector<2x384xf32> to vector<2x128xf32>
    %99 = vector.extract_strided_slice %89 {offsets = [0, 128], sizes = [2, 128], strides = [1, 1]} : vector<2x384xf32> to vector<2x128xf32>
    %100 = arith.addf %98, %99 : vector<2x128xf32>
    %101 = arith.negf %100 : vector<2x128xf32>
    %102 = math.exp %101 : vector<2x128xf32>
    %cst_28 = arith.constant 1.000000e+00 : f32
    %103 = vector.broadcast %cst_28 : f32 to vector<2x128xf32>
    %104 = arith.addf %103, %102 : vector<2x128xf32>
    %105 = arith.divf %103, %104 : vector<2x128xf32>
    %106 = vector.extract_strided_slice %86 {offsets = [0, 256], sizes = [2, 128], strides = [1, 1]} : vector<2x384xf32> to vector<2x128xf32>
    %107 = vector.extract_strided_slice %89 {offsets = [0, 256], sizes = [2, 128], strides = [1, 1]} : vector<2x384xf32> to vector<2x128xf32>
    %108 = arith.mulf %97, %107 : vector<2x128xf32>
    %109 = arith.addf %106, %108 : vector<2x128xf32>
    %110 = math.tanh %109 : vector<2x128xf32>
    %cst_29 = arith.constant 1.000000e+00 : f32
    %111 = vector.broadcast %cst_29 : f32 to vector<2x128xf32>
    %112 = arith.subf %111, %105 : vector<2x128xf32>
    %113 = arith.mulf %112, %110 : vector<2x128xf32>
    %114 = arith.mulf %105, %76 : vector<2x128xf32>
    %115 = arith.addf %113, %114 : vector<2x128xf32>
    %116 = arith.index_cast %83 : i32 to index
    %c0_30 = arith.constant 0 : index
    %c0_31 = arith.constant 0 : index
    %117 = vector.load %arg4[%116, %c0_30, %c0_31] : memref<8x2x128xf32, #tpu.memory_space<vmem>>, vector<1x2x128xf32>
    %118 = vector.shape_cast %117 : vector<1x2x128xf32> to vector<2x128xf32>
    %119 = vector.shape_cast %115 : vector<2x128xf32> to vector<1x2x128xf32>
    tpu.vector_store %arg4[%116, %c0_30, %c0_31], %119 {strides = array<i32>} : memref<8x2x128xf32, #tpu.memory_space<vmem>>, vector<1x2x128xf32>,
    %c3_i32 = arith.constant 3 : i32
    %c0_i32_32 = arith.constant 0 : i32
    %120 = arith.cmpi eq, %arg0, %c0_i32_32 : i32
    %c7_i32_33 = arith.constant 7 : i32
    %121 = arith.subi %c7_i32_33, %c3_i32 : i32
    %122 = arith.select %120, %c3_i32, %121 : i32
    %123 = arith.index_cast %122 : i32 to index
    %c0_34 = arith.constant 0 : index
    %c0_35 = arith.constant 0 : index
    %124 = vector.load %arg1[%123, %c0_34, %c0_35] : memref<8x2x384xf32, #tpu.memory_space<vmem>>, vector<1x2x384xf32>
    %125 = vector.shape_cast %124 : vector<1x2x384xf32> to vector<2x384xf32>
    %cst_36 = arith.constant dense<0.000000e+00> : vector<2x384xf32>
    %126 = tpu.matmul %115, %0, %cst_36 {dimension_numbers = #tpu.dot_dimension_numbers<[1], [0], [0], [1], [0, 0, 1, 1], [], []>} : vector<2x128xf32>, vector<128x384xf32>, vector<2x384xf32> -> vector<2x384xf32>
    %127 = vector.broadcast %1 : vector<1x384xf32> to vector<2x384xf32>
    %128 = arith.addf %126, %127 : vector<2x384xf32>
    %129 = vector.extract_strided_slice %125 {offsets = [0, 0], sizes = [2, 128], strides = [1, 1]} : vector<2x384xf32> to vector<2x128xf32>
    %130 = vector.extract_strided_slice %128 {offsets = [0, 0], sizes = [2, 128], strides = [1, 1]} : vector<2x384xf32> to vector<2x128xf32>
    %131 = arith.addf %129, %130 : vector<2x128xf32>
    %132 = arith.negf %131 : vector<2x128xf32>
    %133 = math.exp %132 : vector<2x128xf32>
    %cst_37 = arith.constant 1.000000e+00 : f32
    %134 = vector.broadcast %cst_37 : f32 to vector<2x128xf32>
    %135 = arith.addf %134, %133 : vector<2x128xf32>
    %136 = arith.divf %134, %135 : vector<2x128xf32>
    %137 = vector.extract_strided_slice %125 {offsets = [0, 128], sizes = [2, 128], strides = [1, 1]} : vector<2x384xf32> to vector<2x128xf32>
    %138 = vector.extract_strided_slice %128 {offsets = [0, 128], sizes = [2, 128], strides = [1, 1]} : vector<2x384xf32> to vector<2x128xf32>
    %139 = arith.addf %137, %138 : vector<2x128xf32>
    %140 = arith.negf %139 : vector<2x128xf32>
    %141 = math.exp %140 : vector<2x128xf32>
    %cst_38 = arith.constant 1.000000e+00 : f32
    %142 = vector.broadcast %cst_38 : f32 to vector<2x128xf32>
    %143 = arith.addf %142, %141 : vector<2x128xf32>
    %144 = arith.divf %142, %143 : vector<2x128xf32>
    %145 = vector.extract_strided_slice %125 {offsets = [0, 256], sizes = [2, 128], strides = [1, 1]} : vector<2x384xf32> to vector<2x128xf32>
    %146 = vector.extract_strided_slice %128 {offsets = [0, 256], sizes = [2, 128], strides = [1, 1]} : vector<2x384xf32> to vector<2x128xf32>
    %147 = arith.mulf %136, %146 : vector<2x128xf32>
    %148 = arith.addf %145, %147 : vector<2x128xf32>
    %149 = math.tanh %148 : vector<2x128xf32>
    %cst_39 = arith.constant 1.000000e+00 : f32
    %150 = vector.broadcast %cst_39 : f32 to vector<2x128xf32>
    %151 = arith.subf %150, %144 : vector<2x128xf32>
    %152 = arith.mulf %151, %149 : vector<2x128xf32>
    %153 = arith.mulf %144, %115 : vector<2x128xf32>
    %154 = arith.addf %152, %153 : vector<2x128xf32>
    %155 = arith.index_cast %122 : i32 to index
    %c0_40 = arith.constant 0 : index
    %c0_41 = arith.constant 0 : index
    %156 = vector.load %arg4[%155, %c0_40, %c0_41] : memref<8x2x128xf32, #tpu.memory_space<vmem>>, vector<1x2x128xf32>
    %157 = vector.shape_cast %156 : vector<1x2x128xf32> to vector<2x128xf32>
    %158 = vector.shape_cast %154 : vector<2x128xf32> to vector<1x2x128xf32>
    tpu.vector_store %arg4[%155, %c0_40, %c0_41], %158 {strides = array<i32>} : memref<8x2x128xf32, #tpu.memory_space<vmem>>, vector<1x2x128xf32>,
    %c4_i32 = arith.constant 4 : i32
    %c0_i32_42 = arith.constant 0 : i32
    %159 = arith.cmpi eq, %arg0, %c0_i32_42 : i32
    %c7_i32_43 = arith.constant 7 : i32
    %160 = arith.subi %c7_i32_43, %c4_i32 : i32
    %161 = arith.select %159, %c4_i32, %160 : i32
    %162 = arith.index_cast %161 : i32 to index
    %c0_44 = arith.constant 0 : index
    %c0_45 = arith.constant 0 : index
    %163 = vector.load %arg1[%162, %c0_44, %c0_45] : memref<8x2x384xf32, #tpu.memory_space<vmem>>, vector<1x2x384xf32>
    %164 = vector.shape_cast %163 : vector<1x2x384xf32> to vector<2x384xf32>
    %cst_46 = arith.constant dense<0.000000e+00> : vector<2x384xf32>
    %165 = tpu.matmul %154, %0, %cst_46 {dimension_numbers = #tpu.dot_dimension_numbers<[1], [0], [0], [1], [0, 0, 1, 1], [], []>} : vector<2x128xf32>, vector<128x384xf32>, vector<2x384xf32> -> vector<2x384xf32>
    %166 = vector.broadcast %1 : vector<1x384xf32> to vector<2x384xf32>
    %167 = arith.addf %165, %166 : vector<2x384xf32>
    %168 = vector.extract_strided_slice %164 {offsets = [0, 0], sizes = [2, 128], strides = [1, 1]} : vector<2x384xf32> to vector<2x128xf32>
    %169 = vector.extract_strided_slice %167 {offsets = [0, 0], sizes = [2, 128], strides = [1, 1]} : vector<2x384xf32> to vector<2x128xf32>
    %170 = arith.addf %168, %169 : vector<2x128xf32>
    %171 = arith.negf %170 : vector<2x128xf32>
    %172 = math.exp %171 : vector<2x128xf32>
    %cst_47 = arith.constant 1.000000e+00 : f32
    %173 = vector.broadcast %cst_47 : f32 to vector<2x128xf32>
    %174 = arith.addf %173, %172 : vector<2x128xf32>
    %175 = arith.divf %173, %174 : vector<2x128xf32>
    %176 = vector.extract_strided_slice %164 {offsets = [0, 128], sizes = [2, 128], strides = [1, 1]} : vector<2x384xf32> to vector<2x128xf32>
    %177 = vector.extract_strided_slice %167 {offsets = [0, 128], sizes = [2, 128], strides = [1, 1]} : vector<2x384xf32> to vector<2x128xf32>
    %178 = arith.addf %176, %177 : vector<2x128xf32>
    %179 = arith.negf %178 : vector<2x128xf32>
    %180 = math.exp %179 : vector<2x128xf32>
    %cst_48 = arith.constant 1.000000e+00 : f32
    %181 = vector.broadcast %cst_48 : f32 to vector<2x128xf32>
    %182 = arith.addf %181, %180 : vector<2x128xf32>
    %183 = arith.divf %181, %182 : vector<2x128xf32>
    %184 = vector.extract_strided_slice %164 {offsets = [0, 256], sizes = [2, 128], strides = [1, 1]} : vector<2x384xf32> to vector<2x128xf32>
    %185 = vector.extract_strided_slice %167 {offsets = [0, 256], sizes = [2, 128], strides = [1, 1]} : vector<2x384xf32> to vector<2x128xf32>
    %186 = arith.mulf %175, %185 : vector<2x128xf32>
    %187 = arith.addf %184, %186 : vector<2x128xf32>
    %188 = math.tanh %187 : vector<2x128xf32>
    %cst_49 = arith.constant 1.000000e+00 : f32
    %189 = vector.broadcast %cst_49 : f32 to vector<2x128xf32>
    %190 = arith.subf %189, %183 : vector<2x128xf32>
    %191 = arith.mulf %190, %188 : vector<2x128xf32>
    %192 = arith.mulf %183, %154 : vector<2x128xf32>
    %193 = arith.addf %191, %192 : vector<2x128xf32>
    %194 = arith.index_cast %161 : i32 to index
    %c0_50 = arith.constant 0 : index
    %c0_51 = arith.constant 0 : index
    %195 = vector.load %arg4[%194, %c0_50, %c0_51] : memref<8x2x128xf32, #tpu.memory_space<vmem>>, vector<1x2x128xf32>
    %196 = vector.shape_cast %195 : vector<1x2x128xf32> to vector<2x128xf32>
    %197 = vector.shape_cast %193 : vector<2x128xf32> to vector<1x2x128xf32>
    tpu.vector_store %arg4[%194, %c0_50, %c0_51], %197 {strides = array<i32>} : memref<8x2x128xf32, #tpu.memory_space<vmem>>, vector<1x2x128xf32>,
    %c5_i32 = arith.constant 5 : i32
    %c0_i32_52 = arith.constant 0 : i32
    %198 = arith.cmpi eq, %arg0, %c0_i32_52 : i32
    %c7_i32_53 = arith.constant 7 : i32
    %199 = arith.subi %c7_i32_53, %c5_i32 : i32
    %200 = arith.select %198, %c5_i32, %199 : i32
    %201 = arith.index_cast %200 : i32 to index
    %c0_54 = arith.constant 0 : index
    %c0_55 = arith.constant 0 : index
    %202 = vector.load %arg1[%201, %c0_54, %c0_55] : memref<8x2x384xf32, #tpu.memory_space<vmem>>, vector<1x2x384xf32>
    %203 = vector.shape_cast %202 : vector<1x2x384xf32> to vector<2x384xf32>
    %cst_56 = arith.constant dense<0.000000e+00> : vector<2x384xf32>
    %204 = tpu.matmul %193, %0, %cst_56 {dimension_numbers = #tpu.dot_dimension_numbers<[1], [0], [0], [1], [0, 0, 1, 1], [], []>} : vector<2x128xf32>, vector<128x384xf32>, vector<2x384xf32> -> vector<2x384xf32>
    %205 = vector.broadcast %1 : vector<1x384xf32> to vector<2x384xf32>
    %206 = arith.addf %204, %205 : vector<2x384xf32>
    %207 = vector.extract_strided_slice %203 {offsets = [0, 0], sizes = [2, 128], strides = [1, 1]} : vector<2x384xf32> to vector<2x128xf32>
    %208 = vector.extract_strided_slice %206 {offsets = [0, 0], sizes = [2, 128], strides = [1, 1]} : vector<2x384xf32> to vector<2x128xf32>
    %209 = arith.addf %207, %208 : vector<2x128xf32>
    %210 = arith.negf %209 : vector<2x128xf32>
    %211 = math.exp %210 : vector<2x128xf32>
    %cst_57 = arith.constant 1.000000e+00 : f32
    %212 = vector.broadcast %cst_57 : f32 to vector<2x128xf32>
    %213 = arith.addf %212, %211 : vector<2x128xf32>
    %214 = arith.divf %212, %213 : vector<2x128xf32>
    %215 = vector.extract_strided_slice %203 {offsets = [0, 128], sizes = [2, 128], strides = [1, 1]} : vector<2x384xf32> to vector<2x128xf32>
    %216 = vector.extract_strided_slice %206 {offsets = [0, 128], sizes = [2, 128], strides = [1, 1]} : vector<2x384xf32> to vector<2x128xf32>
    %217 = arith.addf %215, %216 : vector<2x128xf32>
    %218 = arith.negf %217 : vector<2x128xf32>
    %219 = math.exp %218 : vector<2x128xf32>
    %cst_58 = arith.constant 1.000000e+00 : f32
    %220 = vector.broadcast %cst_58 : f32 to vector<2x128xf32>
    %221 = arith.addf %220, %219 : vector<2x128xf32>
    %222 = arith.divf %220, %221 : vector<2x128xf32>
    %223 = vector.extract_strided_slice %203 {offsets = [0, 256], sizes = [2, 128], strides = [1, 1]} : vector<2x384xf32> to vector<2x128xf32>
    %224 = vector.extract_strided_slice %206 {offsets = [0, 256], sizes = [2, 128], strides = [1, 1]} : vector<2x384xf32> to vector<2x128xf32>
    %225 = arith.mulf %214, %224 : vector<2x128xf32>
    %226 = arith.addf %223, %225 : vector<2x128xf32>
    %227 = math.tanh %226 : vector<2x128xf32>
    %cst_59 = arith.constant 1.000000e+00 : f32
    %228 = vector.broadcast %cst_59 : f32 to vector<2x128xf32>
    %229 = arith.subf %228, %222 : vector<2x128xf32>
    %230 = arith.mulf %229, %227 : vector<2x128xf32>
    %231 = arith.mulf %222, %193 : vector<2x128xf32>
    %232 = arith.addf %230, %231 : vector<2x128xf32>
    %233 = arith.index_cast %200 : i32 to index
    %c0_60 = arith.constant 0 : index
    %c0_61 = arith.constant 0 : index
    %234 = vector.load %arg4[%233, %c0_60, %c0_61] : memref<8x2x128xf32, #tpu.memory_space<vmem>>, vector<1x2x128xf32>
    %235 = vector.shape_cast %234 : vector<1x2x128xf32> to vector<2x128xf32>
    %236 = vector.shape_cast %232 : vector<2x128xf32> to vector<1x2x128xf32>
    tpu.vector_store %arg4[%233, %c0_60, %c0_61], %236 {strides = array<i32>} : memref<8x2x128xf32, #tpu.memory_space<vmem>>, vector<1x2x128xf32>,
    %c6_i32 = arith.constant 6 : i32
    %c0_i32_62 = arith.constant 0 : i32
    %237 = arith.cmpi eq, %arg0, %c0_i32_62 : i32
    %c7_i32_63 = arith.constant 7 : i32
    %238 = arith.subi %c7_i32_63, %c6_i32 : i32
    %239 = arith.select %237, %c6_i32, %238 : i32
    %240 = arith.index_cast %239 : i32 to index
    %c0_64 = arith.constant 0 : index
    %c0_65 = arith.constant 0 : index
    %241 = vector.load %arg1[%240, %c0_64, %c0_65] : memref<8x2x384xf32, #tpu.memory_space<vmem>>, vector<1x2x384xf32>
    %242 = vector.shape_cast %241 : vector<1x2x384xf32> to vector<2x384xf32>
    %cst_66 = arith.constant dense<0.000000e+00> : vector<2x384xf32>
    %243 = tpu.matmul %232, %0, %cst_66 {dimension_numbers = #tpu.dot_dimension_numbers<[1], [0], [0], [1], [0, 0, 1, 1], [], []>} : vector<2x128xf32>, vector<128x384xf32>, vector<2x384xf32> -> vector<2x384xf32>
    %244 = vector.broadcast %1 : vector<1x384xf32> to vector<2x384xf32>
    %245 = arith.addf %243, %244 : vector<2x384xf32>
    %246 = vector.extract_strided_slice %242 {offsets = [0, 0], sizes = [2, 128], strides = [1, 1]} : vector<2x384xf32> to vector<2x128xf32>
    %247 = vector.extract_strided_slice %245 {offsets = [0, 0], sizes = [2, 128], strides = [1, 1]} : vector<2x384xf32> to vector<2x128xf32>
    %248 = arith.addf %246, %247 : vector<2x128xf32>
    %249 = arith.negf %248 : vector<2x128xf32>
    %250 = math.exp %249 : vector<2x128xf32>
    %cst_67 = arith.constant 1.000000e+00 : f32
    %251 = vector.broadcast %cst_67 : f32 to vector<2x128xf32>
    %252 = arith.addf %251, %250 : vector<2x128xf32>
    %253 = arith.divf %251, %252 : vector<2x128xf32>
    %254 = vector.extract_strided_slice %242 {offsets = [0, 128], sizes = [2, 128], strides = [1, 1]} : vector<2x384xf32> to vector<2x128xf32>
    %255 = vector.extract_strided_slice %245 {offsets = [0, 128], sizes = [2, 128], strides = [1, 1]} : vector<2x384xf32> to vector<2x128xf32>
    %256 = arith.addf %254, %255 : vector<2x128xf32>
    %257 = arith.negf %256 : vector<2x128xf32>
    %258 = math.exp %257 : vector<2x128xf32>
    %cst_68 = arith.constant 1.000000e+00 : f32
    %259 = vector.broadcast %cst_68 : f32 to vector<2x128xf32>
    %260 = arith.addf %259, %258 : vector<2x128xf32>
    %261 = arith.divf %259, %260 : vector<2x128xf32>
    %262 = vector.extract_strided_slice %242 {offsets = [0, 256], sizes = [2, 128], strides = [1, 1]} : vector<2x384xf32> to vector<2x128xf32>
    %263 = vector.extract_strided_slice %245 {offsets = [0, 256], sizes = [2, 128], strides = [1, 1]} : vector<2x384xf32> to vector<2x128xf32>
    %264 = arith.mulf %253, %263 : vector<2x128xf32>
    %265 = arith.addf %262, %264 : vector<2x128xf32>
    %266 = math.tanh %265 : vector<2x128xf32>
    %cst_69 = arith.constant 1.000000e+00 : f32
    %267 = vector.broadcast %cst_69 : f32 to vector<2x128xf32>
    %268 = arith.subf %267, %261 : vector<2x128xf32>
    %269 = arith.mulf %268, %266 : vector<2x128xf32>
    %270 = arith.mulf %261, %232 : vector<2x128xf32>
    %271 = arith.addf %269, %270 : vector<2x128xf32>
    %272 = arith.index_cast %239 : i32 to index
    %c0_70 = arith.constant 0 : index
    %c0_71 = arith.constant 0 : index
    %273 = vector.load %arg4[%272, %c0_70, %c0_71] : memref<8x2x128xf32, #tpu.memory_space<vmem>>, vector<1x2x128xf32>
    %274 = vector.shape_cast %273 : vector<1x2x128xf32> to vector<2x128xf32>
    %275 = vector.shape_cast %271 : vector<2x128xf32> to vector<1x2x128xf32>
    tpu.vector_store %arg4[%272, %c0_70, %c0_71], %275 {strides = array<i32>} : memref<8x2x128xf32, #tpu.memory_space<vmem>>, vector<1x2x128xf32>,
    %c7_i32_72 = arith.constant 7 : i32
    %c0_i32_73 = arith.constant 0 : i32
    %276 = arith.cmpi eq, %arg0, %c0_i32_73 : i32
    %c7_i32_74 = arith.constant 7 : i32
    %277 = arith.subi %c7_i32_74, %c7_i32_72 : i32
    %278 = arith.select %276, %c7_i32_72, %277 : i32
    %279 = arith.index_cast %278 : i32 to index
    %c0_75 = arith.constant 0 : index
    %c0_76 = arith.constant 0 : index
    %280 = vector.load %arg1[%279, %c0_75, %c0_76] : memref<8x2x384xf32, #tpu.memory_space<vmem>>, vector<1x2x384xf32>
    %281 = vector.shape_cast %280 : vector<1x2x384xf32> to vector<2x384xf32>
    %cst_77 = arith.constant dense<0.000000e+00> : vector<2x384xf32>
    %282 = tpu.matmul %271, %0, %cst_77 {dimension_numbers = #tpu.dot_dimension_numbers<[1], [0], [0], [1], [0, 0, 1, 1], [], []>} : vector<2x128xf32>, vector<128x384xf32>, vector<2x384xf32> -> vector<2x384xf32>
    %283 = vector.broadcast %1 : vector<1x384xf32> to vector<2x384xf32>
    %284 = arith.addf %282, %283 : vector<2x384xf32>
    %285 = vector.extract_strided_slice %281 {offsets = [0, 0], sizes = [2, 128], strides = [1, 1]} : vector<2x384xf32> to vector<2x128xf32>
    %286 = vector.extract_strided_slice %284 {offsets = [0, 0], sizes = [2, 128], strides = [1, 1]} : vector<2x384xf32> to vector<2x128xf32>
    %287 = arith.addf %285, %286 : vector<2x128xf32>
    %288 = arith.negf %287 : vector<2x128xf32>
    %289 = math.exp %288 : vector<2x128xf32>
    %cst_78 = arith.constant 1.000000e+00 : f32
    %290 = vector.broadcast %cst_78 : f32 to vector<2x128xf32>
    %291 = arith.addf %290, %289 : vector<2x128xf32>
    %292 = arith.divf %290, %291 : vector<2x128xf32>
    %293 = vector.extract_strided_slice %281 {offsets = [0, 128], sizes = [2, 128], strides = [1, 1]} : vector<2x384xf32> to vector<2x128xf32>
    %294 = vector.extract_strided_slice %284 {offsets = [0, 128], sizes = [2, 128], strides = [1, 1]} : vector<2x384xf32> to vector<2x128xf32>
    %295 = arith.addf %293, %294 : vector<2x128xf32>
    %296 = arith.negf %295 : vector<2x128xf32>
    %297 = math.exp %296 : vector<2x128xf32>
    %cst_79 = arith.constant 1.000000e+00 : f32
    %298 = vector.broadcast %cst_79 : f32 to vector<2x128xf32>
    %299 = arith.addf %298, %297 : vector<2x128xf32>
    %300 = arith.divf %298, %299 : vector<2x128xf32>
    %301 = vector.extract_strided_slice %281 {offsets = [0, 256], sizes = [2, 128], strides = [1, 1]} : vector<2x384xf32> to vector<2x128xf32>
    %302 = vector.extract_strided_slice %284 {offsets = [0, 256], sizes = [2, 128], strides = [1, 1]} : vector<2x384xf32> to vector<2x128xf32>
    %303 = arith.mulf %292, %302 : vector<2x128xf32>
    %304 = arith.addf %301, %303 : vector<2x128xf32>
    %305 = math.tanh %304 : vector<2x128xf32>
    %cst_80 = arith.constant 1.000000e+00 : f32
    %306 = vector.broadcast %cst_80 : f32 to vector<2x128xf32>
    %307 = arith.subf %306, %300 : vector<2x128xf32>
    %308 = arith.mulf %307, %305 : vector<2x128xf32>
    %309 = arith.mulf %300, %271 : vector<2x128xf32>
    %310 = arith.addf %308, %309 : vector<2x128xf32>
    %311 = arith.index_cast %278 : i32 to index
    %c0_81 = arith.constant 0 : index
    %c0_82 = arith.constant 0 : index
    %312 = vector.load %arg4[%311, %c0_81, %c0_82] : memref<8x2x128xf32, #tpu.memory_space<vmem>>, vector<1x2x128xf32>
    %313 = vector.shape_cast %312 : vector<1x2x128xf32> to vector<2x128xf32>
    %314 = vector.shape_cast %310 : vector<2x128xf32> to vector<1x2x128xf32>
    tpu.vector_store %arg4[%311, %c0_81, %c0_82], %314 {strides = array<i32>} : memref<8x2x128xf32, #tpu.memory_space<vmem>>, vector<1x2x128xf32>,
    %c8_i32 = arith.constant 8 : i32
    return
  }
  func.func @transform_0(%arg0: i32) -> (i32, i32, i32) {
    %c0_i32 = arith.constant 0 : i32
    %c0_i32_0 = arith.constant 0 : i32
    %c0_i32_1 = arith.constant 0 : i32
    return %c0_i32, %c0_i32_0, %arg0 : i32, i32, i32
  }
  func.func @transform_1(%arg0: i32) -> (i32, i32) {
    %c0_i32 = arith.constant 0 : i32
    %c0_i32_0 = arith.constant 0 : i32
    return %c0_i32, %arg0 : i32, i32
  }
  func.func @transform_2(%arg0: i32) -> (i32, i32) {
    %c0_i32 = arith.constant 0 : i32
    %c0_i32_0 = arith.constant 0 : i32
    return %c0_i32, %arg0 : i32, i32
  }
  func.func @transform_3(%arg0: i32) -> (i32, i32, i32) {
    %c0_i32 = arith.constant 0 : i32
    %c0_i32_0 = arith.constant 0 : i32
    %c0_i32_1 = arith.constant 0 : i32
    return %c0_i32, %c0_i32_0, %arg0 : i32, i32, i32
  }
}

module attributes {stable_mosaic.version = 11 : i64} {
  func.func @_matmul_bias_kernel(%arg0: i32, %arg1: i32, %arg2: i32, %arg3: memref<16x256xbf16, #tpu.memory_space<vmem>>, %arg4: memref<256x384xbf16, #tpu.memory_space<vmem>>, %arg5: memref<1x384xf32, #tpu.memory_space<vmem>>, %arg6: memref<16x384xf32, #tpu.memory_space<vmem>>, %arg7: memref<16x384xf32, #tpu.memory_space<vmem>>) attributes {dimension_semantics = [#tpu.dimension_semantics<parallel>, #tpu.dimension_semantics<parallel>, #tpu.dimension_semantics<arbitrary>], iteration_bounds = array<i64: 1, 2, 1>, scalar_prefetch = 0 : i64, scratch_operands = 1 : i64, tpu.core_type = #tpu.core_type<tc>, window_params = [{transform_indices = @transform_0, window_bounds = array<i64: 16, 256>}, {transform_indices = @transform_1, window_bounds = array<i64: 256, 384>}, {transform_indices = @transform_2, window_bounds = array<i64: 1, 384>}, {transform_indices = @transform_3, window_bounds = array<i64: 16, 384>}]} {
    %c0_i32 = arith.constant 0 : i32
    %0 = arith.cmpi eq, %arg2, %c0_i32 : i32
    %1 = arith.extui %0 : i1 to i32
    %c0_i32_0 = arith.constant 0 : i32
    %2 = arith.cmpi ne, %1, %c0_i32_0 : i32
    scf.if %2 {
      %cst_10 = arith.constant 0.000000e+00 : f32
      %12 = vector.broadcast %cst_10 : f32 to vector<16x384xf32>
      %c0_11 = arith.constant 0 : index
      %c0_12 = arith.constant 0 : index
      %13 = vector.load %arg7[%c0_11, %c0_12] : memref<16x384xf32, #tpu.memory_space<vmem>>, vector<16x384xf32>
      tpu.vector_store %arg7[%c0_11, %c0_12], %12 {strides = array<i32>} : memref<16x384xf32, #tpu.memory_space<vmem>>, vector<16x384xf32>,
    } else {
    }
    %c0 = arith.constant 0 : index
    %c0_1 = arith.constant 0 : index
    %3 = vector.load %arg7[%c0, %c0_1] : memref<16x384xf32, #tpu.memory_space<vmem>>, vector<16x384xf32>
    %c0_2 = arith.constant 0 : index
    %c0_3 = arith.constant 0 : index
    %4 = vector.load %arg3[%c0_2, %c0_3] : memref<16x256xbf16, #tpu.memory_space<vmem>>, vector<16x256xbf16>
    %c0_4 = arith.constant 0 : index
    %c0_5 = arith.constant 0 : index
    %5 = vector.load %arg4[%c0_4, %c0_5] : memref<256x384xbf16, #tpu.memory_space<vmem>>, vector<256x384xbf16>
    %cst = arith.constant dense<0.000000e+00> : vector<16x384xf32>
    %6 = tpu.matmul %4, %5, %cst {dimension_numbers = #tpu.dot_dimension_numbers<[1], [0], [0], [1], [0, 0, 1, 1], [], []>} : vector<16x256xbf16>, vector<256x384xbf16>, vector<16x384xf32> -> vector<16x384xf32>
    %7 = arith.addf %3, %6 : vector<16x384xf32>
    %c0_6 = arith.constant 0 : index
    %c0_7 = arith.constant 0 : index
    %8 = vector.load %arg7[%c0_6, %c0_7] : memref<16x384xf32, #tpu.memory_space<vmem>>, vector<16x384xf32>
    tpu.vector_store %arg7[%c0_6, %c0_7], %7 {strides = array<i32>} : memref<16x384xf32, #tpu.memory_space<vmem>>, vector<16x384xf32>,
    %c0_i32_8 = arith.constant 0 : i32
    %9 = arith.cmpi eq, %arg2, %c0_i32_8 : i32
    %10 = arith.extui %9 : i1 to i32
    %c0_i32_9 = arith.constant 0 : i32
    %11 = arith.cmpi ne, %10, %c0_i32_9 : i32
    scf.if %11 {
      %c0_10 = arith.constant 0 : index
      %c0_11 = arith.constant 0 : index
      %12 = vector.load %arg7[%c0_10, %c0_11] : memref<16x384xf32, #tpu.memory_space<vmem>>, vector<16x384xf32>
      %c0_12 = arith.constant 0 : index
      %c0_13 = arith.constant 0 : index
      %13 = vector.load %arg5[%c0_12, %c0_13] : memref<1x384xf32, #tpu.memory_space<vmem>>, vector<1x384xf32>
      %14 = vector.broadcast %13 : vector<1x384xf32> to vector<16x384xf32>
      %15 = arith.addf %12, %14 : vector<16x384xf32>
      %c0_14 = arith.constant 0 : index
      %c0_15 = arith.constant 0 : index
      %16 = vector.load %arg6[%c0_14, %c0_15] : memref<16x384xf32, #tpu.memory_space<vmem>>, vector<16x384xf32>
      tpu.vector_store %arg6[%c0_14, %c0_15], %15 {strides = array<i32>} : memref<16x384xf32, #tpu.memory_space<vmem>>, vector<16x384xf32>,
    } else {
    }
    return
  }
  func.func @transform_0(%arg0: i32, %arg1: i32, %arg2: i32) -> (i32, i32) {
    %c0_i32 = arith.constant 0 : i32
    return %arg0, %arg2 : i32, i32
  }
  func.func @transform_1(%arg0: i32, %arg1: i32, %arg2: i32) -> (i32, i32) {
    %c0_i32 = arith.constant 0 : i32
    return %arg2, %arg1 : i32, i32
  }
  func.func @transform_2(%arg0: i32, %arg1: i32, %arg2: i32) -> (i32, i32) {
    %c0_i32 = arith.constant 0 : i32
    %c0_i32_0 = arith.constant 0 : i32
    return %c0_i32, %arg1 : i32, i32
  }
  func.func @transform_3(%arg0: i32, %arg1: i32, %arg2: i32) -> (i32, i32) {
    %c0_i32 = arith.constant 0 : i32
    return %arg0, %arg1 : i32, i32
  }
}

module attributes {stable_mosaic.version = 11 : i64} {
  func.func @_matmul_bias_kernel(%arg0: i32, %arg1: i32, %arg2: i32, %arg3: memref<16x256xbf16, #tpu.memory_space<vmem>>, %arg4: memref<256x128xbf16, #tpu.memory_space<vmem>>, %arg5: memref<1x128xf32, #tpu.memory_space<vmem>>, %arg6: memref<16x128xf32, #tpu.memory_space<vmem>>, %arg7: memref<16x128xf32, #tpu.memory_space<vmem>>) attributes {dimension_semantics = [#tpu.dimension_semantics<parallel>, #tpu.dimension_semantics<parallel>, #tpu.dimension_semantics<arbitrary>], iteration_bounds = array<i64: 1, 1, 1>, scalar_prefetch = 0 : i64, scratch_operands = 1 : i64, tpu.core_type = #tpu.core_type<tc>, window_params = [{transform_indices = @transform_0, window_bounds = array<i64: 16, 256>}, {transform_indices = @transform_1, window_bounds = array<i64: 256, 128>}, {transform_indices = @transform_2, window_bounds = array<i64: 1, 128>}, {transform_indices = @transform_3, window_bounds = array<i64: 16, 128>}]} {
    %c0_i32 = arith.constant 0 : i32
    %0 = arith.cmpi eq, %arg2, %c0_i32 : i32
    %1 = arith.extui %0 : i1 to i32
    %c0_i32_0 = arith.constant 0 : i32
    %2 = arith.cmpi ne, %1, %c0_i32_0 : i32
    scf.if %2 {
      %cst_10 = arith.constant 0.000000e+00 : f32
      %12 = vector.broadcast %cst_10 : f32 to vector<16x128xf32>
      %c0_11 = arith.constant 0 : index
      %c0_12 = arith.constant 0 : index
      %13 = vector.load %arg7[%c0_11, %c0_12] : memref<16x128xf32, #tpu.memory_space<vmem>>, vector<16x128xf32>
      tpu.vector_store %arg7[%c0_11, %c0_12], %12 {strides = array<i32>} : memref<16x128xf32, #tpu.memory_space<vmem>>, vector<16x128xf32>,
    } else {
    }
    %c0 = arith.constant 0 : index
    %c0_1 = arith.constant 0 : index
    %3 = vector.load %arg7[%c0, %c0_1] : memref<16x128xf32, #tpu.memory_space<vmem>>, vector<16x128xf32>
    %c0_2 = arith.constant 0 : index
    %c0_3 = arith.constant 0 : index
    %4 = vector.load %arg3[%c0_2, %c0_3] : memref<16x256xbf16, #tpu.memory_space<vmem>>, vector<16x256xbf16>
    %c0_4 = arith.constant 0 : index
    %c0_5 = arith.constant 0 : index
    %5 = vector.load %arg4[%c0_4, %c0_5] : memref<256x128xbf16, #tpu.memory_space<vmem>>, vector<256x128xbf16>
    %cst = arith.constant dense<0.000000e+00> : vector<16x128xf32>
    %6 = tpu.matmul %4, %5, %cst {dimension_numbers = #tpu.dot_dimension_numbers<[1], [0], [0], [1], [0, 0, 1, 1], [], []>} : vector<16x256xbf16>, vector<256x128xbf16>, vector<16x128xf32> -> vector<16x128xf32>
    %7 = arith.addf %3, %6 : vector<16x128xf32>
    %c0_6 = arith.constant 0 : index
    %c0_7 = arith.constant 0 : index
    %8 = vector.load %arg7[%c0_6, %c0_7] : memref<16x128xf32, #tpu.memory_space<vmem>>, vector<16x128xf32>
    tpu.vector_store %arg7[%c0_6, %c0_7], %7 {strides = array<i32>} : memref<16x128xf32, #tpu.memory_space<vmem>>, vector<16x128xf32>,
    %c0_i32_8 = arith.constant 0 : i32
    %9 = arith.cmpi eq, %arg2, %c0_i32_8 : i32
    %10 = arith.extui %9 : i1 to i32
    %c0_i32_9 = arith.constant 0 : i32
    %11 = arith.cmpi ne, %10, %c0_i32_9 : i32
    scf.if %11 {
      %c0_10 = arith.constant 0 : index
      %c0_11 = arith.constant 0 : index
      %12 = vector.load %arg7[%c0_10, %c0_11] : memref<16x128xf32, #tpu.memory_space<vmem>>, vector<16x128xf32>
      %c0_12 = arith.constant 0 : index
      %c0_13 = arith.constant 0 : index
      %13 = vector.load %arg5[%c0_12, %c0_13] : memref<1x128xf32, #tpu.memory_space<vmem>>, vector<1x128xf32>
      %14 = vector.broadcast %13 : vector<1x128xf32> to vector<16x128xf32>
      %15 = arith.addf %12, %14 : vector<16x128xf32>
      %c0_14 = arith.constant 0 : index
      %c0_15 = arith.constant 0 : index
      %16 = vector.load %arg6[%c0_14, %c0_15] : memref<16x128xf32, #tpu.memory_space<vmem>>, vector<16x128xf32>
      tpu.vector_store %arg6[%c0_14, %c0_15], %15 {strides = array<i32>} : memref<16x128xf32, #tpu.memory_space<vmem>>, vector<16x128xf32>,
    } else {
    }
    return
  }
  func.func @transform_0(%arg0: i32, %arg1: i32, %arg2: i32) -> (i32, i32) {
    %c0_i32 = arith.constant 0 : i32
    return %arg0, %arg2 : i32, i32
  }
  func.func @transform_1(%arg0: i32, %arg1: i32, %arg2: i32) -> (i32, i32) {
    %c0_i32 = arith.constant 0 : i32
    return %arg2, %arg1 : i32, i32
  }
  func.func @transform_2(%arg0: i32, %arg1: i32, %arg2: i32) -> (i32, i32) {
    %c0_i32 = arith.constant 0 : i32
    %c0_i32_0 = arith.constant 0 : i32
    return %c0_i32, %arg1 : i32, i32
  }
  func.func @transform_3(%arg0: i32, %arg1: i32, %arg2: i32) -> (i32, i32) {
    %c0_i32 = arith.constant 0 : i32
    return %arg0, %arg1 : i32, i32
  }
}

</mosaic_0001>

<bundles_post_ra>
// kernel: lipnet_forward.8
= control target key start
LH: loop header
LB: loop body
LE: loop exit
PB: predicated region body
PF: predicated region fallthrough
CT: control target
= control target key end

     0   :  { %s1058_s12 = smov 0   ;;  %s1060_s13 = smov 0   ;;  %s1219_s0 = inlined_call_operand.vmem [shape: bf16[2,4,27,512], index: 0, kind: input, shape index: {}]   ;;  %s1220_s1 = inlined_call_operand.vmem [shape: bf16[8,27], index: 1, kind: input, shape index: {}]   ;;  %s1221_s2 = inlined_call_operand.vmem [shape: f32[8,1], index: 2, kind: input, shape index: {}]   ;;  %s1222_s3 = inlined_call_operand.vmem [shape: f32[2,8,512], index: 3, kind: output, shape index: {}]  }
   0x1   :  { %s1062_s14 = smov 0  }
   0x2 LB: > { %s25_s15 = sadd.s32 1, %s1030_s13  ;;  %p776_p0 = scmp.ge.s32.totalorder %s1034_s14, 1  ;;  %s1034_s14 = sphi %s1062_s14, %s13_s14   ;;  %s1030_s13 = sphi %s1060_s13, %s1224_s13   ;;  %s1026_s12 = sphi %s1058_s12, %s1223_s12  }
   0x3   : > { %p27_p1 = scmp.ge.s32.totalorder %s25_s15, 2  ;;  %p158_p2 = scmp.lt.s32.totalorder %s1034_s14, 3 }
   0x5   : > { %s1226_s15 = smov (%p27_p1, %s25_s15), 0  ;;  %p159_p3 = pnand %p776_p0, %p158_p2 }
   0x6   : > { %p191_p4 = scmp.lt.s32.totalorder (!%p159_p3), %s1026_s12, 1 }
   0x7   : > { %162 = sbr.rel (%p159_p3) target bundleno = 217 (0xd9), region = 32 }
   0xc   : > { %vm260_vm0 = vcmask 1044480   ;;  %s1228_s12 = smov (!%p191_p4, %s1026_s12), 1  ;;  %vm261_vm1 = vcmask 1045504   ;;  %v1036_v0 = vmov 65535   ;;  %vm256_vm2 = vcmask 220160  }
   0xd   : > { %v262_v1 = vsel %vm260_vm0, 4294967295, %v1036_v0  ;;  %s951_s16 = sshll.u32 %s1228_s12, 8  ;;  %v1114_v37 = vld [vmem:[%s1220_s1] sm:$0xf]  ;;  %s952_s24 = sshll.u32 %s1228_s12, 5 }
   0xe   : > { %s1082_s19 = scalar_lea.vmem %s1219_s0, %s951_s16  ;;  %v1084_v2 = vsel %vm261_vm1, %v262_v1, 0  ;;  %s208_s27 = scalar_lea.vmem %s1222_s3, %s952_s24 }
   0xf   : > { %v799_v3 = vld [vmem:[%s1082_s19 + $0x20] sm:$0xf]  ;;  %v959_v4 = vld [vmem:[%s1082_s19 + $0x2c] sm:$0x30]  ;;  %v957_v5 = vld [vmem:[%s1082_s19 + $0x24] sm:$0xf] }
  0x10   : > { %v800_v6 = vor.u32 %v959_v4, %v799_v3  ;;  %v801_v7 = vld [vmem:[%s1082_s19 + $0x30] sm:$0x30]  ;;  %v807_v8 = vld [vmem:[%s1082_s19 + $0x28] sm:$0xf]  ;;  %v960_v9 = vld [vmem:[%s1082_s19 + $0x34] sm:$0x30] }
  0x11   : > { %v804_v10 = vor.u32 %v957_v5, %v801_v7  ;;  %v808_v11 = vor.u32 %v960_v9, %v807_v8  ;;  %v958_v12 = vld [vmem:[%s1082_s19 + $0x2c] sm:$0xf]  ;;  %v809_v13 = vld [vmem:[%s1082_s19 + $0x38] sm:$0x30]  ;;  %v783_v14 = vld [vmem:[%s1082_s19] sm:$0xf] }
  0x12   : > { %v265_v15 = vand.u32 %v800_v6, %v1084_v2  ;;  %v812_v16 = vor.u32 %v958_v12, %v809_v13  ;;  %v955_v17 = vld [vmem:[%s1082_s19 + $0xc] sm:$0xf0]  ;;  %v953_v18 = vld [vmem:[%s1082_s19 + $0x4] sm:$0xf]  ;;  %v785_v19 = vld [vmem:[%s1082_s19 + $0x10] sm:$0xf0] }
  0x13   : > { %v268_v20 = vand.u32 %v804_v10, %v1084_v2  ;;  %v271_v21 = vand.u32 %v808_v11, %v1084_v2  ;;  %v791_v22 = vld [vmem:[%s1082_s19 + $0x8] sm:$0xf]  ;;  %v956_v23 = vld [vmem:[%s1082_s19 + $0x14] sm:$0xf0]  ;;  %v954_v24 = vld [vmem:[%s1082_s19 + $0xc] sm:$0xf]  ;;  %v784_v26 = vor.u32 %v955_v17, %v783_v14  ;;  %v788_v30 = vor.u32 %v953_v18, %v785_v19 }
  0x14   : > { %282 = vmatpush.bf16.msra.mxu0 %v265_v15  ;;  %v274_v25 = vand.u32 %v812_v16, %v1084_v2  ;;  %v793_v27 = vld [vmem:[%s1082_s19 + $0x18] sm:$0xf0]  ;;  %v851_v28 = vld [vmem:[%s1082_s19 + $0x68] sm:$0xf]  ;;  %v968_v29 = vld [vmem:[%s1082_s19 + $0x74] sm:$0x30]  ;;  %v792_v31 = vor.u32 %v956_v23, %v791_v22 }
  0x15   : > { %295 = vmatpush.bf16.msra.mxu1 %v268_v20  ;;  %308 = vmatpush.bf16.msra.mxu2 %v271_v21  ;;  %v852_v32 = vor.u32 %v968_v29, %v851_v28  ;;  %v966_v33 = vld [vmem:[%s1082_s19 + $0x6c] sm:$0xf]  ;;  %v853_v34 = vld [vmem:[%s1082_s19 + $0x78] sm:$0x30]  ;;  %v843_v35 = vld [vmem:[%s1082_s19 + $0x60] sm:$0xf]  ;;  %v796_v36 = vor.u32 %v954_v24, %v793_v27 }
  0x16   : > { %321 = vmatpush.bf16.msra.mxu3 %v274_v25  ;;  %v856_v38 = vor.u32 %v966_v33, %v853_v34  ;;  %v967_v39 = vld [vmem:[%s1082_s19 + $0x6c] sm:$0x30]  ;;  %v965_v40 = vld [vmem:[%s1082_s19 + $0x64] sm:$0xf]  ;;  %v845_v41 = vld [vmem:[%s1082_s19 + $0x70] sm:$0x30] }
  0x17   : > { %v380_v42 = vand.u32 %v852_v32, %v1084_v2  ;;  %v844_v43 = vor.u32 %v967_v39, %v843_v35  ;;  %v848_v44 = vor.u32 %v965_v40, %v845_v41  ;;  %v835_v45 = vld [vmem:[%s1082_s19 + $0x48] sm:$0xf]  ;;  %v964_v46 = vld [vmem:[%s1082_s19 + $0x54] sm:$0xf0]  ;;  %v962_v47 = vld [vmem:[%s1082_s19 + $0x4c] sm:$0xf] }
  0x18   : > { %283 = vmatpush.bf16.msra.mxu0 %v784_v26  ;;  %v383_v48 = vand.u32 %v856_v38, %v1084_v2  ;;  %v837_v49 = vld [vmem:[%s1082_s19 + $0x58] sm:$0xf0]  ;;  %v827_v50 = vld [vmem:[%s1082_s19 + $0x40] sm:$0xf]  ;;  %v963_v51 = vld [vmem:[%s1082_s19 + $0x4c] sm:$0xf0]  ;;  %v836_v57 = vor.u32 %v964_v46, %v835_v45 }
  0x19   : > { %296 = vmatpush.bf16.msra.mxu1 %v788_v30  ;;  %309 = vmatpush.bf16.msra.mxu2 %v792_v31  ;;  %v374_v52 = vand.u32 %v844_v43, %v1084_v2  ;;  %v961_v53 = vld [vmem:[%s1082_s19 + $0x44] sm:$0xf]  ;;  %v829_v54 = vld [vmem:[%s1082_s19 + $0x50] sm:$0xf0]  ;;  %v895_v55 = vld [vmem:[%s1082_s19 + $0xa8] sm:$0xf]  ;;  %v377_v56 = vand.u32 %v848_v44, %v1084_v2  ;;  %v840_v61 = vor.u32 %v962_v47, %v837_v49 }
  0x1a   : > { %322 = vmatpush.bf16.msra.mxu3 %v796_v36  ;;  %v976_v58 = vld [vmem:[%s1082_s19 + $0xb4] sm:$0x30]  ;;  %v974_v59 = vld [vmem:[%s1082_s19 + $0xac] sm:$0xf]  ;;  %v897_v60 = vld [vmem:[%s1082_s19 + $0xb8] sm:$0x30]  ;;  %v828_v4 = vor.u32 %v963_v51, %v827_v50  ;;  %v832_v14 = vor.u32 %v961_v53, %v829_v54 }
  0x1b   : > { %813 = vmatmul.msk.bf16.vlgmr.msra.gmra.mxu0 %vm256_vm2, %v1114_v37  ;;  %v896_v62 = vor.u32 %v976_v58, %v895_v55  ;;  %v900_v63 = vor.u32 %v974_v59, %v897_v60  ;;  %v887_v0 = vld [vmem:[%s1082_s19 + $0xa0] sm:$0xf]  ;;  %v975_v1 = vld [vmem:[%s1082_s19 + $0xac] sm:$0x30]  ;;  %v973_v3 = vld [vmem:[%s1082_s19 + $0xa4] sm:$0xf] }
  0x1c   : > { %814 = vmatmul.msk.bf16.vlgmr.msra.gmra.mxu1 %vm256_vm2, %v1114_v37  ;;  %815 = vmatmul.msk.bf16.vlgmr.msra.gmra.mxu2 %vm256_vm2, %v1114_v37  ;;  %v888_v5 = vor.u32 %v975_v1, %v887_v0  ;;  %v889_v6 = vld [vmem:[%s1082_s19 + $0xb0] sm:$0x30]  ;;  %v879_v7 = vld [vmem:[%s1082_s19 + $0x88] sm:$0xf]  ;;  %v972_v8 = vld [vmem:[%s1082_s19 + $0x94] sm:$0xf0] }
  0x1d   : > { %417 = vmatpush.bf16.msrb.mxu2 %v380_v42  ;;  %816 = vmatmul.msk.bf16.vlgmr.msra.gmra.mxu3 %vm256_vm2, %v1114_v37  ;;  %v493_v9 = vand.u32 %v896_v62, %v1084_v2  ;;  %v496_v10 = vand.u32 %v900_v63, %v1084_v2  ;;  %v892_v11 = vor.u32 %v973_v3, %v889_v6  ;;  %v970_v12 = vld [vmem:[%s1082_s19 + $0x8c] sm:$0xf]  ;;  %v881_v13 = vld [vmem:[%s1082_s19 + $0x98] sm:$0xf0]  ;;  %v871_v18 = vld [vmem:[%s1082_s19 + $0x80] sm:$0xf] }
  0x1e   : > { %430 = vmatpush.bf16.msrb.mxu3 %v383_v48  ;;  %391 = vmatpush.bf16.msrb.mxu0 %v374_v52  ;;  %v487_v15 = vand.u32 %v888_v5, %v1084_v2  ;;  %v880_v17 = vor.u32 %v972_v8, %v879_v7  ;;  %v971_v19 = vld [vmem:[%s1082_s19 + $0x8c] sm:$0xf0]  ;;  %v884_v20 = vor.u32 %v970_v12, %v881_v13  ;;  %v969_v21 = vld [vmem:[%s1082_s19 + $0x84] sm:$0xf]  ;;  %v873_v22 = vld [vmem:[%s1082_s19 + $0x90] sm:$0xf0] }
  0x1f   : > { %404 = vmatpush.bf16.msrb.mxu1 %v377_v56  ;;  %v490_v16 = vand.u32 %v892_v11, %v1084_v2  ;;  %v872_v23 = vor.u32 %v971_v19, %v871_v18  ;;  %v939_v24 = vld [vmem:[%s1082_s19 + $0xe8] sm:$0xf]  ;;  %v984_v25 = vld [vmem:[%s1082_s19 + $0xf4] sm:$0x30]  ;;  %v982_v26 = vld [vmem:[%s1082_s19 + $0xec] sm:$0xf]  ;;  %v876_v27 = vor.u32 %v969_v21, %v873_v22 }
  0x20   : > { %v941_v28 = vld [vmem:[%s1082_s19 + $0xf8] sm:$0x30]  ;;  %v931_v29 = vld [vmem:[%s1082_s19 + $0xe0] sm:$0xf]  ;;  %v983_v30 = vld [vmem:[%s1082_s19 + $0xec] sm:$0x30]  ;;  %v940_v33 = vor.u32 %v984_v25, %v939_v24 }
  0x21   : > { %418 = vmatpush.bf16.msrb.mxu2 %v836_v57  ;;  %v981_v31 = vld [vmem:[%s1082_s19 + $0xe4] sm:$0xf]  ;;  %v933_v32 = vld [vmem:[%s1082_s19 + $0xf0] sm:$0x30]  ;;  %v944_v34 = vor.u32 %v982_v26, %v941_v28  ;;  %v932_v35 = vor.u32 %v983_v30, %v931_v29  ;;  %v923_v41 = vld [vmem:[%s1082_s19 + $0xc8] sm:$0xf] }
  0x22   : > { %431 = vmatpush.bf16.msrb.mxu3 %v840_v61  ;;  %392 = vmatpush.bf16.msrb.mxu0 %v828_v4  ;;  %v936_v36 = vor.u32 %v981_v31, %v933_v32  ;;  %v606_v38 = vand.u32 %v940_v33, %v1084_v2  ;;  %v980_v42 = vld [vmem:[%s1082_s19 + $0xd4] sm:$0xf0]  ;;  %v978_v43 = vld [vmem:[%s1082_s19 + $0xcc] sm:$0xf]  ;;  %v925_v45 = vld [vmem:[%s1082_s19 + $0xd8] sm:$0xf0] }
  0x23   : > { %405 = vmatpush.bf16.msrb.mxu1 %v832_v14  ;;  %v609_v39 = vand.u32 %v944_v34, %v1084_v2  ;;  %v600_v40 = vand.u32 %v932_v35, %v1084_v2  ;;  %v915_v46 = vld [vmem:[%s1082_s19 + $0xc0] sm:$0xf]  ;;  %v979_v47 = vld [vmem:[%s1082_s19 + $0xcc] sm:$0xf0]  ;;  %v977_v48 = vld [vmem:[%s1082_s19 + $0xc4] sm:$0xf]  ;;  %v924_v50 = vor.u32 %v980_v42, %v923_v41  ;;  %v928_v51 = vor.u32 %v978_v43, %v925_v45 }
  0x24   : > { %v603_v44 = vand.u32 %v936_v36, %v1084_v2  ;;  %v917_v49 = vld [vmem:[%s1082_s19 + $0xd0] sm:$0xf0]  ;;  %v667_v2 = vld [vmem:[%s1221_s2] sm:$0xff]  ;;  %v916_v52 = vor.u32 %v979_v47, %v915_v46  ;;  %v1037_v54 = vmov 0  }
  0x25   : > { %530 = vmatpush.bf16.msra.mxu2 %v493_v9  ;;  %v920_v53 = vor.u32 %v977_v48, %v917_v49  ;;  %1011 = vset.pattern.permute.xlu0 %v1037_v54 }
  0x26   : > { %543 = vmatpush.bf16.msra.mxu3 %v496_v10  ;;  %504 = vmatpush.bf16.msra.mxu0 %v487_v15 }
  0x27   : > { %517 = vmatpush.bf16.msra.mxu1 %v490_v16  ;;  %670 = vperm.xlu0 %1011, %v667_v2  }
  0x29   : > { %531 = vmatpush.bf16.msra.mxu2 %v880_v17 }
  0x2a   : > { %544 = vmatpush.bf16.msra.mxu3 %v884_v20  ;;  %505 = vmatpush.bf16.msra.mxu0 %v872_v23 }
  0x2b   : > { %518 = vmatpush.bf16.msra.mxu1 %v876_v27  ;;  %857 = vmatmul.msk.bf16.vlgmr.msrb.gmra.mxu0 %vm256_vm2, %v1114_v37 }
  0x2c   : > { %858 = vmatmul.msk.bf16.vlgmr.msrb.gmra.mxu1 %vm256_vm2, %v1114_v37  ;;  %859 = vmatmul.msk.bf16.vlgmr.msrb.gmra.mxu2 %vm256_vm2, %v1114_v37 }
  0x2d   : > { %860 = vmatmul.msk.bf16.vlgmr.msrb.gmra.mxu3 %vm256_vm2, %v1114_v37  ;;  %643 = vmatpush.bf16.msrb.mxu2 %v606_v38 }
  0x2e   : > { %656 = vmatpush.bf16.msrb.mxu3 %v609_v39  ;;  %617 = vmatpush.bf16.msrb.mxu0 %v600_v40 }
  0x2f   : > { %630 = vmatpush.bf16.msrb.mxu1 %v603_v44 }
  0x31   : > { %644 = vmatpush.bf16.msrb.mxu2 %v924_v50 }
  0x32   : > { %657 = vmatpush.bf16.msrb.mxu3 %v928_v51  ;;  %618 = vmatpush.bf16.msrb.mxu0 %v916_v52 }
  0x33   : > { %631 = vmatpush.bf16.msrb.mxu1 %v920_v53 }
  0x3b   : > { %901 = vmatmul.msk.bf16.vlgmr.msra.gmra.mxu0 %vm256_vm2, %v1114_v37 }
  0x3c   : > { %902 = vmatmul.msk.bf16.vlgmr.msra.gmra.mxu1 %vm256_vm2, %v1114_v37  ;;  %903 = vmatmul.msk.bf16.vlgmr.msra.gmra.mxu2 %vm256_vm2, %v1114_v37 }
  0x3d   : > { %904 = vmatmul.msk.bf16.vlgmr.msra.gmra.mxu3 %vm256_vm2, %v1114_v37 }
  0x4b   : > { %945 = vmatmul.msk.bf16.vlgmr.msrb.gmra.mxu0 %vm256_vm2, %v1114_v37 }
  0x4c   : > { %946 = vmatmul.msk.bf16.vlgmr.msrb.gmra.mxu1 %vm256_vm2, %v1114_v37  ;;  %947 = vmatmul.msk.bf16.vlgmr.msrb.gmra.mxu2 %vm256_vm2, %v1114_v37 }
  0x4d   : > { %948 = vmatmul.msk.bf16.vlgmr.msrb.gmra.mxu3 %vm256_vm2, %v1114_v37 }
  0x98   : > { %v285_v55 = vpop.f32.mrf.mxu0 }
  0x99   : > { %v298_v56 = vpop.f32.mrf.mxu1  ;;  %v671_v17 = vpop.permute.xlu0 %670 }
  0x9f   : > { %v311_v57 = vpop.f32.mrf.mxu2 }
  0xa0   : > { %v324_v58 = vpop.f32.mrf.mxu3  ;;  %v287_v59 = vpop.f32.mrf.mxu0 }
  0xa1   : > { %v300_v60 = vpop.f32.mrf.mxu1 }
  0xa7   : > { %v313_v61 = vpop.f32.mrf.mxu2 }
  0xa8   : > { %v326_v62 = vpop.f32.mrf.mxu3  ;;  %v394_v63 = vpop.f32.mrf.mxu0 }
  0xa9   : > { %v407_v0 = vpop.f32.mrf.mxu1  ;;  %v437_v13 = vmax.f32 %v285_v55, %v394_v63 }
  0xaa   : > { %v438_v14 = vmax.f32 %v298_v56, %v407_v0 }
  0xaf   : > { %v420_v1 = vpop.f32.mrf.mxu2 }
  0xb0   : > { %v433_v3 = vpop.f32.mrf.mxu3  ;;  %v396_v4 = vpop.f32.mrf.mxu0  ;;  %v439_v25 = vmax.f32 %v311_v57, %v420_v1 }
  0xb1   : > { %v409_v5 = vpop.f32.mrf.mxu1  ;;  %v440_v27 = vmax.f32 %v324_v58, %v433_v3 }
  0xb7   : > { %v422_v6 = vpop.f32.mrf.mxu2 }
  0xb8   : > { %v435_v7 = vpop.f32.mrf.mxu3  ;;  %v507_v8 = vpop.f32.mrf.mxu0 }
  0xb9   : > { %v520_v9 = vpop.f32.mrf.mxu1  ;;  %v550_v15 = vmax.f32 %v437_v13, %v507_v8 }
  0xba   : > { %v551_v18 = vmax.f32 %v438_v14, %v520_v9 }
  0xbf   : > { %v533_v37 = vpop.f32.mrf.mxu2 }
  0xc0   : > { %v546_v10 = vpop.f32.mrf.mxu3  ;;  %v509_v11 = vpop.f32.mrf.mxu0  ;;  %v552_v29 = vmax.f32 %v439_v25, %v533_v37 }
  0xc1   : > { %v522_v12 = vpop.f32.mrf.mxu1  ;;  %v553_v31 = vmax.f32 %v440_v27, %v546_v10 }
  0xc7   : > { %v535_v16 = vpop.f32.mrf.mxu2 }
  0xc8   : > { %v548_v19 = vpop.f32.mrf.mxu3  ;;  %v620_v20 = vpop.f32.mrf.mxu0 }
  0xc9   : > { %v663_v21 = vmax.f32 %v550_v15, %v620_v20  ;;  %v633_v22 = vpop.f32.mrf.mxu1 }
  0xca   : > { %v664_v23 = vmax.f32 %v551_v18, %v633_v22 }
  0xcb   : > { %v673_v24 = vadd.f32 %v671_v17, %v663_v21 }
  0xcc   : > { %v674_v26 = vadd.f32 %v671_v17, %v664_v23 }
  0xcd   : > { %v677_v28 = vmax.f32 %v673_v24, 0.0 }
  0xce   : > { %v678_v30 = vmax.f32 %v674_v26, 0.0 }
  0xcf   : > { %681 = vst [vmem:[%s208_s27] sm:$0xff] %v677_v28  ;;  %v646_v32 = vpop.f32.mrf.mxu2 }
  0xd0   : > { %682 = vst [vmem:[%s208_s27 + $0x8] sm:$0xff] %v678_v30  ;;  %v665_v33 = vmax.f32 %v552_v29, %v646_v32  ;;  %v659_v34 = vpop.f32.mrf.mxu3  ;;  %v622_v35 = vpop.f32.mrf.mxu0 }
  0xd1   : > { %v666_v36 = vmax.f32 %v553_v31, %v659_v34  ;;  %v635_v38 = vpop.f32.mrf.mxu1 }
  0xd2   : > { %v675_v39 = vadd.f32 %v671_v17, %v665_v33 }
  0xd3   : > { %v676_v40 = vadd.f32 %v671_v17, %v666_v36 }
  0xd4   : > { %v679_v41 = vmax.f32 %v675_v39, 0.0 }
  0xd5   : > { %v680_v42 = vmax.f32 %v676_v40, 0.0 }
  0xd6   : > { %683 = vst [vmem:[%s208_s27 + $0x10] sm:$0xff] %v679_v41 }
  0xd7   : > { %684 = vst [vmem:[%s208_s27 + $0x18] sm:$0xff] %v680_v42  ;;  %v648_v43 = vpop.f32.mrf.mxu2 }
  0xd8   : > { %v661_v44 = vpop.f32.mrf.mxu3 }
  0xd9 PF: > { %s13_s14 = sadd.s32 1, %s1034_s14   ;;  %s1223_s12 = smov %s1030_s13 }
  0xda   : > { %p10_p5 = scmp.ge.s32.totalorder %s13_s14, 4   ;;  %s1224_s13 = smov %s1226_s15 }
  0xdc   :  { %12 = sbr.rel (!%p10_p5) target bundleno = 2 (0x2), region = 65 }

// kernel: lipnet_forward.9
= control target key start
LH: loop header
LB: loop body
LE: loop exit
PB: predicated region body
PF: predicated region fallthrough
CT: control target
= control target key end

     0   :  { %s1323_s12 = smov 0   ;;  %s1325_s13 = smov 0   ;;  %s1450_s0 = inlined_call_operand.vmem [shape: bf16[2,4,216,128], index: 0, kind: input, shape index: {}]   ;;  %s1451_s1 = inlined_call_operand.vmem [shape: bf16[16,216], index: 1, kind: input, shape index: {}]   ;;  %s1452_s2 = inlined_call_operand.vmem [shape: f32[16,1], index: 2, kind: input, shape index: {}]   ;;  %s1453_s3 = inlined_call_operand.vmem [shape: f32[2,16,128], index: 3, kind: output, shape index: {}]  }
   0x1   :  { %s1327_s14 = smov 0  }
   0x2 LB: > { %s25_s15 = sadd.s32 1, %s1296_s13  ;;  %p889_p0 = scmp.ge.s32.totalorder %s1300_s14, 1  ;;  %s1300_s14 = sphi %s1327_s14, %s13_s14   ;;  %s1296_s13 = sphi %s1325_s13, %s1455_s13   ;;  %s1292_s12 = sphi %s1323_s12, %s1454_s12  }
   0x3   : > { %p27_p1 = scmp.ge.s32.totalorder %s25_s15, 2  ;;  %p156_p2 = scmp.lt.s32.totalorder %s1300_s14, 3 }
   0x5   : > { %s1457_s15 = smov (%p27_p1, %s25_s15), 0  ;;  %p157_p3 = pnand %p889_p0, %p156_p2 }
   0x6   : > { %p186_p4 = scmp.lt.s32.totalorder (!%p157_p3), %s1292_s12, 1 }
   0x7   : > { %160 = sbr.rel (%p157_p3) target bundleno = 223 (0xdf), region = 32 }
   0xc   : > { %s1459_s12 = smov (!%p186_p4, %s1292_s12), 1  ;;  %vm326_vm0 = vcmask 1043456   ;;  %v1197_v34 = vld [vmem:[%s1451_s1 + $0x4] sm:$0xf]  ;;  %v897_v38 = vld [vmem:[%s1451_s1 + $0x8] sm:$0xf0] }
   0xd   : > { %s1251_s16 = smul.u32 432, %s1459_s12  ;;  %v1389_v43 = vor.u32 %v1197_v34, %v897_v38  ;;  %vm322_vm1 = vcmask 719872   ;;  %v895_v46 = vld [vmem:[%s1451_s1] sm:$0xf]  ;;  %v1198_v47 = vld [vmem:[%s1451_s1 + $0x4] sm:$0xf0] }
   0xe   : > { %v896_v51 = vor.u32 %v1198_v47, %v895_v46  ;;  %v784_v55 = vld [vmem:[%s1452_s2] sm:$0xff]  ;;  %v1302_v57 = vmov 0   ;;  %s1196_s5 = sshll.u32 %s1459_s12, 4 }
   0xf   : > { %s1347_s19 = scalar_lea.vmem %s1450_s0, %s1251_s16  ;;  %1277 = vset.pattern.permute.xlu0 %v1302_v57  ;;  %s201_s8 = scalar_lea.vmem %s1453_s3, %s1196_s5 }
  0x10   : > { %v1206_v0 = vld [vmem:[%s1347_s19 + $0x38] sm:$0xff]  ;;  %v1219_v1 = vld [vmem:[%s1347_s19 + $0xa4] sm:$0xff]  ;;  %v980_v4 = vld [vmem:[%s1347_s19 + $0xd4] sm:$0xf]  ;;  %788 = vperm.xlu0 %1277, %v784_v55  }
  0x11   : > { %v231_v2 = vld [vmem:[%s1347_s19 + $0x68] sm:$0xf]  ;;  %330 = vmatpush.bf16.msra.mxu0 %v1206_v0  ;;  %470 = vmatpush.bf16.msra.mxu2 %v1219_v1  ;;  %v439_v5 = vunpack.c.l.b16 %v980_v4  ;;  %v1205_v6 = vld [vmem:[%s1347_s19 + $0x30] sm:$0xff]  ;;  %v1218_v8 = vld [vmem:[%s1347_s19 + $0x9c] sm:$0xff] }
  0x12   : > { %v294_v3 = vunpack.c.l.b16 %v231_v2  ;;  %v1211_v12 = vld [vmem:[%s1347_s19 + $0x60] sm:$0xff]  ;;  %v1204_v13 = vld [vmem:[%s1347_s19 + $0x28] sm:$0xff]  ;;  %v1217_v15 = vld [vmem:[%s1347_s19 + $0x94] sm:$0xff] }
  0x13   : > { %v453_v9 = vpack.c.b16 %v439_v5, %v439_v5  ;;  %v1224_v14 = vld [vmem:[%s1347_s19 + $0xcc] sm:$0xff]  ;;  %v1210_v16 = vld [vmem:[%s1347_s19 + $0x58] sm:$0xff]  ;;  %v1203_v17 = vld [vmem:[%s1347_s19 + $0x20] sm:$0xff] }
  0x14   : > { %v308_v7 = vpack.c.b16 %v294_v3, %v294_v3  ;;  %v1223_v18 = vld [vmem:[%s1347_s19 + $0xc4] sm:$0xff]  ;;  %v1216_v19 = vld [vmem:[%s1347_s19 + $0x8c] sm:$0xff]  ;;  %v1202_v21 = vld [vmem:[%s1347_s19 + $0x18] sm:$0xff] }
  0x15   : > { %v468_v11 = vsel %vm326_vm0, %v453_v9, 0  ;;  %331 = vmatpush.bf16.msra.mxu0 %v1205_v6  ;;  %471 = vmatpush.bf16.msra.mxu2 %v1218_v8  ;;  %v1209_v20 = vld [vmem:[%s1347_s19 + $0x50] sm:$0xff]  ;;  %v1060_v22 = vld [vmem:[%s1347_s19 + $0x140] sm:$0xf]  ;;  %v1215_v24 = vld [vmem:[%s1347_s19 + $0x84] sm:$0xff] }
  0x16   : > { %v328_v10 = vsel %vm326_vm0, %v308_v7, 0  ;;  %486 = vmatpush.bf16.msra.mxu3 %v468_v11  ;;  %v1222_v23 = vld [vmem:[%s1347_s19 + $0xbc] sm:$0xff]  ;;  %v581_v25 = vunpack.c.l.b16 %v1060_v22  ;;  %v1208_v26 = vld [vmem:[%s1347_s19 + $0x48] sm:$0xff]  ;;  %v1201_v27 = vld [vmem:[%s1347_s19 + $0x10] sm:$0xff] }
  0x17   : > { %346 = vmatpush.bf16.msra.mxu1 %v328_v10  ;;  %v1221_v28 = vld [vmem:[%s1347_s19 + $0xb4] sm:$0xff]  ;;  %v1214_v29 = vld [vmem:[%s1347_s19 + $0x7c] sm:$0xff]  ;;  %v1140_v30 = vld [vmem:[%s1347_s19 + $0x1ac] sm:$0xf] }
  0x18   : > { %v595_v31 = vpack.c.b16 %v581_v25, %v581_v25  ;;  %v1207_v32 = vld [vmem:[%s1347_s19 + $0x40] sm:$0xff]  ;;  %v1200_v33 = vld [vmem:[%s1347_s19 + $0x8] sm:$0xff]  ;;  %v723_v35 = vunpack.c.l.b16 %v1140_v30  ;;  %v1213_v37 = vld [vmem:[%s1347_s19 + $0x74] sm:$0xff] }
  0x19   : > { %332 = vmatpush.bf16.msra.mxu0 %v1204_v13  ;;  %472 = vmatpush.bf16.msra.mxu2 %v1217_v15  ;;  %v1220_v36 = vld [vmem:[%s1347_s19 + $0xac] sm:$0xff]  ;;  %v1199_v41 = vld [vmem:[%s1347_s19] sm:$0xff]  ;;  %v1237_v49 = vld [vmem:[%s1347_s19 + $0x138] sm:$0xff] }
  0x1a   : > { %487 = vmatpush.bf16.msra.mxu3 %v1224_v14  ;;  %v1232_v39 = vld [vmem:[%s1347_s19 + $0x110] sm:$0xff]  ;;  %v610_v40 = vsel %vm326_vm0, %v595_v31, 0  ;;  %v737_v44 = vpack.c.b16 %v723_v35, %v723_v35  ;;  %v1245_v45 = vld [vmem:[%s1347_s19 + $0x17c] sm:$0xff]  ;;  %v1231_v48 = vld [vmem:[%s1347_s19 + $0x108] sm:$0xff] }
  0x1b   : > { %347 = vmatpush.bf16.msra.mxu1 %v1211_v12  ;;  %v1212_v42 = vld [vmem:[%s1347_s19 + $0x6c] sm:$0xff]  ;;  %v1244_v52 = vld [vmem:[%s1347_s19 + $0x174] sm:$0xff]  ;;  %v1230_v53 = vld [vmem:[%s1347_s19 + $0x100] sm:$0xff] }
  0x1c   : > { %v752_v50 = vsel %vm326_vm0, %v737_v44, 0  ;;  %v1236_v54 = vld [vmem:[%s1347_s19 + $0x130] sm:$0xff]  ;;  %v1250_v56 = vld [vmem:[%s1347_s19 + $0x1a4] sm:$0xff]  ;;  %v1229_v59 = vld [vmem:[%s1347_s19 + $0xf8] sm:$0xff] }
  0x1d   : > { %333 = vmatpush.bf16.msra.mxu0 %v1203_v17  ;;  %473 = vmatpush.bf16.msra.mxu2 %v1216_v19  ;;  %v1243_v58 = vld [vmem:[%s1347_s19 + $0x16c] sm:$0xff]  ;;  %v1249_v61 = vld [vmem:[%s1347_s19 + $0x19c] sm:$0xff]  ;;  %v1242_v62 = vld [vmem:[%s1347_s19 + $0x164] sm:$0xff] }
  0x1e   : > { %488 = vmatpush.bf16.msra.mxu3 %v1223_v18  ;;  %v1235_v60 = vld [vmem:[%s1347_s19 + $0x128] sm:$0xff]  ;;  %v1228_v63 = vld [vmem:[%s1347_s19 + $0xf0] sm:$0xff]  ;;  %v1234_v0 = vld [vmem:[%s1347_s19 + $0x120] sm:$0xff] }
  0x1f   : > { %348 = vmatpush.bf16.msra.mxu1 %v1210_v16  ;;  %v785_v1 = vld [vmem:[%s1452_s2 + $0x8] sm:$0xff]  ;;  %v1248_v2 = vld [vmem:[%s1347_s19 + $0x194] sm:$0xff]  ;;  %v1241_v3 = vld [vmem:[%s1347_s19 + $0x15c] sm:$0xff] }
  0x20   : > { %793 = vperm.xlu0 %1277, %v785_v1   ;;  %v1227_v4 = vld [vmem:[%s1347_s19 + $0xe8] sm:$0xff]  ;;  %v1233_v5 = vld [vmem:[%s1347_s19 + $0x118] sm:$0xff]  ;;  %v1226_v8 = vld [vmem:[%s1347_s19 + $0xe0] sm:$0xff] }
  0x21   : > { %334 = vmatpush.bf16.msra.mxu0 %v1202_v21  ;;  %474 = vmatpush.bf16.msra.mxu2 %v1215_v24  ;;  %v1247_v6 = vld [vmem:[%s1347_s19 + $0x18c] sm:$0xff]  ;;  %v1240_v7 = vld [vmem:[%s1347_s19 + $0x154] sm:$0xff]  ;;  %v1246_v9 = vld [vmem:[%s1347_s19 + $0x184] sm:$0xff] }
  0x22   : > { %489 = vmatpush.bf16.msra.mxu3 %v1222_v23  ;;  %v1239_v10 = vld [vmem:[%s1347_s19 + $0x14c] sm:$0xff]  ;;  %v1225_v11 = vld [vmem:[%s1347_s19 + $0xd8] sm:$0xff]  ;;  %v1238_v12 = vld [vmem:[%s1347_s19 + $0x144] sm:$0xff] }
  0x23   : > { %349 = vmatpush.bf16.msra.mxu1 %v1209_v20 }
  0x25   : > { %335 = vmatpush.bf16.msra.mxu0 %v1201_v27  ;;  %475 = vmatpush.bf16.msra.mxu2 %v1214_v29 }
  0x26   : > { %490 = vmatpush.bf16.msra.mxu3 %v1221_v28 }
  0x27   : > { %350 = vmatpush.bf16.msra.mxu1 %v1208_v26 }
  0x29   : > { %336 = vmatpush.bf16.msra.mxu0 %v1200_v33  ;;  %476 = vmatpush.bf16.msra.mxu2 %v1213_v37 }
  0x2a   : > { %491 = vmatpush.bf16.msra.mxu3 %v1220_v36 }
  0x2b   : > { %351 = vmatpush.bf16.msra.mxu1 %v1207_v32 }
  0x2d   : > { %337 = vmatpush.bf16.msra.mxu0 %v1199_v41  ;;  %1033 = vmatmul.msk.bf16.vlgmr.msra.gmra.mxu3 %vm322_vm1, %v1389_v43 }
  0x2e   : > { %628 = vmatpush.bf16.msrb.mxu3 %v610_v40  ;;  %953 = vmatmul.msk.bf16.vlgmr.msra.gmra.mxu1 %vm322_vm1, %v1389_v43 }
  0x2f   : > { %612 = vmatpush.bf16.msrb.mxu1 %v1232_v39  ;;  %477 = vmatpush.bf16.msra.mxu2 %v1212_v42 }
  0x30   : > { %338 = vmatmul.bf16.vlgmr.msra.gmra.mxu0 %v896_v51 }
  0x31   : > { %754 = vmatpush.bf16.msrb.mxu0 %v1245_v45 }
  0x32   : > { %629 = vmatpush.bf16.msrb.mxu3 %v1237_v49  ;;  %478 = vmatmul.bf16.vlgmr.msra.gmra.mxu2 %v896_v51 }
  0x33   : > { %613 = vmatpush.bf16.msrb.mxu1 %v1231_v48  ;;  %770 = vmatpush.bf16.msrb.mxu2 %v752_v50 }
  0x35   : > { %755 = vmatpush.bf16.msrb.mxu0 %v1244_v52 }
  0x36   : > { %630 = vmatpush.bf16.msrb.mxu3 %v1236_v54 }
  0x37   : > { %614 = vmatpush.bf16.msrb.mxu1 %v1230_v53  ;;  %771 = vmatpush.bf16.msrb.mxu2 %v1250_v56 }
  0x39   : > { %756 = vmatpush.bf16.msrb.mxu0 %v1243_v58 }
  0x3a   : > { %631 = vmatpush.bf16.msrb.mxu3 %v1235_v60 }
  0x3b   : > { %615 = vmatpush.bf16.msrb.mxu1 %v1229_v59  ;;  %772 = vmatpush.bf16.msrb.mxu2 %v1249_v61 }
  0x3d   : > { %757 = vmatpush.bf16.msrb.mxu0 %v1242_v62 }
  0x3e   : > { %632 = vmatpush.bf16.msrb.mxu3 %v1234_v0 }
  0x3f   : > { %616 = vmatpush.bf16.msrb.mxu1 %v1228_v63  ;;  %773 = vmatpush.bf16.msrb.mxu2 %v1248_v2 }
  0x41   : > { %758 = vmatpush.bf16.msrb.mxu0 %v1241_v3 }
  0x42   : > { %633 = vmatpush.bf16.msrb.mxu3 %v1233_v5 }
  0x43   : > { %617 = vmatpush.bf16.msrb.mxu1 %v1227_v4  ;;  %774 = vmatpush.bf16.msrb.mxu2 %v1247_v6 }
  0x45   : > { %1113 = vmatmul.msk.bf16.vlgmr.msrb.gmra.mxu3 %vm322_vm1, %v1389_v43  ;;  %759 = vmatpush.bf16.msrb.mxu0 %v1240_v7 }
  0x47   : > { %618 = vmatpush.bf16.msrb.mxu1 %v1226_v8  ;;  %775 = vmatpush.bf16.msrb.mxu2 %v1246_v9 }
  0x49   : > { %760 = vmatpush.bf16.msrb.mxu0 %v1239_v10 }
  0x4a   : > { %1193 = vmatmul.msk.bf16.vlgmr.msrb.gmra.mxu2 %vm322_vm1, %v1389_v43 }
  0x4b   : > { %619 = vmatpush.bf16.msrb.mxu1 %v1225_v11 }
  0x4d   : > { %761 = vmatpush.bf16.msrb.mxu0 %v1238_v12 }
  0x4e   : > { %620 = vmatmul.bf16.vlgmr.msrb.gmra.mxu1 %v896_v51 }
  0x50   : > { %762 = vmatmul.bf16.vlgmr.msrb.gmra.mxu0 %v896_v51 }
  0x82   : > { %v789_v31 = vpop.permute.xlu0 %788 }
  0x92   : > { %v794_v46 = vpop.permute.xlu0 %793 }
  0xab   : > { %v353_v14 = vpop.f32.mrf.mxu1 }
  0xad   : > { %v339_v15 = vpop.f32.mrf.mxu0 }
  0xae   : > { %v354_v21 = vadd.f32 %v353_v14, %v339_v15 }
  0xb0   : > { %v493_v13 = vpop.f32.mrf.mxu3 }
  0xb3   : > { %v355_v18 = vpop.f32.mrf.mxu1 }
  0xb5   : > { %v479_v16 = vpop.f32.mrf.mxu2  ;;  %v341_v19 = vpop.f32.mrf.mxu0 }
  0xb6   : > { %v494_v22 = vadd.f32 %v493_v13, %v479_v16  ;;  %v356_v34 = vadd.f32 %v355_v18, %v341_v19 }
  0xb8   : > { %v495_v17 = vpop.f32.mrf.mxu3  ;;  %v498_v26 = vmax.f32 %v354_v21, %v494_v22 }
  0xbd   : > { %v481_v20 = vpop.f32.mrf.mxu2 }
  0xbe   : > { %v496_v32 = vadd.f32 %v495_v17, %v481_v20 }
  0xc0   : > { %v499_v39 = vmax.f32 %v356_v34, %v496_v32 }
  0xc8   : > { %v635_v23 = vpop.f32.mrf.mxu3 }
  0xcb   : > { %v621_v24 = vpop.f32.mrf.mxu1 }
  0xcc   : > { %v636_v25 = vadd.f32 %v635_v23, %v621_v24 }
  0xcd   : > { %v777_v27 = vpop.f32.mrf.mxu2  ;;  %v763_v28 = vpop.f32.mrf.mxu0 }
  0xce   : > { %v640_v29 = vmax.f32 %v498_v26, %v636_v25  ;;  %v778_v30 = vadd.f32 %v777_v27, %v763_v28 }
  0xd0   : > { %v782_v33 = vmax.f32 %v640_v29, %v778_v30  ;;  %v637_v36 = vpop.f32.mrf.mxu3 }
  0xd2   : > { %v796_v35 = vadd.f32 %v789_v31, %v782_v33 }
  0xd3   : > { %v623_v37 = vpop.f32.mrf.mxu1 }
  0xd4   : > { %v638_v38 = vadd.f32 %v637_v36, %v623_v37  ;;  %v798_v40 = vmax.f32 %v796_v35, 0.0 }
  0xd5   : > { %v779_v41 = vpop.f32.mrf.mxu2  ;;  %v765_v42 = vpop.f32.mrf.mxu0 }
  0xd6   : > { %800 = vst [vmem:[%s201_s8] sm:$0xff] %v798_v40  ;;  %v641_v43 = vmax.f32 %v499_v39, %v638_v38  ;;  %v780_v44 = vadd.f32 %v779_v41, %v765_v42 }
  0xd8   : > { %v783_v45 = vmax.f32 %v641_v43, %v780_v44 }
  0xda   : > { %v797_v47 = vadd.f32 %v794_v46, %v783_v45 }
  0xdc   : > { %v799_v48 = vmax.f32 %v797_v47, 0.0 }
  0xde   : > { %801 = vst [vmem:[%s201_s8 + $0x8] sm:$0xff] %v799_v48 }
  0xdf PF: > { %s13_s14 = sadd.s32 1, %s1300_s14   ;;  %s1454_s12 = smov %s1296_s13 }
  0xe0   : > { %p10_p5 = scmp.ge.s32.totalorder %s13_s14, 4   ;;  %s1455_s13 = smov %s1457_s15 }
  0xe2   :  { %12 = sbr.rel (!%p10_p5) target bundleno = 2 (0x2), region = 65 }

// kernel: lipnet_forward.10
= control target key start
LH: loop header
LB: loop body
LE: loop exit
PB: predicated region body
PF: predicated region fallthrough
CT: control target
= control target key end

     0   :  { %s2239_s12 = smov 0   ;;  %s2241_s13 = smov 0   ;;  %s2444_s0 = inlined_call_operand.vmem [shape: bf16[2,4,432,32], index: 0, kind: input, shape index: {}]   ;;  %s2445_s1 = inlined_call_operand.vmem [shape: bf16[12,432], index: 1, kind: input, shape index: {}]   ;;  %s2446_s2 = inlined_call_operand.vmem [shape: f32[12,1], index: 2, kind: input, shape index: {}]   ;;  %s2447_s3 = inlined_call_operand.vmem [shape: f32[2,12,32], index: 3, kind: output, shape index: {}]  }
   0x1   :  { %s2243_s14 = smov 0  }
   0x2 LB: > { %s25_s15 = sadd.s32 1, %s2212_s13  ;;  %p1434_p0 = scmp.ge.s32.totalorder %s2216_s14, 1  ;;  %s2216_s14 = sphi %s2243_s14, %s13_s14   ;;  %s2212_s13 = sphi %s2241_s13, %s2449_s13   ;;  %s2208_s12 = sphi %s2239_s12, %s2448_s12  }
   0x3   : > { %p27_p1 = scmp.ge.s32.totalorder %s25_s15, 2  ;;  %p156_p2 = scmp.lt.s32.totalorder %s2216_s14, 3 }
   0x5   : > { %s2451_s15 = smov (%p27_p1, %s25_s15), 0  ;;  %p157_p3 = pnand %p1434_p0, %p156_p2 }
   0x6   : > { %p186_p4 = scmp.lt.s32.totalorder (!%p157_p3), %s2208_s12, 1 }
   0x7   : > { %160 = sbr.rel (%p157_p3) target bundleno = 277 (0x115), region = 32 }
   0xc   : > { %s2453_s12 = smov (!%p186_p4, %s2208_s12), 1  ;;  %v2056_v13 = vld [vmem:[%s2445_s1 + $0xc] sm:$0xf]  ;;  %v1450_v14 = vld [vmem:[%s2445_s1 + $0x18] sm:$0x30]  ;;  %vm442_vm0 = vcmask 392192  }
   0xd   : > { %s2167_s16 = smul.u32 864, %s2453_s12  ;;  %v2287_v18 = vor.u32 %v2056_v13, %v1450_v14  ;;  %v1448_v36 = vld [vmem:[%s2445_s1 + $0x8] sm:$0xf]  ;;  %v1440_v37 = vld [vmem:[%s2445_s1] sm:$0xf]  ;;  %s2054_s17 = sshll.u32 %s2453_s12, 4 }
   0xe   : > { %v2057_v38 = vld [vmem:[%s2445_s1 + $0xc] sm:$0x30]  ;;  %v2058_v39 = vld [vmem:[%s2445_s1 + $0x14] sm:$0x30]  ;;  %v2055_v40 = vld [vmem:[%s2445_s1 + $0x4] sm:$0xf]  ;;  %s201_s20 = scalar_lea.vmem %s2447_s3, %s2054_s17 }
   0xf   : > { %s2263_s19 = scalar_lea.vmem %s2444_s0, %s2167_s16  ;;  %v1442_v41 = vld [vmem:[%s2445_s1 + $0x10] sm:$0x30]  ;;  %v2329_v45 = vor.u32 %v2057_v38, %v1440_v37  ;;  %v2331_v46 = vor.u32 %v2058_v39, %v1448_v36  ;;  %v1327_v37 = vld [vmem:[%s2446_s2] sm:$0xff]  ;;  %v2218_v38 = vmov 0   ;;  %vm1343_vm1 = vcmask 261120  }
  0x10   : > { %v2066_v0 = vld [vmem:[%s2263_s19 + $0x38] sm:$0xff]  ;;  %v2085_v3 = vld [vmem:[%s2263_s19 + $0xd0] sm:$0xff]  ;;  %v2084_v7 = vld [vmem:[%s2263_s19 + $0xc8] sm:$0xff]  ;;  %v2333_v47 = vor.u32 %v2055_v40, %v1442_v41  ;;  %2193 = vset.pattern.permute.xlu0 %v2218_v38  ;;  %vm1345_vm2 = vcmask 257024  }
  0x11   : > { %v2074_v1 = vld [vmem:[%s2263_s19 + $0x78] sm:$0xff]  ;;  %446 = vmatpush.bf16.msra.mxu0 %v2066_v0  ;;  %v2065_v4 = vld [vmem:[%s2263_s19 + $0x30] sm:$0xff]  ;;  %493 = vmatpush.bf16.msra.mxu3 %v2085_v3  ;;  %v2064_v8 = vld [vmem:[%s2263_s19 + $0x28] sm:$0xff] }
  0x12   : > { %v2082_v2 = vld [vmem:[%s2263_s19 + $0xb8] sm:$0xff]  ;;  %460 = vmatpush.bf16.msra.mxu1 %v2074_v1  ;;  %v2073_v5 = vld [vmem:[%s2263_s19 + $0x70] sm:$0xff]  ;;  %v2072_v9 = vld [vmem:[%s2263_s19 + $0x68] sm:$0xff]  ;;  %1331 = vperm.xlu0 %2193, %v1327_v37  }
  0x13   : > { %474 = vmatpush.bf16.msra.mxu2 %v2082_v2  ;;  %v2081_v6 = vld [vmem:[%s2263_s19 + $0xb0] sm:$0xff]  ;;  %v2080_v10 = vld [vmem:[%s2263_s19 + $0xa8] sm:$0xff]  ;;  %v2083_v11 = vld [vmem:[%s2263_s19 + $0xc0] sm:$0xff] }
  0x14   : > { %v2093_v12 = vld [vmem:[%s2263_s19 + $0x110] sm:$0xff]  ;;  %v2063_v15 = vld [vmem:[%s2263_s19 + $0x20] sm:$0xff]  ;;  %v2092_v19 = vld [vmem:[%s2263_s19 + $0x108] sm:$0xff] }
  0x15   : > { %447 = vmatpush.bf16.msra.mxu0 %v2065_v4  ;;  %494 = vmatpush.bf16.msra.mxu3 %v2084_v7  ;;  %v2071_v16 = vld [vmem:[%s2263_s19 + $0x60] sm:$0xff]  ;;  %v2062_v20 = vld [vmem:[%s2263_s19 + $0x18] sm:$0xff]  ;;  %v2061_v24 = vld [vmem:[%s2263_s19 + $0x10] sm:$0xff] }
  0x16   : > { %461 = vmatpush.bf16.msra.mxu1 %v2073_v5  ;;  %v2079_v17 = vld [vmem:[%s2263_s19 + $0xa0] sm:$0xff]  ;;  %v2070_v21 = vld [vmem:[%s2263_s19 + $0x58] sm:$0xff]  ;;  %v2069_v25 = vld [vmem:[%s2263_s19 + $0x50] sm:$0xff] }
  0x17   : > { %475 = vmatpush.bf16.msra.mxu2 %v2081_v6  ;;  %v2078_v22 = vld [vmem:[%s2263_s19 + $0x98] sm:$0xff]  ;;  %v2091_v23 = vld [vmem:[%s2263_s19 + $0x100] sm:$0xff]  ;;  %v2077_v26 = vld [vmem:[%s2263_s19 + $0x90] sm:$0xff] }
  0x18   : > { %v2090_v27 = vld [vmem:[%s2263_s19 + $0xf8] sm:$0xff]  ;;  %v2060_v28 = vld [vmem:[%s2263_s19 + $0x8] sm:$0xff]  ;;  %v2089_v31 = vld [vmem:[%s2263_s19 + $0xf0] sm:$0xff] }
  0x19   : > { %448 = vmatpush.bf16.msra.mxu0 %v2064_v8  ;;  %495 = vmatpush.bf16.msra.mxu3 %v2083_v11  ;;  %v2068_v29 = vld [vmem:[%s2263_s19 + $0x48] sm:$0xff]  ;;  %v2059_v32 = vld [vmem:[%s2263_s19] sm:$0xff]  ;;  %v2101_v35 = vld [vmem:[%s2263_s19 + $0x150] sm:$0xff] }
  0x1a   : > { %462 = vmatpush.bf16.msra.mxu1 %v2072_v9  ;;  %v2076_v30 = vld [vmem:[%s2263_s19 + $0x88] sm:$0xff]  ;;  %v2067_v33 = vld [vmem:[%s2263_s19 + $0x40] sm:$0xff]  ;;  %v2109_v43 = vld [vmem:[%s2263_s19 + $0x190] sm:$0xff] }
  0x1b   : > { %476 = vmatpush.bf16.msra.mxu2 %v2080_v10  ;;  %v2075_v34 = vld [vmem:[%s2263_s19 + $0x80] sm:$0xff]  ;;  %v2088_v42 = vld [vmem:[%s2263_s19 + $0xe8] sm:$0xff]  ;;  %v2086_v53 = vld [vmem:[%s2263_s19 + $0xd8] sm:$0xff] }
  0x1c   : > { %1562 = vmatmul.msk.bf16.vlgmr.msra.gmra.mxu3 %vm442_vm0, %v2287_v18  ;;  %v2112_v44 = vld [vmem:[%s2263_s19 + $0x1a8] sm:$0xff]  ;;  %v2087_v49 = vld [vmem:[%s2263_s19 + $0xe0] sm:$0xff]  ;;  %v2110_v55 = vld [vmem:[%s2263_s19 + $0x198] sm:$0xff] }
  0x1d   : > { %719 = vmatpush.bf16.msrb.mxu3 %v2093_v12  ;;  %449 = vmatpush.bf16.msra.mxu0 %v2063_v15  ;;  %v2100_v48 = vld [vmem:[%s2263_s19 + $0x148] sm:$0xff]  ;;  %v2111_v51 = vld [vmem:[%s2263_s19 + $0x1a0] sm:$0xff]  ;;  %v2098_v58 = vld [vmem:[%s2263_s19 + $0x138] sm:$0xff] }
  0x1e   : > { %463 = vmatpush.bf16.msra.mxu1 %v2071_v16  ;;  %v2108_v50 = vld [vmem:[%s2263_s19 + $0x188] sm:$0xff]  ;;  %v2099_v52 = vld [vmem:[%s2263_s19 + $0x140] sm:$0xff]  ;;  %v2106_v59 = vld [vmem:[%s2263_s19 + $0x178] sm:$0xff] }
  0x1f   : > { %477 = vmatpush.bf16.msra.mxu2 %v2079_v17  ;;  %v2107_v54 = vld [vmem:[%s2263_s19 + $0x180] sm:$0xff]  ;;  %v2120_v56 = vld [vmem:[%s2263_s19 + $0x1e8] sm:$0xff]  ;;  %v2097_v62 = vld [vmem:[%s2263_s19 + $0x130] sm:$0xff] }
  0x20   : > { %v2128_v57 = vld [vmem:[%s2263_s19 + $0x228] sm:$0xff]  ;;  %v2119_v60 = vld [vmem:[%s2263_s19 + $0x1e0] sm:$0xff]  ;;  %v2105_v63 = vld [vmem:[%s2263_s19 + $0x170] sm:$0xff] }
  0x21   : > { %720 = vmatpush.bf16.msrb.mxu3 %v2092_v19  ;;  %450 = vmatpush.bf16.msra.mxu0 %v2062_v20  ;;  %v2127_v61 = vld [vmem:[%s2263_s19 + $0x220] sm:$0xff]  ;;  %v2118_v0 = vld [vmem:[%s2263_s19 + $0x1d8] sm:$0xff]  ;;  %v2096_v2 = vld [vmem:[%s2263_s19 + $0x128] sm:$0xff] }
  0x22   : > { %464 = vmatpush.bf16.msra.mxu1 %v2070_v21  ;;  %v2126_v1 = vld [vmem:[%s2263_s19 + $0x218] sm:$0xff]  ;;  %v2104_v3 = vld [vmem:[%s2263_s19 + $0x168] sm:$0xff]  ;;  %v2117_v4 = vld [vmem:[%s2263_s19 + $0x1d0] sm:$0xff] }
  0x23   : > { %478 = vmatpush.bf16.msra.mxu2 %v2078_v22  ;;  %v2125_v5 = vld [vmem:[%s2263_s19 + $0x210] sm:$0xff]  ;;  %v2095_v6 = vld [vmem:[%s2263_s19 + $0x120] sm:$0xff]  ;;  %v2116_v8 = vld [vmem:[%s2263_s19 + $0x1c8] sm:$0xff] }
  0x24   : > { %v2103_v7 = vld [vmem:[%s2263_s19 + $0x160] sm:$0xff]  ;;  %v2124_v9 = vld [vmem:[%s2263_s19 + $0x208] sm:$0xff]  ;;  %v2094_v10 = vld [vmem:[%s2263_s19 + $0x118] sm:$0xff] }
  0x25   : > { %721 = vmatpush.bf16.msrb.mxu3 %v2091_v23  ;;  %451 = vmatpush.bf16.msra.mxu0 %v2061_v24  ;;  %v2102_v11 = vld [vmem:[%s2263_s19 + $0x158] sm:$0xff]  ;;  %v2136_v12 = vld [vmem:[%s2263_s19 + $0x268] sm:$0xff]  ;;  %v2115_v13 = vld [vmem:[%s2263_s19 + $0x1c0] sm:$0xff] }
  0x26   : > { %465 = vmatpush.bf16.msra.mxu1 %v2069_v25  ;;  %v2139_v14 = vld [vmem:[%s2263_s19 + $0x280] sm:$0xff]  ;;  %v2114_v17 = vld [vmem:[%s2263_s19 + $0x1b8] sm:$0xff]  ;;  %v2113_v22 = vld [vmem:[%s2263_s19 + $0x1b0] sm:$0xff] }
  0x27   : > { %479 = vmatpush.bf16.msra.mxu2 %v2077_v26  ;;  %v2123_v15 = vld [vmem:[%s2263_s19 + $0x200] sm:$0xff]  ;;  %v2138_v19 = vld [vmem:[%s2263_s19 + $0x278] sm:$0xff]  ;;  %v2137_v23 = vld [vmem:[%s2263_s19 + $0x270] sm:$0xff] }
  0x28   : > { %v2135_v16 = vld [vmem:[%s2263_s19 + $0x260] sm:$0xff]  ;;  %v2122_v20 = vld [vmem:[%s2263_s19 + $0x1f8] sm:$0xff]  ;;  %v2121_v24 = vld [vmem:[%s2263_s19 + $0x1f0] sm:$0xff] }
  0x29   : > { %722 = vmatpush.bf16.msrb.mxu3 %v2090_v27  ;;  %452 = vmatpush.bf16.msra.mxu0 %v2060_v28  ;;  %v2134_v21 = vld [vmem:[%s2263_s19 + $0x258] sm:$0xff]  ;;  %v2147_v25 = vld [vmem:[%s2263_s19 + $0x2c0] sm:$0xff]  ;;  %v2133_v28 = vld [vmem:[%s2263_s19 + $0x250] sm:$0xff] }
  0x2a   : > { %466 = vmatpush.bf16.msra.mxu1 %v2068_v29  ;;  %v2155_v26 = vld [vmem:[%s2263_s19 + $0x300] sm:$0xff]  ;;  %v2146_v29 = vld [vmem:[%s2263_s19 + $0x2b8] sm:$0xff]  ;;  %v2144_v39 = vld [vmem:[%s2263_s19 + $0x2a8] sm:$0xff] }
  0x2b   : > { %480 = vmatpush.bf16.msra.mxu2 %v2076_v30  ;;  %v2163_v27 = vld [vmem:[%s2263_s19 + $0x340] sm:$0xff]  ;;  %v2154_v30 = vld [vmem:[%s2263_s19 + $0x2f8] sm:$0xff]  ;;  %v2152_v40 = vld [vmem:[%s2263_s19 + $0x2e8] sm:$0xff] }
  0x2c   : > { %v2131_v36 = vld [vmem:[%s2263_s19 + $0x240] sm:$0xff]  ;;  %v2160_v41 = vld [vmem:[%s2263_s19 + $0x328] sm:$0xff] }
  0x2d   : > { %723 = vmatpush.bf16.msrb.mxu3 %v2089_v31  ;;  %453 = vmatpush.bf16.msra.mxu0 %v2059_v32  ;;  %v2162_v31 = vld [vmem:[%s2263_s19 + $0x338] sm:$0xff]  ;;  %v2132_v32 = vld [vmem:[%s2263_s19 + $0x248] sm:$0xff] }
  0x2e   : > { %467 = vmatpush.bf16.msra.mxu1 %v2067_v33  ;;  %v2145_v33 = vld [vmem:[%s2263_s19 + $0x2b0] sm:$0xff] }
  0x2f   : > { %481 = vmatpush.bf16.msra.mxu2 %v2075_v34  ;;  %v2153_v34 = vld [vmem:[%s2263_s19 + $0x2f0] sm:$0xff] }
  0x30   : > { %454 = vmatmul.bf16.vlgmr.msra.gmra.mxu0 %v2329_v45 }
  0x31   : > { %733 = vmatpush.bf16.msrb.mxu0 %v2101_v35  ;;  %724 = vmatpush.bf16.msrb.mxu3 %v2088_v42  ;;  %v2161_v35 = vld [vmem:[%s2263_s19 + $0x330] sm:$0xff]  ;;  %v2130_v42 = vld [vmem:[%s2263_s19 + $0x238] sm:$0xff] }
  0x32   : > { %747 = vmatpush.bf16.msrb.mxu1 %v2109_v43  ;;  %482 = vmatmul.bf16.vlgmr.msra.gmra.mxu2 %v2331_v46  ;;  %v2143_v43 = vld [vmem:[%s2263_s19 + $0x2a0] sm:$0xff] }
  0x33   : > { %766 = vmatpush.bf16.msrb.mxu2 %v2112_v44  ;;  %468 = vmatmul.bf16.vlgmr.msra.gmra.mxu1 %v2333_v47  ;;  %v2151_v44 = vld [vmem:[%s2263_s19 + $0x2e0] sm:$0xff] }
  0x35   : > { %734 = vmatpush.bf16.msrb.mxu0 %v2100_v48  ;;  %725 = vmatpush.bf16.msrb.mxu3 %v2087_v49  ;;  %v2159_v48 = vld [vmem:[%s2263_s19 + $0x320] sm:$0xff]  ;;  %v1328_v49 = vld [vmem:[%s2446_s2 + $0x8] sm:$0xf] }
  0x36   : > { %748 = vmatpush.bf16.msrb.mxu1 %v2108_v50  ;;  %v2129_v50 = vld [vmem:[%s2263_s19 + $0x230] sm:$0xff]  ;;  %1336 = vperm.xlu0 %2193, %v1328_v49  }
  0x37   : > { %767 = vmatpush.bf16.msrb.mxu2 %v2111_v51  ;;  %v2166_v51 = vld [vmem:[%s2263_s19 + $0x358] sm:$0xff] }
  0x39   : > { %735 = vmatpush.bf16.msrb.mxu0 %v2099_v52  ;;  %726 = vmatpush.bf16.msrb.mxu3 %v2086_v53  ;;  %v2142_v52 = vld [vmem:[%s2263_s19 + $0x298] sm:$0xff] }
  0x3a   : > { %749 = vmatpush.bf16.msrb.mxu1 %v2107_v54  ;;  %v2150_v53 = vld [vmem:[%s2263_s19 + $0x2d8] sm:$0xff] }
  0x3b   : > { %768 = vmatpush.bf16.msrb.mxu2 %v2110_v55  ;;  %v2158_v54 = vld [vmem:[%s2263_s19 + $0x318] sm:$0xff]  ;;  %v2165_v55 = vld [vmem:[%s2263_s19 + $0x350] sm:$0xff] }
  0x3c   : > { %727 = vmatmul.bf16.vlgmr.msrb.gmra.mxu3 %v2329_v45 }
  0x3d   : > { %994 = vmatpush.bf16.msra.mxu3 %v2120_v56  ;;  %736 = vmatpush.bf16.msrb.mxu0 %v2098_v58  ;;  %v2141_v56 = vld [vmem:[%s2263_s19 + $0x290] sm:$0xff] }
  0x3e   : > { %750 = vmatpush.bf16.msrb.mxu1 %v2106_v59  ;;  %v2157_v58 = vld [vmem:[%s2263_s19 + $0x310] sm:$0xff]  ;;  %v2164_v59 = vld [vmem:[%s2263_s19 + $0x348] sm:$0xff] }
  0x3f   : > { %1008 = vmatpush.bf16.msra.mxu2 %v2128_v57  ;;  %v2149_v57 = vld [vmem:[%s2263_s19 + $0x2d0] sm:$0xff] }
  0x41   : > { %995 = vmatpush.bf16.msra.mxu3 %v2119_v60  ;;  %737 = vmatpush.bf16.msrb.mxu0 %v2097_v62  ;;  %v2140_v60 = vld [vmem:[%s2263_s19 + $0x288] sm:$0xff] }
  0x42   : > { %751 = vmatpush.bf16.msrb.mxu1 %v2105_v63  ;;  %1725 = vmatmul.msk.bf16.vlgmr.msrb.gmra.mxu2 %vm442_vm0, %v2287_v18  ;;  %v2156_v62 = vld [vmem:[%s2263_s19 + $0x308] sm:$0xff] }
  0x43   : > { %1009 = vmatpush.bf16.msra.mxu2 %v2127_v61  ;;  %v2148_v61 = vld [vmem:[%s2263_s19 + $0x2c8] sm:$0xff] }
  0x45   : > { %996 = vmatpush.bf16.msra.mxu3 %v2118_v0  ;;  %738 = vmatpush.bf16.msrb.mxu0 %v2096_v2 }
  0x46   : > { %752 = vmatpush.bf16.msrb.mxu1 %v2104_v3 }
  0x47   : > { %1010 = vmatpush.bf16.msra.mxu2 %v2126_v1 }
  0x49   : > { %997 = vmatpush.bf16.msra.mxu3 %v2117_v4  ;;  %739 = vmatpush.bf16.msrb.mxu0 %v2095_v6 }
  0x4a   : > { %753 = vmatpush.bf16.msrb.mxu1 %v2103_v7 }
  0x4b   : > { %1011 = vmatpush.bf16.msra.mxu2 %v2125_v5 }
  0x4d   : > { %998 = vmatpush.bf16.msra.mxu3 %v2116_v8  ;;  %740 = vmatpush.bf16.msrb.mxu0 %v2094_v10 }
  0x4e   : > { %754 = vmatpush.bf16.msrb.mxu1 %v2102_v11 }
  0x4f   : > { %1012 = vmatpush.bf16.msra.mxu2 %v2124_v9 }
  0x50   : > { %741 = vmatmul.bf16.vlgmr.msrb.gmra.mxu0 %v2333_v47 }
  0x51   : > { %1022 = vmatpush.bf16.msra.mxu0 %v2136_v12  ;;  %999 = vmatpush.bf16.msra.mxu3 %v2115_v13 }
  0x52   : > { %1041 = vmatpush.bf16.msra.mxu1 %v2139_v14 }
  0x53   : > { %1013 = vmatpush.bf16.msra.mxu2 %v2123_v15  ;;  %755 = vmatmul.bf16.vlgmr.msrb.gmra.mxu1 %v2331_v46 }
  0x55   : > { %1023 = vmatpush.bf16.msra.mxu0 %v2135_v16  ;;  %1000 = vmatpush.bf16.msra.mxu3 %v2114_v17 }
  0x56   : > { %1042 = vmatpush.bf16.msra.mxu1 %v2138_v19 }
  0x57   : > { %1014 = vmatpush.bf16.msra.mxu2 %v2122_v20 }
  0x59   : > { %1024 = vmatpush.bf16.msra.mxu0 %v2134_v21  ;;  %1001 = vmatpush.bf16.msra.mxu3 %v2113_v22 }
  0x5a   : > { %1043 = vmatpush.bf16.msra.mxu1 %v2137_v23 }
  0x5b   : > { %1015 = vmatpush.bf16.msra.mxu2 %v2121_v24 }
  0x5c   : > { %1002 = vmatmul.bf16.vlgmr.msra.gmra.mxu3 %v2329_v45 }
  0x5d   : > { %1269 = vmatpush.bf16.msrb.mxu3 %v2147_v25  ;;  %1025 = vmatpush.bf16.msra.mxu0 %v2133_v28 }
  0x5e   : > { %1283 = vmatpush.bf16.msrb.mxu1 %v2155_v26  ;;  %1016 = vmatmul.bf16.vlgmr.msra.gmra.mxu2 %v2333_v47 }
  0x5f   : > { %1297 = vmatpush.bf16.msrb.mxu2 %v2163_v27 }
  0x61   : > { %1270 = vmatpush.bf16.msrb.mxu3 %v2146_v29  ;;  %1026 = vmatpush.bf16.msra.mxu0 %v2132_v32 }
  0x62   : > { %1284 = vmatpush.bf16.msrb.mxu1 %v2154_v30 }
  0x63   : > { %1298 = vmatpush.bf16.msrb.mxu2 %v2162_v31  ;;  %1888 = vmatmul.msk.bf16.vlgmr.msra.gmra.mxu1 %vm442_vm0, %v2287_v18 }
  0x65   : > { %1271 = vmatpush.bf16.msrb.mxu3 %v2145_v33  ;;  %1027 = vmatpush.bf16.msra.mxu0 %v2131_v36 }
  0x66   : > { %1285 = vmatpush.bf16.msrb.mxu1 %v2153_v34 }
  0x67   : > { %1299 = vmatpush.bf16.msrb.mxu2 %v2161_v35 }
  0x69   : > { %1272 = vmatpush.bf16.msrb.mxu3 %v2144_v39  ;;  %1028 = vmatpush.bf16.msra.mxu0 %v2130_v42 }
  0x6a   : > { %1286 = vmatpush.bf16.msrb.mxu1 %v2152_v40 }
  0x6b   : > { %1300 = vmatpush.bf16.msrb.mxu2 %v2160_v41 }
  0x6d   : > { %1273 = vmatpush.bf16.msrb.mxu3 %v2143_v43  ;;  %1029 = vmatpush.bf16.msra.mxu0 %v2129_v50 }
  0x6e   : > { %1287 = vmatpush.bf16.msrb.mxu1 %v2151_v44 }
  0x6f   : > { %1301 = vmatpush.bf16.msrb.mxu2 %v2159_v48 }
  0x70   : > { %1030 = vmatmul.bf16.vlgmr.msra.gmra.mxu0 %v2331_v46 }
  0x71   : > { %1316 = vmatpush.bf16.msrb.mxu0 %v2166_v51  ;;  %1274 = vmatpush.bf16.msrb.mxu3 %v2142_v52 }
  0x72   : > { %1288 = vmatpush.bf16.msrb.mxu1 %v2150_v53 }
  0x73   : > { %1302 = vmatpush.bf16.msrb.mxu2 %v2158_v54 }
  0x75   : > { %1317 = vmatpush.bf16.msrb.mxu0 %v2165_v55  ;;  %1275 = vmatpush.bf16.msrb.mxu3 %v2141_v56 }
  0x76   : > { %1289 = vmatpush.bf16.msrb.mxu1 %v2149_v57 }
  0x77   : > { %1303 = vmatpush.bf16.msrb.mxu2 %v2157_v58 }
  0x79   : > { %1318 = vmatpush.bf16.msrb.mxu0 %v2164_v59  ;;  %1276 = vmatpush.bf16.msrb.mxu3 %v2140_v60 }
  0x7a   : > { %1290 = vmatpush.bf16.msrb.mxu1 %v2148_v61 }
  0x7b   : > { %1304 = vmatpush.bf16.msrb.mxu2 %v2156_v62 }
  0x7c   : > { %1277 = vmatmul.bf16.vlgmr.msrb.gmra.mxu3 %v2329_v45 }
  0x7d   : > { %1291 = vmatmul.bf16.vlgmr.msrb.gmra.mxu1 %v2333_v47 }
  0x7e   : > { %1305 = vmatmul.bf16.vlgmr.msrb.gmra.mxu2 %v2331_v46 }
  0x80   : > { %2051 = vmatmul.msk.bf16.vlgmr.msrb.gmra.mxu0 %vm442_vm0, %v2287_v18 }
  0x84   : > { %v1332_v44 = vpop.permute.xlu0 %1331 }
  0x9f   : > { %v497_v1 = vpop.f32.mrf.mxu3 }
  0xa7   : > { %v499_v5 = vpop.f32.mrf.mxu3 }
  0xad   : > { %v455_v2 = vpop.f32.mrf.mxu0 }
  0xb0   : > { %v469_v63 = vpop.f32.mrf.mxu1 }
  0xb1   : > { %v470_v19 = vadd.f32 %v469_v63, %v455_v2 }
  0xb5   : > { %v483_v0 = vpop.f32.mrf.mxu2  ;;  %v457_v6 = vpop.f32.mrf.mxu0 }
  0xb6   : > { %v484_v24 = vadd.f32 %v483_v0, %v470_v19  ;;  %v1337_v0 = vpop.permute.xlu0 %1336 }
  0xb8   : > { %v471_v3 = vpop.f32.mrf.mxu1  ;;  %v498_v30 = vadd.f32 %v497_v1, %v484_v24 }
  0xb9   : > { %v472_v31 = vadd.f32 %v471_v3, %v457_v6 }
  0xbd   : > { %v485_v4 = vpop.f32.mrf.mxu2 }
  0xbe   : > { %v486_v40 = vadd.f32 %v485_v4, %v472_v31 }
  0xbf   : > { %v728_v9 = vpop.f32.mrf.mxu3 }
  0xc0   : > { %v500_v52 = vadd.f32 %v499_v5, %v486_v40 }
  0xc5   : > { %v770_v8 = vpop.f32.mrf.mxu2 }
  0xc7   : > { %v730_v47 = vpop.f32.mrf.mxu3 }
  0xcd   : > { %v742_v10 = vpop.f32.mrf.mxu0  ;;  %v772_v11 = vpop.f32.mrf.mxu2 }
  0xce   : > { %v743_v16 = vadd.f32 %v742_v10, %v728_v9 }
  0xd0   : > { %v756_v7 = vpop.f32.mrf.mxu1 }
  0xd1   : > { %v757_v23 = vadd.f32 %v756_v7, %v743_v16 }
  0xd3   : > { %v771_v27 = vadd.f32 %v770_v8, %v757_v23 }
  0xd5   : > { %v744_v12 = vpop.f32.mrf.mxu0  ;;  %v775_v36 = vmax.f32 %v498_v30, %v771_v27 }
  0xd6   : > { %v745_v28 = vadd.f32 %v744_v12, %v730_v47 }
  0xd8   : > { %v758_v45 = vpop.f32.mrf.mxu1 }
  0xd9   : > { %v759_v37 = vadd.f32 %v758_v45, %v745_v28 }
  0xdb   : > { %v773_v48 = vadd.f32 %v772_v11, %v759_v37 }
  0xdd   : > { %v776_v57 = vmax.f32 %v500_v52, %v773_v48 }
  0xdf   : > { %v1003_v13 = vpop.f32.mrf.mxu3 }
  0xe0   : > { %v1045_v46 = vpop.f32.mrf.mxu1 }
  0xe1   : > { %v1017_v14 = vpop.f32.mrf.mxu2 }
  0xe2   : > { %v1018_v20 = vadd.f32 %v1017_v14, %v1003_v13 }
  0xe7   : > { %v1005_v17 = vpop.f32.mrf.mxu3 }
  0xe8   : > { %v1047_v15 = vpop.f32.mrf.mxu1 }
  0xe9   : > { %v1019_v21 = vpop.f32.mrf.mxu2 }
  0xea   : > { %v1020_v38 = vadd.f32 %v1019_v21, %v1005_v17 }
  0xed   : > { %v1031_v18 = vpop.f32.mrf.mxu0 }
  0xee   : > { %v1032_v25 = vadd.f32 %v1031_v18, %v1018_v20 }
  0xf0   : > { %v1046_v32 = vadd.f32 %v1045_v46, %v1032_v25 }
  0xf2   : > { %v1050_v42 = vmax.f32 %v775_v36, %v1046_v32 }
  0xf5   : > { %v1033_v22 = vpop.f32.mrf.mxu0 }
  0xf6   : > { %v1034_v41 = vadd.f32 %v1033_v22, %v1020_v38 }
  0xf8   : > { %v1048_v53 = vadd.f32 %v1047_v15, %v1034_v41 }
  0xfa   : > { %v1292_v26 = vpop.f32.mrf.mxu1  ;;  %v1051_v61 = vmax.f32 %v776_v57, %v1048_v53 }
  0xfd   : > { %v1320_v35 = vpop.f32.mrf.mxu0 }
  0xff   : > { %v1278_v29 = vpop.f32.mrf.mxu3 }
 0x100   : > { %v1293_v33 = vadd.f32 %v1292_v26, %v1278_v29 }
 0x101   : > { %v1306_v34 = vpop.f32.mrf.mxu2 }
 0x102   : > { %v1307_v39 = vadd.f32 %v1306_v34, %v1293_v33  ;;  %v1294_v50 = vpop.f32.mrf.mxu1 }
 0x104   : > { %v1321_v43 = vadd.f32 %v1320_v35, %v1307_v39 }
 0x105   : > { %v1322_v60 = vpop.f32.mrf.mxu0 }
 0x106   : > { %v1325_v49 = vmax.f32 %v1050_v42, %v1321_v43 }
 0x107   : > { %v1280_v51 = vpop.f32.mrf.mxu3 }
 0x108   : > { %v1339_v54 = vadd.f32 %v1332_v44, %v1325_v49  ;;  %v1295_v55 = vadd.f32 %v1294_v50, %v1280_v51 }
 0x109   : > { %v1308_v56 = vpop.f32.mrf.mxu2 }
 0x10a   : > { %v1341_v58 = vmax.f32 %v1339_v54, 0.0  ;;  %v1309_v59 = vadd.f32 %v1308_v56, %v1295_v55 }
 0x10c   : > { %1344 = vst.msk [vmem:[%s201_s20] sm:$0xff] %vm1343_vm1, %v1341_v58  ;;  %v1323_v62 = vadd.f32 %v1322_v60, %v1309_v59 }
 0x10e   : > { %v1326_v63 = vmax.f32 %v1051_v61, %v1323_v62 }
 0x110   : > { %v1340_v1 = vadd.f32 %v1337_v0, %v1326_v63 }
 0x112   : > { %v1342_v2 = vmax.f32 %v1340_v1, 0.0 }
 0x114   : > { %1346 = vst.msk [vmem:[%s201_s20 + $0x8] sm:$0xf] %vm1345_vm2, %v1342_v2 }
 0x115 PF: > { %s13_s14 = sadd.s32 1, %s2216_s14   ;;  %s2448_s12 = smov %s2212_s13 }
 0x116   : > { %p10_p5 = scmp.ge.s32.totalorder %s13_s14, 4   ;;  %s2449_s13 = smov %s2451_s15 }
 0x118   :  { %12 = sbr.rel (!%p10_p5) target bundleno = 2 (0x2), region = 65 }

// kernel: lipnet_forward.11
= control target key start
LH: loop header
LB: loop body
LE: loop exit
PB: predicated region body
PF: predicated region fallthrough
CT: control target
= control target key end

     0   :  { %s795_s12 = smov 0   ;;  %s797_s13 = smov 0   ;;  %s878_s0 = inlined_call_operand.vmem [shape: bf16[16,48], index: 0, kind: input, shape index: {}]   ;;  %s879_s1 = inlined_call_operand.vmem [shape: bf16[48,768], index: 1, kind: input, shape index: {}]   ;;  %s880_s2 = inlined_call_operand.vmem [shape: f32[1,768], index: 2, kind: input, shape index: {}]   ;;  %s881_s3 = inlined_call_operand.vmem [shape: f32[16,768], index: 3, kind: output, shape index: {}]  }
   0x1   :  { %s799_s14 = smov 0   ;;  %s801_s15 = smov 0  }
   0x2   :  { %s803_s16 = smov 0  }
   0x3 LB: > { %s28_s17 = sadd.s32 1, %s769_s15  ;;  %s615_s18 = sadd.s32 4294967295, %s773_s16   ;;  %s773_s16 = sphi %s803_s16, %s13_s16   ;;  %s769_s15 = sphi %s801_s15, %s886_s15   ;;  %s765_s14 = sphi %s799_s14, %s885_s14   ;;  %s761_s13 = sphi %s797_s13, %s884_s13   ;;  %s757_s12 = sphi %s795_s12, %s883_s12  }
   0x4   : > { %p30_p0 = scmp.ge.s32.totalorder %s28_s17, 2  ;;  %p76_p1 = scmp.ne.s32.totalorder %s761_s13, %s757_s12 }
   0x5   : > { %p77_p2 = scmp.eq.s32.totalorder %s773_s16, 0  ;;  %p134_p4 = scmp.eq.s32.totalorder %s615_s18, 1 }
   0x6   : > { %s888_s17 = smov (%p30_p0, %s28_s17), 0  ;;  %s69_s20 = sadd.s32 1, %s761_s13 }
   0x7   : > { %p78_p3 = por %p77_p2, %p76_p1  ;;  %s65_s19 = ssub.s32 %s769_s15, %s888_s17 }
   0x8   : > { %p67_p5 = scmp.eq.s32.totalorder %s65_s19, 0  ;;  %p830_p6 = por %p134_p4, %p76_p1 }
   0x9   : > { %p619_p7 = scmp.ge.s32.totalorder %s773_s16, 2 }
   0xa   : > { %s835_s22 = scalar_select %p67_p5, %s761_s13, %s69_s20  }
   0xb   : > { %168 = sbr.rel (%p619_p7) target bundleno = 33 (0x21), region = 20 }
  0x10   : > { %171 = sbr.rel (!%p78_p3) target bundleno = 33 (0x21), region = 24  ;;  %s173_s23 = sand.u32 (%p78_p3), 1, %s761_s13  }
  0x11   : > { %s680_s24 = smul.u32 (%p78_p3), 12, %s769_s15 }
  0x12   : > { %s692_s25 = smul.u32 (%p78_p3), 72, %s173_s23 }
  0x13   : > { %s181_s28 = scalar_lea.vmem (%p78_p3), %s879_s1, %s680_s24 }
  0x14   : > { %v196_v0 = vld [vmem:[%s181_s28] sm:$0xff] (%p78_p3)  ;;  %v198_v1 = vld [vmem:[%s181_s28 + $0x18] sm:$0xff] (%p78_p3)  ;;  %v200_v2 = vld [vmem:[%s181_s28 + $0x30] sm:$0xff] (%p78_p3)  ;;  %s175_s29 = scalar_lea.vmem (%p78_p3), [#allocation3], %s692_s25 }
  0x15   : > { %197 = vst [vmem:[%s175_s29] sm:$0xff] %v196_v0  ;;  %v202_v3 = vld [vmem:[%s181_s28 + $0x48] sm:$0xff]  ;;  %v204_v4 = vld [vmem:[%s181_s28 + $0x60] sm:$0xff]  ;;  %v206_v5 = vld [vmem:[%s181_s28 + $0x78] sm:$0xff] }
  0x16   : > { %199 = vst [vmem:[%s175_s29 + $0xc] sm:$0xff] %v198_v1  ;;  %v621_v6 = vld [vmem:[%s181_s28 + $0x8] sm:$0xf]  ;;  %v623_v7 = vld [vmem:[%s181_s28 + $0x20] sm:$0xf] }
  0x17   : > { %201 = vst [vmem:[%s175_s29 + $0x18] sm:$0xff] %v200_v2  ;;  %v625_v8 = vld [vmem:[%s181_s28 + $0x38] sm:$0xf]  ;;  %v627_v9 = vld [vmem:[%s181_s28 + $0x50] sm:$0xf] }
  0x18   : > { %203 = vst [vmem:[%s175_s29 + $0x24] sm:$0xff] %v202_v3  ;;  %v629_v10 = vld [vmem:[%s181_s28 + $0x68] sm:$0xf]  ;;  %v631_v11 = vld [vmem:[%s181_s28 + $0x80] sm:$0xf] }
  0x19   : > { %205 = vst [vmem:[%s175_s29 + $0x30] sm:$0xff] %v204_v4 }
  0x1a   : > { %207 = vst [vmem:[%s175_s29 + $0x3c] sm:$0xff] %v206_v5 }
  0x1b   : > { %622 = vst [vmem:[%s175_s29 + $0x8] sm:$0xf] %v621_v6 }
  0x1c   : > { %624 = vst [vmem:[%s175_s29 + $0x14] sm:$0xf] %v623_v7 }
  0x1d   : > { %626 = vst [vmem:[%s175_s29 + $0x20] sm:$0xf] %v625_v8 }
  0x1e   : > { %628 = vst [vmem:[%s175_s29 + $0x2c] sm:$0xf] %v627_v9 }
  0x1f   : > { %630 = vst [vmem:[%s175_s29 + $0x38] sm:$0xf] %v629_v10 }
  0x20   : > { %632 = vst [vmem:[%s175_s29 + $0x44] sm:$0xf] %v631_v11 }
  0x21 PF: > { %p633_p8 = scmp.ge.s32.totalorder %s773_s16, 1  ;;  %p240_p9 = scmp.lt.s32.totalorder %s773_s16, 3 }
  0x23   : > { %p241_p10 = pnand %p633_p8, %p240_p9 }
  0x24   : > { %s247_s30 = sand.u32 (!%p241_p10), 1, %s757_s12   ;;  %s292_s8 = smul.u32 (!%p241_p10), 3, %s765_s14 }
  0x25   : > { %244 = sbr.rel (%p241_p10) target bundleno = 208 (0xd0), region = 54 }
  0x26   : > { %s693_s4 = smul.u32 (!%p241_p10), 72, %s247_s30  ;;  %p293_p11 = scmp.lt.s32.totalorder (!%p241_p10), %s292_s8, 5 }
  0x27   : > { %s694_s18 = smul.u32 (!%p241_p10), 48, %s247_s30 }
  0x28   : > { %s249_s5 = scalar_lea.vmem (!%p241_p10), [#allocation3], %s693_s4 }
  0x29   : > { %s280_s19 = scalar_lea.vmem (!%p241_p10), [#allocation4], %s694_s18 }
  0x2a   : > { %v664_v12 = vld [vmem:[%s249_s5 + $0x30] sm:$0xf]  ;;  %v689_v13 = vld [vmem:[%s249_s5 + $0x38] sm:$0xf0]  ;;  %v688_v14 = vld [vmem:[%s249_s5 + $0x34] sm:$0xf] }
  0x2b   : > { %v665_v15 = vor.u32 %v689_v13, %v664_v12  ;;  %v666_v16 = vld [vmem:[%s249_s5 + $0x3c] sm:$0xf0]  ;;  %v672_v17 = vld [vmem:[%s249_s5 + $0x38] sm:$0xf]  ;;  %v690_v18 = vld [vmem:[%s249_s5 + $0x40] sm:$0xf0] }
  0x2c   : > { %v669_v19 = vor.u32 %v688_v14, %v666_v16  ;;  %v673_v20 = vor.u32 %v690_v18, %v672_v17  ;;  %v652_v21 = vld [vmem:[%s249_s5 + $0x18] sm:$0xf]  ;;  %v686_v22 = vld [vmem:[%s249_s5 + $0x20] sm:$0xf0]  ;;  %v685_v23 = vld [vmem:[%s249_s5 + $0x1c] sm:$0xf] }
  0x2d   : > { %392 = vmatpush.bf16.msra.mxu0 %v665_v15  ;;  %v653_v24 = vor.u32 %v686_v22, %v652_v21  ;;  %v654_v25 = vld [vmem:[%s249_s5 + $0x24] sm:$0xf0]  ;;  %v660_v26 = vld [vmem:[%s249_s5 + $0x20] sm:$0xf]  ;;  %v687_v27 = vld [vmem:[%s249_s5 + $0x28] sm:$0xf0] }
  0x2e   : > { %406 = vmatpush.bf16.msra.mxu1 %v669_v19  ;;  %420 = vmatpush.bf16.msra.mxu2 %v673_v20  ;;  %v657_v28 = vor.u32 %v685_v23, %v654_v25  ;;  %v661_v29 = vor.u32 %v687_v27, %v660_v26  ;;  %v640_v30 = vld [vmem:[%s249_s5] sm:$0xf]  ;;  %v683_v31 = vld [vmem:[%s249_s5 + $0x8] sm:$0xf0]  ;;  %v682_v32 = vld [vmem:[%s249_s5 + $0x4] sm:$0xf] }
  0x2f   : > { %v642_v33 = vld [vmem:[%s249_s5 + $0xc] sm:$0xf0]  ;;  %v648_v34 = vld [vmem:[%s249_s5 + $0x8] sm:$0xf]  ;;  %v684_v35 = vld [vmem:[%s249_s5 + $0x10] sm:$0xf0]  ;;  %v641_v36 = vor.u32 %v683_v31, %v640_v30 }
  0x30   : > { %v645_v37 = vor.u32 %v682_v32, %v642_v33  ;;  %v649_v38 = vor.u32 %v684_v35, %v648_v34  ;;  %v681_v39 = vld [vmem:[%s878_s0] sm:$0xff]  ;;  %vm383_vm0 = vcmask 392192   ;;  %s890_s8 = smov (!%p293_p11, %s292_s8), 5  ;;  %s691_s12 = smul.u32 (%p830_p6), 24, %s765_s14 }
  0x31   : > { %393 = vmatpush.bf16.msra.mxu0 %v653_v24  ;;  %s295_s11 = scalar_lea.vmem %s880_s2, %s890_s8 }
  0x32   : > { %407 = vmatpush.bf16.msra.mxu1 %v657_v28  ;;  %421 = vmatpush.bf16.msra.mxu2 %v661_v29  ;;  %v450_v40 = vld [vmem:[%s295_s11] sm:$0x7]  ;;  %s482_s24 = scalar_lea.vmem (%p830_p6), %s881_s3, %s691_s12 }
  0x33   : > { %v452_v41 = vperm.slane %v450_v40, 0  ;;  %v453_v42 = vperm.slane %v450_v40, 1  ;;  %v454_v47 = vperm.slane %v450_v40, 2 }
  0x35   : > { %394 = vmatpush.bf16.msra.mxu0 %v641_v36 }
  0x36   : > { %408 = vmatpush.bf16.msra.mxu1 %v645_v37  ;;  %422 = vmatpush.bf16.msra.mxu2 %v649_v38 }
  0x38   : > { %674 = vmatmul.msk.bf16.vlgmr.msra.gmra.mxu0 %vm383_vm0, %v681_v39 }
  0x39   : > { %675 = vmatmul.msk.bf16.vlgmr.msra.gmra.mxu1 %vm383_vm0, %v681_v39  ;;  %676 = vmatmul.msk.bf16.vlgmr.msra.gmra.mxu2 %vm383_vm0, %v681_v39 }
  0xb5   : > { %v396_v43 = vpop.f32.mrf.mxu0 }
  0xb6   : > { %v458_v44 = vadd.f32 %v452_v41, %v396_v43  ;;  %v410_v45 = vpop.f32.mrf.mxu1 }
  0xb7   : > { %v459_v46 = vadd.f32 %v453_v42, %v410_v45 }
  0xb8   : > { %464 = vst [vmem:[%s280_s19] sm:$0xff] %v458_v44 }
  0xb9   : > { %465 = vst [vmem:[%s280_s19 + $0x8] sm:$0xff] %v459_v46 }
  0xbc   : > { %v424_v48 = vpop.f32.mrf.mxu2 }
  0xbd   : > { %v460_v49 = vadd.f32 %v454_v47, %v424_v48  ;;  %v398_v50 = vpop.f32.mrf.mxu0 }
  0xbe   : > { %v461_v51 = vadd.f32 %v452_v41, %v398_v50  ;;  %v412_v52 = vpop.f32.mrf.mxu1 }
  0xbf   : > { %466 = vst [vmem:[%s280_s19 + $0x10] sm:$0xff] %v460_v49  ;;  %v462_v53 = vadd.f32 %v453_v42, %v412_v52  ;;  %v495_v56 = vld [vmem:[%s280_s19] sm:$0xff] (%p830_p6) }
  0xc0   : > { %467 = vst [vmem:[%s280_s19 + $0x18] sm:$0xff] %v461_v51  ;;  %v497_v57 = vld [vmem:[%s280_s19 + $0x8] sm:$0xff] (%p830_p6) }
  0xc1   : > { %468 = vst [vmem:[%s280_s19 + $0x20] sm:$0xff] %v462_v53 }
  0xc2   : > { %496 = vst [vmem:[%s482_s24] sm:$0xff] (%p830_p6), %v495_v56 }
  0xc3   : > { %476 = sbr.rel (!%p830_p6) target bundleno = 208 (0xd0), region = 70  ;;  %498 = vst [vmem:[%s482_s24 + $0x8] sm:$0xff] (%p830_p6), %v497_v57 }
  0xc4   : > { %v426_v54 = vpop.f32.mrf.mxu2 }
  0xc5   : > { %v463_v55 = vadd.f32 %v454_v47, %v426_v54 }
  0xc6   : > { %v499_v58 = vld [vmem:[%s280_s19 + $0x10] sm:$0xff] (%p830_p6) }
  0xc7   : > { %469 = vst [vmem:[%s280_s19 + $0x28] sm:$0xff] %v463_v55  ;;  %v501_v59 = vld [vmem:[%s280_s19 + $0x18] sm:$0xff] (%p830_p6) }
  0xc8   : > { %v503_v60 = vld [vmem:[%s280_s19 + $0x20] sm:$0xff]  ;;  %500 = vst [vmem:[%s482_s24 + $0x10] sm:$0xff] %v499_v58 }
  0xc9   : > { %502 = vst [vmem:[%s482_s24 + $0x30] sm:$0xff] %v501_v59 }
  0xca   : > { %504 = vst [vmem:[%s482_s24 + $0x38] sm:$0xff] %v503_v60 }
  0xce   : > { %v505_v61 = vld [vmem:[%s280_s19 + $0x28] sm:$0xff] }
  0xcf   : > { %506 = vst [vmem:[%s482_s24 + $0x40] sm:$0xff] %v505_v61 }
  0xd0 PF: > { %s13_s16 = sadd.s32 1, %s773_s16   ;;  %s883_s12 = smov %s761_s13 }
  0xd1   : > { %p10_p12 = scmp.ge.s32.totalorder %s13_s16, 4   ;;  %s884_s13 = smov %s835_s22 }
  0xd2   : > { %s885_s14 = smov %s769_s15  ;;  %s886_s15 = smov %s888_s17 }
  0xd3   :  { %12 = sbr.rel (!%p10_p12) target bundleno = 3 (0x3), region = 136 }

// kernel: lipnet_forward.12
= control target key start
LH: loop header
LB: loop body
LE: loop exit
PB: predicated region body
PF: predicated region fallthrough
CT: control target
= control target key end

     0   :  { %s1858_s12 = smov 0   ;;  %s1860_s13 = smov 0   ;;  %s2834_s0 = inlined_call_operand.vmem [shape: f32[8,2,768], index: 0, kind: input, shape index: {}]   ;;  %s2835_s1 = inlined_call_operand.vmem [shape: f32[128,768], index: 1, kind: input, shape index: {}]   ;;  %s2836_s2 = inlined_call_operand.vmem [shape: f32[1,768], index: 2, kind: input, shape index: {}]   ;;  %s2837_s3 = inlined_call_operand.vmem [shape: f32[8,2,256], index: 3, kind: output, shape index: {}]  }
   0x1   :  { %s1862_s14 = smov 0  }
   0x2 LB: > { %s1874_s15 = sadd.s32 4294967295, %s1835_s14   ;;  %s1877_s16 = sadd.s32 1, %s1835_s14   ;;  %s1835_s14 = sphi %s1862_s14, %s2887_s14   ;;  %s1831_s13 = sphi %s1860_s13, %s2886_s13   ;;  %s1827_s12 = sphi %s1858_s12, %s2885_s12  }
   0x3   : > { %s17_s17 = ssub.s32 %s1835_s14, %s1877_s16  ;;  %s20_s18 = sadd.s32 1, %s1831_s13 }
   0x4   : > { %p18_p0 = scmp.eq.s32.totalorder %s17_s17, 0  ;;  %p27_p1 = scmp.ne.s32.totalorder %s1831_s13, %s1827_s12 }
   0x5   : > { %p28_p2 = scmp.eq.s32.totalorder %s1835_s14, 0  ;;  %p109_p3 = scmp.eq.s32.totalorder %s1874_s15, 1 }
   0x6   : > { %s1887_s19 = scalar_select %p18_p0, %s1831_s13, %s20_s18  }
   0x7   : > { %p1889_p4 = por %p28_p2, %p27_p1  ;;  %p1893_p5 = por %p109_p3, %p27_p1 }
   0x8   : > { %p1605_p6 = scmp.ge.s32.totalorder %s1835_s14, 2 }
   0xa   : > { %131 = sbr.rel (%p1605_p6) target bundleno = 81 (0x51), region = 16 }
   0xf   : > { %134 = sbr.rel (!%p1889_p4) target bundleno = 28 (0x1c), region = 20  ;;  %s136_s22 = sand.u32 (%p1889_p4), 1, %s1831_s13  }
  0x10   : > { %s1646_s23 = smul.u32 (%p1889_p4), 6, %s1835_s14 }
  0x11   : > { %s1656_s24 = smul.u32 (%p1889_p4), 48, %s136_s22 }
  0x12   : > { %s141_s27 = scalar_lea.vmem (%p1889_p4), %s2834_s0, %s1646_s23 }
  0x13   : > { %v158_v0 = vld [vmem:[%s141_s27] sm:$0x3f] (%p1889_p4)  ;;  %v160_v1 = vld [vmem:[%s141_s27 + $0xc] sm:$0x3f] (%p1889_p4)  ;;  %s138_s28 = scalar_lea.vmem (%p1889_p4), [#allocation2], %s1656_s24 }
  0x14   : > { %159 = vst [vmem:[%s138_s28] sm:$0x3f] %v158_v0  ;;  %v162_v2 = vld [vmem:[%s141_s27 + $0x18] sm:$0x3f]  ;;  %v164_v3 = vld [vmem:[%s141_s27 + $0x24] sm:$0x3f] }
  0x15   : > { %161 = vst [vmem:[%s138_s28 + $0x6] sm:$0x3f] %v160_v1  ;;  %v166_v4 = vld [vmem:[%s141_s27 + $0x30] sm:$0x3f]  ;;  %v168_v5 = vld [vmem:[%s141_s27 + $0x3c] sm:$0x3f] }
  0x16   : > { %163 = vst [vmem:[%s138_s28 + $0xc] sm:$0x3f] %v162_v2  ;;  %v170_v6 = vld [vmem:[%s141_s27 + $0x48] sm:$0x3f]  ;;  %v172_v7 = vld [vmem:[%s141_s27 + $0x54] sm:$0x3f] }
  0x17   : > { %165 = vst [vmem:[%s138_s28 + $0x12] sm:$0x3f] %v164_v3 }
  0x18   : > { %167 = vst [vmem:[%s138_s28 + $0x18] sm:$0x3f] %v166_v4 }
  0x19   : > { %169 = vst [vmem:[%s138_s28 + $0x1e] sm:$0x3f] %v168_v5 }
  0x1a   : > { %171 = vst [vmem:[%s138_s28 + $0x24] sm:$0x3f] %v170_v6 }
  0x1b   : > { %173 = vst [vmem:[%s138_s28 + $0x2a] sm:$0x3f] %v172_v7 }
  0x1c PF: > { %213 = sbr.rel (!%p1889_p4) target bundleno = 81 (0x51), region = 61  ;;  %s215_s29 = sand.u32 (%p1889_p4), 1, %s1831_s13  }
  0x1d   : > { %s1647_s30 = smul.u32 (%p1889_p4), 24, %s1835_s14 }
  0x1e   : > { %s1657_s4 = smul.u32 (%p1889_p4), 384, %s215_s29 }
  0x1f   : > { %s1912_s7 = scalar_lea.vmem (%p1889_p4), %s2835_s1, %s1647_s30 }
  0x20   : > { %v233_v8 = vld [vmem:[%s1912_s7] sm:$0xff] (%p1889_p4)  ;;  %v235_v9 = vld [vmem:[%s1912_s7 + $0x8] sm:$0xff] (%p1889_p4)  ;;  %v237_v10 = vld [vmem:[%s1912_s7 + $0x10] sm:$0xff] (%p1889_p4)  ;;  %s1917_s8 = scalar_lea.vmem (%p1889_p4), [#allocation3], %s1657_s4 }
  0x21   : > { %234 = vst [vmem:[%s1917_s8] sm:$0xff] %v233_v8  ;;  %v239_v11 = vld [vmem:[%s1912_s7 + $0x30] sm:$0xff]  ;;  %v241_v12 = vld [vmem:[%s1912_s7 + $0x38] sm:$0xff]  ;;  %v243_v13 = vld [vmem:[%s1912_s7 + $0x40] sm:$0xff] }
  0x22   : > { %236 = vst [vmem:[%s1917_s8 + $0x8] sm:$0xff] %v235_v9  ;;  %v245_v14 = vld [vmem:[%s1912_s7 + $0x60] sm:$0xff]  ;;  %v247_v15 = vld [vmem:[%s1912_s7 + $0x68] sm:$0xff]  ;;  %v249_v16 = vld [vmem:[%s1912_s7 + $0x70] sm:$0xff] }
  0x23   : > { %238 = vst [vmem:[%s1917_s8 + $0x10] sm:$0xff] %v237_v10  ;;  %v251_v17 = vld [vmem:[%s1912_s7 + $0x90] sm:$0xff]  ;;  %v253_v18 = vld [vmem:[%s1912_s7 + $0x98] sm:$0xff]  ;;  %v255_v19 = vld [vmem:[%s1912_s7 + $0xa0] sm:$0xff] }
  0x24   : > { %240 = vst [vmem:[%s1917_s8 + $0x18] sm:$0xff] %v239_v11  ;;  %v257_v20 = vld [vmem:[%s1912_s7 + $0xc0] sm:$0xff]  ;;  %v259_v21 = vld [vmem:[%s1912_s7 + $0xc8] sm:$0xff]  ;;  %v261_v22 = vld [vmem:[%s1912_s7 + $0xd0] sm:$0xff] }
  0x25   : > { %242 = vst [vmem:[%s1917_s8 + $0x20] sm:$0xff] %v241_v12  ;;  %v263_v23 = vld [vmem:[%s1912_s7 + $0xf0] sm:$0xff]  ;;  %v265_v24 = vld [vmem:[%s1912_s7 + $0xf8] sm:$0xff]  ;;  %v267_v25 = vld [vmem:[%s1912_s7 + $0x100] sm:$0xff] }
  0x26   : > { %244 = vst [vmem:[%s1917_s8 + $0x28] sm:$0xff] %v243_v13  ;;  %v269_v26 = vld [vmem:[%s1912_s7 + $0x120] sm:$0xff]  ;;  %v271_v27 = vld [vmem:[%s1912_s7 + $0x128] sm:$0xff]  ;;  %v273_v28 = vld [vmem:[%s1912_s7 + $0x130] sm:$0xff] }
  0x27   : > { %246 = vst [vmem:[%s1917_s8 + $0x30] sm:$0xff] %v245_v14  ;;  %v275_v29 = vld [vmem:[%s1912_s7 + $0x150] sm:$0xff]  ;;  %v277_v30 = vld [vmem:[%s1912_s7 + $0x158] sm:$0xff]  ;;  %v279_v31 = vld [vmem:[%s1912_s7 + $0x160] sm:$0xff] }
  0x28   : > { %248 = vst [vmem:[%s1917_s8 + $0x38] sm:$0xff] %v247_v15  ;;  %v281_v32 = vld [vmem:[%s1912_s7 + $0x180] sm:$0xff]  ;;  %v283_v33 = vld [vmem:[%s1912_s7 + $0x188] sm:$0xff]  ;;  %v285_v34 = vld [vmem:[%s1912_s7 + $0x190] sm:$0xff] }
  0x29   : > { %250 = vst [vmem:[%s1917_s8 + $0x40] sm:$0xff] %v249_v16  ;;  %v287_v35 = vld [vmem:[%s1912_s7 + $0x1b0] sm:$0xff]  ;;  %v289_v36 = vld [vmem:[%s1912_s7 + $0x1b8] sm:$0xff]  ;;  %v291_v37 = vld [vmem:[%s1912_s7 + $0x1c0] sm:$0xff] }
  0x2a   : > { %252 = vst [vmem:[%s1917_s8 + $0x48] sm:$0xff] %v251_v17  ;;  %v293_v38 = vld [vmem:[%s1912_s7 + $0x1e0] sm:$0xff]  ;;  %v295_v39 = vld [vmem:[%s1912_s7 + $0x1e8] sm:$0xff]  ;;  %v297_v40 = vld [vmem:[%s1912_s7 + $0x1f0] sm:$0xff] }
  0x2b   : > { %254 = vst [vmem:[%s1917_s8 + $0x50] sm:$0xff] %v253_v18  ;;  %v299_v41 = vld [vmem:[%s1912_s7 + $0x210] sm:$0xff]  ;;  %v301_v42 = vld [vmem:[%s1912_s7 + $0x218] sm:$0xff]  ;;  %v303_v43 = vld [vmem:[%s1912_s7 + $0x220] sm:$0xff] }
  0x2c   : > { %256 = vst [vmem:[%s1917_s8 + $0x58] sm:$0xff] %v255_v19  ;;  %v305_v44 = vld [vmem:[%s1912_s7 + $0x240] sm:$0xff]  ;;  %v307_v45 = vld [vmem:[%s1912_s7 + $0x248] sm:$0xff]  ;;  %v309_v46 = vld [vmem:[%s1912_s7 + $0x250] sm:$0xff] }
  0x2d   : > { %258 = vst [vmem:[%s1917_s8 + $0x60] sm:$0xff] %v257_v20  ;;  %v311_v47 = vld [vmem:[%s1912_s7 + $0x270] sm:$0xff]  ;;  %v313_v48 = vld [vmem:[%s1912_s7 + $0x278] sm:$0xff]  ;;  %v315_v49 = vld [vmem:[%s1912_s7 + $0x280] sm:$0xff] }
  0x2e   : > { %260 = vst [vmem:[%s1917_s8 + $0x68] sm:$0xff] %v259_v21  ;;  %v317_v50 = vld [vmem:[%s1912_s7 + $0x2a0] sm:$0xff]  ;;  %v319_v51 = vld [vmem:[%s1912_s7 + $0x2a8] sm:$0xff]  ;;  %v321_v52 = vld [vmem:[%s1912_s7 + $0x2b0] sm:$0xff] }
  0x2f   : > { %262 = vst [vmem:[%s1917_s8 + $0x70] sm:$0xff] %v261_v22  ;;  %v323_v53 = vld [vmem:[%s1912_s7 + $0x2d0] sm:$0xff]  ;;  %v325_v54 = vld [vmem:[%s1912_s7 + $0x2d8] sm:$0xff]  ;;  %v327_v55 = vld [vmem:[%s1912_s7 + $0x2e0] sm:$0xff] }
  0x30   : > { %264 = vst [vmem:[%s1917_s8 + $0x78] sm:$0xff] %v263_v23 }
  0x31   : > { %266 = vst [vmem:[%s1917_s8 + $0x80] sm:$0xff] %v265_v24 }
  0x32   : > { %268 = vst [vmem:[%s1917_s8 + $0x88] sm:$0xff] %v267_v25 }
  0x33   : > { %270 = vst [vmem:[%s1917_s8 + $0x90] sm:$0xff] %v269_v26 }
  0x34   : > { %272 = vst [vmem:[%s1917_s8 + $0x98] sm:$0xff] %v271_v27 }
  0x35   : > { %274 = vst [vmem:[%s1917_s8 + $0xa0] sm:$0xff] %v273_v28 }
  0x36   : > { %276 = vst [vmem:[%s1917_s8 + $0xa8] sm:$0xff] %v275_v29 }
  0x37   : > { %278 = vst [vmem:[%s1917_s8 + $0xb0] sm:$0xff] %v277_v30 }
  0x38   : > { %280 = vst [vmem:[%s1917_s8 + $0xb8] sm:$0xff] %v279_v31 }
  0x39   : > { %282 = vst [vmem:[%s1917_s8 + $0xc0] sm:$0xff] %v281_v32 }
  0x3a   : > { %284 = vst [vmem:[%s1917_s8 + $0xc8] sm:$0xff] %v283_v33 }
  0x3b   : > { %286 = vst [vmem:[%s1917_s8 + $0xd0] sm:$0xff] %v285_v34 }
  0x3c   : > { %288 = vst [vmem:[%s1917_s8 + $0xd8] sm:$0xff] %v287_v35 }
  0x3d   : > { %290 = vst [vmem:[%s1917_s8 + $0xe0] sm:$0xff] %v289_v36 }
  0x3e   : > { %292 = vst [vmem:[%s1917_s8 + $0xe8] sm:$0xff] %v291_v37 }
  0x3f   : > { %294 = vst [vmem:[%s1917_s8 + $0xf0] sm:$0xff] %v293_v38 }
  0x40   : > { %296 = vst [vmem:[%s1917_s8 + $0xf8] sm:$0xff] %v295_v39 }
  0x41   : > { %298 = vst [vmem:[%s1917_s8 + $0x100] sm:$0xff] %v297_v40 }
  0x42   : > { %300 = vst [vmem:[%s1917_s8 + $0x108] sm:$0xff] %v299_v41 }
  0x43   : > { %302 = vst [vmem:[%s1917_s8 + $0x110] sm:$0xff] %v301_v42 }
  0x44   : > { %304 = vst [vmem:[%s1917_s8 + $0x118] sm:$0xff] %v303_v43 }
  0x45   : > { %306 = vst [vmem:[%s1917_s8 + $0x120] sm:$0xff] %v305_v44 }
  0x46   : > { %308 = vst [vmem:[%s1917_s8 + $0x128] sm:$0xff] %v307_v45 }
  0x47   : > { %310 = vst [vmem:[%s1917_s8 + $0x130] sm:$0xff] %v309_v46 }
  0x48   : > { %312 = vst [vmem:[%s1917_s8 + $0x138] sm:$0xff] %v311_v47 }
  0x49   : > { %314 = vst [vmem:[%s1917_s8 + $0x140] sm:$0xff] %v313_v48 }
  0x4a   : > { %316 = vst [vmem:[%s1917_s8 + $0x148] sm:$0xff] %v315_v49 }
  0x4b   : > { %318 = vst [vmem:[%s1917_s8 + $0x150] sm:$0xff] %v317_v50 }
  0x4c   : > { %320 = vst [vmem:[%s1917_s8 + $0x158] sm:$0xff] %v319_v51 }
  0x4d   : > { %322 = vst [vmem:[%s1917_s8 + $0x160] sm:$0xff] %v321_v52 }
  0x4e   : > { %324 = vst [vmem:[%s1917_s8 + $0x168] sm:$0xff] %v323_v53 }
  0x4f   : > { %326 = vst [vmem:[%s1917_s8 + $0x170] sm:$0xff] %v325_v54 }
  0x50   : > { %328 = vst [vmem:[%s1917_s8 + $0x178] sm:$0xff] %v327_v55 }
  0x51 PF: > { %p1608_p7 = scmp.ge.s32.totalorder %s1835_s14, 1  ;;  %p341_p8 = scmp.lt.s32.totalorder %s1835_s14, 3 }
  0x53   : > { %p342_p9 = pnand %p1608_p7, %p341_p8 }
  0x55   : > { %345 = sbr.rel (%p342_p9) target bundleno = 1550 (0x60e), region = 88 }
  0x5a   : > { %s2015_s9 = sand.u32 1, %s1827_s12   ;;  %v1837_v36 = vmov 0.0   ;;  %s387_s12 = smul.u32 3, %s1874_s15 }
  0x5b   : > { %s1659_s10 = smul.u32 384, %s2015_s9  ;;  %p441_p10 = scmp.eq.s32.totalorder %s1874_s15, 0 }
  0x5c   : > { %p388_p11 = scmp.lt.s32.totalorder %s387_s12, 5  ;;  %s1658_s17 = smul.u32 48, %s2015_s9 }
  0x5d   : > { %s2018_s11 = scalar_lea.vmem [#allocation3], %s1659_s10  ;;  %s1609_s26 = sshll.u32 %s2015_s9, 4 }
  0x5e   : > { %v2021_v56 = vld [vmem:[%s2018_s11 + $0x168] sm:$0xff]  ;;  %v2024_v57 = vld [vmem:[%s2018_s11 + $0x170] sm:$0xff]  ;;  %v2032_v59 = vld [vmem:[%s2018_s11 + $0x158] sm:$0xff]  ;;  %s2344_s14 = scalar_select %p441_p10, 0, 7 }
  0x5f   : > { %v2027_v58 = vld [vmem:[%s2018_s11 + $0x150] sm:$0xff]  ;;  %454 = vmatpush.msra.mxu0 %v2021_v56  ;;  %474 = vmatpush.msra.mxu1 %v2024_v57  ;;  %v2035_v60 = vld [vmem:[%s2018_s11 + $0x138] sm:$0xff]  ;;  %v2038_v61 = vld [vmem:[%s2018_s11 + $0x140] sm:$0xff]  ;;  %s2889_s12 = smov (!%p388_p11, %s387_s12), 5  ;;  %s2351_s24 = scalar_lea.vmem [#allocation2], %s1658_s17 }
  0x60   : > { %574 = vmatpush.msra.mxu3 %v2021_v56  ;;  %v2044_v62 = vld [vmem:[%s2018_s11 + $0x120] sm:$0xff]  ;;  %v2047_v63 = vld [vmem:[%s2018_s11 + $0x128] sm:$0xff]  ;;  %v2056_v1 = vld [vmem:[%s2018_s11 + $0x110] sm:$0xff]  ;;  %s1648_s18 = smul.u32 6, %s2344_s14  ;;  %s390_s23 = scalar_lea.vmem %s2836_s2, %s2889_s12 }
  0x61   : > { %455 = vmatpush.msra.mxu0 %v2027_v58  ;;  %475 = vmatpush.msra.mxu1 %v2032_v59  ;;  %v2053_v0 = vld [vmem:[%s2018_s11 + $0x108] sm:$0xff]  ;;  %v2062_v2 = vld [vmem:[%s2018_s11 + $0xf0] sm:$0xff]  ;;  %v2065_v3 = vld [vmem:[%s2018_s11 + $0xf8] sm:$0xff]  ;;  %s1613_s27 = sshll.u32 %s2344_s14, 1  ;;  %s2365_s28 = scalar_lea.vmem [#allocation4], %s1609_s26 }
  0x62   : > { %575 = vmatpush.msra.mxu3 %v2027_v58  ;;  %v2068_v4 = vld [vmem:[%s2018_s11 + $0x178] sm:$0xff]  ;;  %v2074_v5 = vld [vmem:[%s2018_s11 + $0x160] sm:$0xff]  ;;  %v2087_v8 = vld [vmem:[%s2018_s11 + $0x148] sm:$0xff]  ;;  %s445_s25 = scalar_lea.vmem %s2351_s24, %s1648_s18 [#allocation2]  ;;  %s567_s29 = scalar_lea.vmem %s2365_s28, %s1613_s27 [#allocation4] }
  0x63   : > { %456 = vmatpush.msra.mxu0 %v2035_v60  ;;  %476 = vmatpush.msra.mxu1 %v2038_v61  ;;  %v2077_v6 = vld [vmem:[%s2018_s11 + $0xd8] sm:$0xff]  ;;  %v2080_v7 = vld [vmem:[%s2018_s11 + $0xe0] sm:$0xff]  ;;  %v2093_v10 = vld [vmem:[%s2018_s11 + $0xc8] sm:$0xff]  ;;  %s2424_s30 = scalar_select %p441_p10, 1, 6 }
  0x64   : > { %576 = vmatpush.msra.mxu3 %v2035_v60  ;;  %494 = vmatpush.msra.mxu2 %v2068_v4  ;;  %v2090_v9 = vld [vmem:[%s2018_s11 + $0xc0] sm:$0xff]  ;;  %v2100_v11 = vld [vmem:[%s2018_s11 + $0x130] sm:$0xff]  ;;  %v2103_v12 = vld [vmem:[%s2018_s11 + $0xa8] sm:$0xff]  ;;  %s2490_s8 = scalar_select %p441_p10, 2, 5 }
  0x65   : > { %457 = vmatpush.msra.mxu0 %v2044_v62  ;;  %477 = vmatpush.msra.mxu1 %v2047_v63  ;;  %v2106_v13 = vld [vmem:[%s2018_s11 + $0xb0] sm:$0xff]  ;;  %v2113_v14 = vld [vmem:[%s2018_s11 + $0x118] sm:$0xff]  ;;  %v2126_v17 = vld [vmem:[%s2018_s11 + $0x100] sm:$0xff]  ;;  %s1649_s4 = smul.u32 6, %s2424_s30  ;;  %s1617_s6 = sshll.u32 %s2424_s30, 1 }
  0x66   : > { %577 = vmatpush.msra.mxu3 %v2044_v62  ;;  %495 = vmatpush.msra.mxu2 %v2074_v5  ;;  %v2116_v15 = vld [vmem:[%s2018_s11 + $0x90] sm:$0xff]  ;;  %v2119_v16 = vld [vmem:[%s2018_s11 + $0x98] sm:$0xff]  ;;  %v2132_v19 = vld [vmem:[%s2018_s11 + $0x80] sm:$0xff]  ;;  %s687_s7 = scalar_lea.vmem %s2365_s28, %s1617_s6 [#allocation4]  ;;  %s1650_s9 = smul.u32 6, %s2490_s8 }
  0x67   : > { %458 = vmatpush.msra.mxu0 %v2053_v0  ;;  %478 = vmatpush.msra.mxu1 %v2056_v1  ;;  %v2129_v18 = vld [vmem:[%s2018_s11 + $0x78] sm:$0xff]  ;;  %v2139_v20 = vld [vmem:[%s2018_s11 + $0xe8] sm:$0xff]  ;;  %v2142_v21 = vld [vmem:[%s2018_s11 + $0x60] sm:$0xff]  ;;  %s572_s5 = scalar_lea.vmem %s2351_s24, %s1649_s4 [#allocation2]  ;;  %s1621_s12 = sshll.u32 %s2490_s8, 1 }
  0x68   : > { %578 = vmatpush.msra.mxu3 %v2053_v0  ;;  %496 = vmatpush.msra.mxu2 %v2087_v8  ;;  %v2145_v22 = vld [vmem:[%s2018_s11 + $0x68] sm:$0xff]  ;;  %v2152_v23 = vld [vmem:[%s2018_s11 + $0xd0] sm:$0xff]  ;;  %v2165_v26 = vld [vmem:[%s2018_s11 + $0xb8] sm:$0xff]  ;;  %s692_s10 = scalar_lea.vmem %s2351_s24, %s1650_s9 [#allocation2]  ;;  %s807_s14 = scalar_lea.vmem %s2365_s28, %s1621_s12 [#allocation4] }
  0x69   : > { %459 = vmatpush.msra.mxu0 %v2062_v2  ;;  %479 = vmatpush.msra.mxu1 %v2065_v3  ;;  %v2155_v24 = vld [vmem:[%s2018_s11 + $0x48] sm:$0xff]  ;;  %v2158_v25 = vld [vmem:[%s2018_s11 + $0x50] sm:$0xff]  ;;  %v2171_v28 = vld [vmem:[%s2018_s11 + $0x38] sm:$0xff]  ;;  %s2619_s17 = scalar_select %p441_p10, 3, 4 }
  0x6a   : > { %579 = vmatpush.msra.mxu3 %v2062_v2  ;;  %497 = vmatpush.msra.mxu2 %v2100_v11  ;;  %v2168_v27 = vld [vmem:[%s2018_s11 + $0x30] sm:$0xff]  ;;  %2858 = vst [vmem:[#allocation5_spill] sm:$0xff] %v2171_v28  ;;  %v2178_v29 = vld [vmem:[%s2018_s11 + $0xa0] sm:$0xff]  ;;  %v2181_v30 = vld [vmem:[%s2018_s11 + $0x18] sm:$0xff]  ;;  %s2764_s30 = scalar_select %p441_p10, 5, 2 }
  0x6b   : > { %460 = vmatpush.msra.mxu0 %v2077_v6  ;;  %480 = vmatpush.msra.mxu1 %v2080_v7  ;;  %2859 = vst [vmem:[#allocation6_spill] sm:$0xff] %v2181_v30  ;;  %v2184_v31 = vld [vmem:[%s2018_s11 + $0x20] sm:$0xff]  ;;  %v2191_v32 = vld [vmem:[%s2018_s11 + $0x88] sm:$0xff]  ;;  %v2205_v35 = vld [vmem:[%s2018_s11 + $0x70] sm:$0xff]  ;;  %s1651_s18 = smul.u32 6, %s2619_s17  ;;  %s1625_s22 = sshll.u32 %s2619_s17, 1 }
  0x6c   : > { %580 = vmatpush.msra.mxu3 %v2077_v6  ;;  %498 = vmatpush.msra.mxu2 %v2113_v14  ;;  %2860 = vst [vmem:[#allocation7_spill] sm:$0xff] %v2184_v31  ;;  %v2194_v33 = vld [vmem:[%s2018_s11] sm:$0xff]  ;;  %v2197_v34 = vld [vmem:[%s2018_s11 + $0x8] sm:$0xff]  ;;  %v2211_v37 = vld [vmem:[%s2018_s11 + $0x58] sm:$0xff]  ;;  %s1653_s4 = smul.u32 6, %s2764_s30  ;;  %s1633_s6 = sshll.u32 %s2764_s30, 1 }
  0x6d   : > { %461 = vmatpush.msra.mxu0 %v2090_v9  ;;  %481 = vmatpush.msra.mxu1 %v2093_v10  ;;  %2861 = vst [vmem:[#allocation8_spill] sm:$0xff] %v2194_v33  ;;  %v2216_v38 = vld [vmem:[%s2018_s11 + $0x40] sm:$0xff]  ;;  %v2223_v39 = vld [vmem:[%s2018_s11 + $0x28] sm:$0xff]  ;;  %v2230_v40 = vld [vmem:[%s2018_s11 + $0x10] sm:$0xff]  ;;  %s812_s20 = scalar_lea.vmem %s2351_s24, %s1651_s18 [#allocation2] }
  0x6e   : > { %581 = vmatpush.msra.mxu3 %v2090_v9  ;;  %499 = vmatpush.msra.mxu2 %v2126_v17  ;;  %2862 = vst [vmem:[#allocation9_spill] sm:$0xff] %v2197_v34  ;;  %v440_v41 = vld [vmem:[%s390_s23] sm:$0x7]  ;;  %s927_s23 = scalar_lea.vmem %s2365_s28, %s1625_s22 [#allocation4] }
  0x6f   : > { %462 = vmatpush.msra.mxu0 %v2103_v12  ;;  %482 = vmatpush.msra.mxu1 %v2106_v13  ;;  %2863 = vst [vmem:[#allocation10_spill] sm:$0xff] %v2223_v39  ;;  %v446_v42 = vld [vmem:[%s445_s25] sm:$0x3f]  ;;  %v2354_v43 = vperm.slane %v440_v41, 0  ;;  %v2356_v44 = vperm.slane %v440_v41, 1 }
  0x70   : > { %582 = vmatpush.msra.mxu3 %v2103_v12  ;;  %500 = vmatpush.msra.mxu2 %v2139_v20  ;;  %2864 = vst [vmem:[#allocation11_spill] sm:$0xff] %v2230_v40  ;;  %v535_v45 = vrot.slane %v446_v42, 2  ;;  %s2730_s25 = scalar_select %p441_p10, 4, 3 }
  0x71   : > { %463 = vmatpush.msra.mxu0 %v2116_v15  ;;  %483 = vmatpush.msra.mxu1 %v2119_v16  ;;  %2865 = vst [vmem:[#allocation12_spill] sm:$0xff] %v2354_v43  ;;  %s2782_s8 = scalar_select %p441_p10, 6, 1 }
  0x72   : > { %583 = vmatpush.msra.mxu3 %v2116_v15  ;;  %501 = vmatpush.msra.mxu2 %v2152_v23  ;;  %2866 = vst [vmem:[#allocation13_spill] sm:$0xff] %v2356_v44  ;;  %s1652_s26 = smul.u32 6, %s2730_s25 }
  0x73   : > { %464 = vmatpush.msra.mxu0 %v2129_v18  ;;  %484 = vmatpush.msra.mxu1 %v2132_v19  ;;  %s1654_s9 = smul.u32 6, %s2782_s8  ;;  %s1637_s12 = sshll.u32 %s2782_s8, 1 }
  0x74   : > { %584 = vmatpush.msra.mxu3 %v2129_v18  ;;  %502 = vmatpush.msra.mxu2 %v2165_v26  ;;  %s932_s27 = scalar_lea.vmem %s2351_s24, %s1652_s26 [#allocation2] }
  0x75   : > { %465 = vmatpush.msra.mxu0 %v2142_v21  ;;  %485 = vmatpush.msra.mxu1 %v2145_v22  ;;  %s2800_s17 = scalar_select %p441_p10, 7, 0 }
  0x76   : > { %585 = vmatpush.msra.mxu3 %v2142_v21  ;;  %503 = vmatpush.msra.mxu2 %v2178_v29 }
  0x77   : > { %466 = vmatpush.msra.mxu0 %v2155_v24  ;;  %486 = vmatpush.msra.mxu1 %v2158_v25  ;;  %s1655_s18 = smul.u32 6, %s2800_s17 }
  0x78   : > { %586 = vmatpush.msra.mxu3 %v2155_v24  ;;  %504 = vmatpush.msra.mxu2 %v2191_v32 }
  0x79   : > { %467 = vmatpush.msra.mxu0 %v2168_v27  ;;  %487 = vmatpush.msra.mxu1 %v2171_v28 }
  0x7a   : > { %587 = vmatpush.msra.mxu3 %v2168_v27  ;;  %505 = vmatpush.msra.mxu2 %v2205_v35 }
  0x7b   : > { %468 = vmatpush.msra.mxu0 %v2181_v30  ;;  %488 = vmatpush.msra.mxu1 %v2184_v31 }
  0x7c   : > { %588 = vmatpush.msra.mxu3 %v2181_v30  ;;  %506 = vmatpush.msra.mxu2 %v2211_v37 }
  0x7d   : > { %469 = vmatpush.msra.mxu0 %v2194_v33  ;;  %489 = vmatpush.msra.mxu1 %v2197_v34 }
  0x7e   : > { %470 = vmatmul.f32.vlgmr.msra.gmra.mxu0 %v1837_v36  ;;  %490 = vmatmul.f32.vlgmr.msra.gmra.mxu1 %v1837_v36 }
  0x7f   : > { %594 = vmatpush.msrb.mxu0 %v2024_v57  ;;  %614 = vmatpush.msrb.mxu1 %v2068_v4 }
  0x80   : > { %589 = vmatpush.msra.mxu3 %v2194_v33  ;;  %507 = vmatpush.msra.mxu2 %v2216_v38 }
  0x81   : > { %595 = vmatpush.msrb.mxu0 %v2032_v59  ;;  %615 = vmatpush.msrb.mxu1 %v2074_v5 }
  0x82   : > { %714 = vmatpush.msrb.mxu3 %v2024_v57  ;;  %508 = vmatpush.msra.mxu2 %v2223_v39 }
  0x83   : > { %596 = vmatpush.msrb.mxu0 %v2038_v61  ;;  %616 = vmatpush.msrb.mxu1 %v2087_v8 }
  0x84   : > { %715 = vmatpush.msrb.mxu3 %v2032_v59  ;;  %509 = vmatpush.msra.mxu2 %v2230_v40 }
  0x85   : > { %597 = vmatpush.msrb.mxu0 %v2047_v63  ;;  %617 = vmatpush.msrb.mxu1 %v2100_v11 }
  0x86   : > { %716 = vmatpush.msrb.mxu3 %v2038_v61  ;;  %510 = vmatmul.f32.vlgmr.msra.gmra.mxu2 %v1837_v36 }
  0x87   : > { %598 = vmatpush.msrb.mxu0 %v2056_v1  ;;  %618 = vmatpush.msrb.mxu1 %v2113_v14 }
  0x88   : > { %694 = vmatpush.msrb.mxu2 %v2021_v56  ;;  %717 = vmatpush.msrb.mxu3 %v2047_v63 }
  0x89   : > { %599 = vmatpush.msrb.mxu0 %v2065_v3  ;;  %619 = vmatpush.msrb.mxu1 %v2126_v17 }
  0x8a   : > { %695 = vmatpush.msrb.mxu2 %v2027_v58  ;;  %718 = vmatpush.msrb.mxu3 %v2056_v1 }
  0x8b   : > { %600 = vmatpush.msrb.mxu0 %v2080_v7  ;;  %620 = vmatpush.msrb.mxu1 %v2139_v20 }
  0x8c   : > { %696 = vmatpush.msrb.mxu2 %v2035_v60  ;;  %719 = vmatpush.msrb.mxu3 %v2065_v3 }
  0x8d   : > { %601 = vmatpush.msrb.mxu0 %v2093_v10  ;;  %621 = vmatpush.msrb.mxu1 %v2152_v23 }
  0x8e   : > { %697 = vmatpush.msrb.mxu2 %v2044_v62  ;;  %720 = vmatpush.msrb.mxu3 %v2080_v7 }
  0x8f   : > { %602 = vmatpush.msrb.mxu0 %v2106_v13  ;;  %622 = vmatpush.msrb.mxu1 %v2165_v26 }
  0x90   : > { %698 = vmatpush.msrb.mxu2 %v2053_v0  ;;  %721 = vmatpush.msrb.mxu3 %v2093_v10 }
  0x91   : > { %603 = vmatpush.msrb.mxu0 %v2119_v16  ;;  %623 = vmatpush.msrb.mxu1 %v2178_v29 }
  0x92   : > { %699 = vmatpush.msrb.mxu2 %v2062_v2  ;;  %722 = vmatpush.msrb.mxu3 %v2106_v13 }
  0x93   : > { %604 = vmatpush.msrb.mxu0 %v2132_v19  ;;  %624 = vmatpush.msrb.mxu1 %v2191_v32 }
  0x94   : > { %700 = vmatpush.msrb.mxu2 %v2077_v6  ;;  %723 = vmatpush.msrb.mxu3 %v2119_v16 }
  0x95   : > { %605 = vmatpush.msrb.mxu0 %v2145_v22  ;;  %625 = vmatpush.msrb.mxu1 %v2205_v35 }
  0x96   : > { %701 = vmatpush.msrb.mxu2 %v2090_v9  ;;  %724 = vmatpush.msrb.mxu3 %v2132_v19 }
  0x97   : > { %606 = vmatpush.msrb.mxu0 %v2158_v25  ;;  %626 = vmatpush.msrb.mxu1 %v2211_v37 }
  0x98   : > { %702 = vmatpush.msrb.mxu2 %v2103_v12  ;;  %725 = vmatpush.msrb.mxu3 %v2145_v22 }
  0x99   : > { %607 = vmatpush.msrb.mxu0 %v2171_v28  ;;  %627 = vmatpush.msrb.mxu1 %v2216_v38 }
  0x9a   : > { %703 = vmatpush.msrb.mxu2 %v2116_v15  ;;  %726 = vmatpush.msrb.mxu3 %v2158_v25 }
  0x9b   : > { %608 = vmatpush.msrb.mxu0 %v2184_v31  ;;  %628 = vmatpush.msrb.mxu1 %v2223_v39 }
  0x9c   : > { %704 = vmatpush.msrb.mxu2 %v2129_v18  ;;  %727 = vmatpush.msrb.mxu3 %v2171_v28 }
  0x9d   : > { %609 = vmatpush.msrb.mxu0 %v2197_v34  ;;  %629 = vmatpush.msrb.mxu1 %v2230_v40 }
  0x9e   : > { %705 = vmatpush.msrb.mxu2 %v2142_v21  ;;  %728 = vmatpush.msrb.mxu3 %v2184_v31 }
  0x9f   : > { %734 = vmatpush.msra.mxu0 %v2068_v4  ;;  %814 = vmatpush.msra.mxu1 %v2021_v56 }
  0xa0   : > { %706 = vmatpush.msrb.mxu2 %v2155_v24  ;;  %729 = vmatpush.msrb.mxu3 %v2197_v34 }
  0xa1   : > { %735 = vmatpush.msra.mxu0 %v2074_v5  ;;  %815 = vmatpush.msra.mxu1 %v2027_v58 }
  0xa2   : > { %707 = vmatpush.msrb.mxu2 %v2168_v27 }
  0xa3   : > { %736 = vmatpush.msra.mxu0 %v2087_v8  ;;  %816 = vmatpush.msra.mxu1 %v2035_v60 }
  0xa4   : > { %708 = vmatpush.msrb.mxu2 %v2181_v30 }
  0xa5   : > { %737 = vmatpush.msra.mxu0 %v2100_v11  ;;  %817 = vmatpush.msra.mxu1 %v2044_v62 }
  0xa6   : > { %709 = vmatpush.msrb.mxu2 %v2194_v33 }
  0xa7   : > { %738 = vmatpush.msra.mxu0 %v2113_v14  ;;  %818 = vmatpush.msra.mxu1 %v2053_v0 }
  0xa8   : > { %834 = vmatpush.msra.mxu2 %v2024_v57 }
  0xa9   : > { %739 = vmatpush.msra.mxu0 %v2126_v17  ;;  %819 = vmatpush.msra.mxu1 %v2062_v2 }
  0xaa   : > { %835 = vmatpush.msra.mxu2 %v2032_v59 }
  0xab   : > { %740 = vmatpush.msra.mxu0 %v2139_v20  ;;  %820 = vmatpush.msra.mxu1 %v2077_v6 }
  0xac   : > { %836 = vmatpush.msra.mxu2 %v2038_v61 }
  0xad   : > { %741 = vmatpush.msra.mxu0 %v2152_v23  ;;  %821 = vmatpush.msra.mxu1 %v2090_v9 }
  0xae   : > { %837 = vmatpush.msra.mxu2 %v2047_v63 }
  0xaf   : > { %742 = vmatpush.msra.mxu0 %v2165_v26  ;;  %822 = vmatpush.msra.mxu1 %v2103_v12 }
  0xb0   : > { %838 = vmatpush.msra.mxu2 %v2056_v1 }
  0xb1   : > { %743 = vmatpush.msra.mxu0 %v2178_v29  ;;  %823 = vmatpush.msra.mxu1 %v2116_v15 }
  0xb2   : > { %839 = vmatpush.msra.mxu2 %v2065_v3 }
  0xb3   : > { %744 = vmatpush.msra.mxu0 %v2191_v32  ;;  %824 = vmatpush.msra.mxu1 %v2129_v18 }
  0xb4   : > { %840 = vmatpush.msra.mxu2 %v2080_v7 }
  0xb5   : > { %745 = vmatpush.msra.mxu0 %v2205_v35  ;;  %825 = vmatpush.msra.mxu1 %v2142_v21 }
  0xb6   : > { %841 = vmatpush.msra.mxu2 %v2093_v10 }
  0xb7   : > { %746 = vmatpush.msra.mxu0 %v2211_v37  ;;  %826 = vmatpush.msra.mxu1 %v2155_v24 }
  0xb8   : > { %842 = vmatpush.msra.mxu2 %v2106_v13 }
  0xb9   : > { %747 = vmatpush.msra.mxu0 %v2216_v38  ;;  %827 = vmatpush.msra.mxu1 %v2168_v27 }
  0xba   : > { %843 = vmatpush.msra.mxu2 %v2119_v16 }
  0xbb   : > { %748 = vmatpush.msra.mxu0 %v2223_v39  ;;  %828 = vmatpush.msra.mxu1 %v2181_v30  ;;  %v2360_v39 = vperm.slane %v440_v41, 2 }
  0xbc   : > { %844 = vmatpush.msra.mxu2 %v2132_v19 }
  0xbd   : > { %749 = vmatpush.msra.mxu0 %v2230_v40  ;;  %829 = vmatpush.msra.mxu1 %v2194_v33 }
  0xbe   : > { %845 = vmatpush.msra.mxu2 %v2145_v22 }
  0xc0   : > { %846 = vmatpush.msra.mxu2 %v2158_v25 }
  0xc2   : > { %847 = vmatpush.msra.mxu2 %v2171_v28 }
  0xc4   : > { %848 = vmatpush.msra.mxu2 %v2184_v31 }
  0xc6   : > { %849 = vmatpush.msra.mxu2 %v2197_v34 }
  0xfb   : > { %v471_v46 = vpop.f32.mrf.mxu0  ;;  %v491_v47 = vpop.f32.mrf.mxu1 }
  0xfc   : > { %v472_v48 = vadd.f32 %v471_v46, %v2354_v43  ;;  %v492_v49 = vadd.f32 %v491_v47, %v2356_v44  ;;  %v558_v43 = vrot.slane %v446_v42, 4 }
  0xfe   : > { %v514_v50 = vadd.f32 %v472_v48, %v446_v42  ;;  %v537_v51 = vadd.f32 %v535_v45, %v492_v49 }
 0x100   : > { %v1611_v52 = vmul.f32 -1.442695, %v514_v50  ;;  %v1612_v53 = vmul.f32 -1.442695, %v537_v51 }
 0x102   : > { %1685 = vpow2.f32 %v1611_v52 }
 0x103   : > { %1687 = vpow2.f32 %v1612_v53 }
 0x108   : > { %v1686_v54 = vpop.eup %1685 }
 0x109   : > { %v1688_v55 = vpop.eup %1687  ;;  %v518_v36 = vadd.f32 1.0, %v1686_v54  ;;  %v511_v48 = vpop.f32.mrf.mxu2 }
 0x10a   : > { %v541_v34 = vadd.f32 1.0, %v1688_v55  ;;  %v512_v52 = vadd.f32 %v511_v48, %v2360_v39 }
 0x10b   : > { %1689 = vrcp.f32 %v518_v36  ;;  %v530_v45 = vand.u32 2147483648, %v518_v36  ;;  %v528_v50 = vand.u32 2147483647, %v518_v36  ;;  %vm524_vm1 = vweird.f32 %v518_v36 }
 0x10c   : > { %1691 = vrcp.f32 %v541_v34  ;;  %vm547_vm4 = vweird.f32 %v541_v34  ;;  %v553_v41 = vand.u32 2147483648, %v541_v34  ;;  %v551_v44 = vand.u32 2147483647, %v541_v34 }
 0x10d   : > { %v531_v54 = vor.u32 1.1754944e-38, %v530_v45  ;;  %vm529_vm3 = vcmp.eq.f32.partialorder %v528_v50, 8.507059e+37 }
 0x10e   : > { %v554_v48 = vor.u32 1.1754944e-38, %v553_v41  ;;  %vm552_vm7 = vcmp.eq.f32.partialorder %v551_v44, 8.507059e+37  ;;  %v2871_v44 = vld [vmem:[#allocation11_spill] sm:$0xff] }
 0x111   : > { %v1690_v33 = vpop.eup %1689 }
 0x112   : > { %v1692_v40 = vpop.eup %1691  ;;  %v520_v31 = vmul.f32 %v1690_v33, %v518_v36  ;;  %vm525_vm0 = vweird.f32 %v1690_v33 }
 0x113   : > { %v543_v30 = vmul.f32 %v1692_v40, %v541_v34  ;;  %vm526_vm2 = vmor %vm524_vm1, %vm525_vm0  ;;  %vm548_vm5 = vweird.f32 %v1692_v40  ;;  %v2868_v34 = vld [vmem:[#allocation10_spill] sm:$0xff] }
 0x114   : > { %v521_v46 = vsub.f32 1.0, %v520_v31  ;;  %vm549_vm6 = vmor %vm547_vm4, %vm548_vm5 }
 0x115   : > { %v544_v47 = vsub.f32 1.0, %v543_v30 }
 0x116   : > { %v522_v49 = vmul.f32 %v1690_v33, %v521_v46 }
 0x117   : > { %v545_v51 = vmul.f32 %v1692_v40, %v544_v47 }
 0x118   : > { %v523_v53 = vadd.f32 %v1690_v33, %v522_v49 }
 0x119   : > { %v546_v31 = vadd.f32 %v1692_v40, %v545_v51  ;;  %v2872_v51 = vld [vmem:[#allocation8_spill] sm:$0xff] }
 0x11a   : > { %v527_v55 = vsel %vm526_vm2, %v1690_v33, %v523_v53  ;;  %v573_v53 = vld [vmem:[%s572_s5] sm:$0x3f]  ;;  %s1052_s5 = scalar_lea.vmem %s2351_s24, %s1653_s4 [#allocation2] }
 0x11b   : > { %v532_v30 = vsel %vm529_vm3, %v531_v54, %v527_v55  ;;  %v550_v28 = vsel %vm549_vm6, %v1692_v40, %v546_v31  ;;  %v2869_v40 = vld [vmem:[#allocation6_spill] sm:$0xff]  ;;  %v655_v54 = vrot.slane %v573_v53, 2 }
 0x11c   : > { %v557_v46 = vmul.f32 %v532_v30, %v512_v52  ;;  %v555_v36 = vsel %vm552_vm7, %v554_v48, %v550_v28  ;;  %v2867_v28 = vld [vmem:[#allocation5_spill] sm:$0xff]  ;;  %v2875_v48 = vld [vmem:[#allocation12_spill] sm:$0xff] }
 0x11d   : > { %v562_v33 = vsub.f32 1.0, %v555_v36  ;;  %v564_v49 = vmul.f32 0.0, %v555_v36  ;;  %v2873_v52 = vld [vmem:[#allocation9_spill] sm:$0xff] }
 0x11e   : > { %v560_v47 = vadd.f32 %v558_v43, %v557_v46  ;;  %v2870_v43 = vld [vmem:[#allocation7_spill] sm:$0xff]  ;;  %v2874_v30 = vld [vmem:[#allocation13_spill] sm:$0xff] }
 0x120   : > { %1693 = vtanh.f32 %v560_v47 }
 0x126   : > { %v1694_v45 = vpop.eup %1693 }
 0x127   : > { %v563_v42 = vmul.f32 %v1694_v45, %v562_v33 }
 0x129   : > { %v2368_v50 = vadd.f32 %v564_v49, %v563_v42 }
 0x12b   : > { %590 = vmatmul.f32.vlgmr.msra.gmra.mxu3 %v2368_v50  ;;  %568 = vst [vmem:[%s567_s29] sm:$0x3] %v2368_v50  ;;  %610 = vmatmul.f32.vlgmr.msrb.gmra.mxu0 %v2368_v50 }
 0x12c   : > { %630 = vmatmul.f32.vlgmr.msrb.gmra.mxu1 %v2368_v50  ;;  %854 = vmatpush.msra.mxu3 %v2068_v4 }
 0x12d   : > { %934 = vmatpush.msrb.mxu0 %v2021_v56  ;;  %954 = vmatpush.msrb.mxu1 %v2024_v57 }
 0x12e   : > { %855 = vmatpush.msra.mxu3 %v2074_v5 }
 0x12f   : > { %935 = vmatpush.msrb.mxu0 %v2027_v58  ;;  %955 = vmatpush.msrb.mxu1 %v2032_v59 }
 0x130   : > { %856 = vmatpush.msra.mxu3 %v2087_v8 }
 0x131   : > { %936 = vmatpush.msrb.mxu0 %v2035_v60  ;;  %956 = vmatpush.msrb.mxu1 %v2038_v61 }
 0x132   : > { %857 = vmatpush.msra.mxu3 %v2100_v11 }
 0x133   : > { %937 = vmatpush.msrb.mxu0 %v2044_v62  ;;  %957 = vmatpush.msrb.mxu1 %v2047_v63 }
 0x134   : > { %858 = vmatpush.msra.mxu3 %v2113_v14 }
 0x135   : > { %938 = vmatpush.msrb.mxu0 %v2053_v0  ;;  %958 = vmatpush.msrb.mxu1 %v2056_v1 }
 0x136   : > { %859 = vmatpush.msra.mxu3 %v2126_v17 }
 0x137   : > { %939 = vmatpush.msrb.mxu0 %v2062_v2  ;;  %959 = vmatpush.msrb.mxu1 %v2065_v3 }
 0x138   : > { %860 = vmatpush.msra.mxu3 %v2139_v20 }
 0x139   : > { %940 = vmatpush.msrb.mxu0 %v2077_v6  ;;  %960 = vmatpush.msrb.mxu1 %v2080_v7 }
 0x13a   : > { %861 = vmatpush.msra.mxu3 %v2152_v23 }
 0x13b   : > { %941 = vmatpush.msrb.mxu0 %v2090_v9  ;;  %961 = vmatpush.msrb.mxu1 %v2093_v10 }
 0x13c   : > { %862 = vmatpush.msra.mxu3 %v2165_v26 }
 0x13d   : > { %942 = vmatpush.msrb.mxu0 %v2103_v12  ;;  %962 = vmatpush.msrb.mxu1 %v2106_v13 }
 0x13e   : > { %863 = vmatpush.msra.mxu3 %v2178_v29 }
 0x13f   : > { %943 = vmatpush.msrb.mxu0 %v2116_v15  ;;  %963 = vmatpush.msrb.mxu1 %v2119_v16 }
 0x140   : > { %864 = vmatpush.msra.mxu3 %v2191_v32 }
 0x141   : > { %944 = vmatpush.msrb.mxu0 %v2129_v18  ;;  %964 = vmatpush.msrb.mxu1 %v2132_v19 }
 0x142   : > { %865 = vmatpush.msra.mxu3 %v2205_v35 }
 0x143   : > { %945 = vmatpush.msrb.mxu0 %v2142_v21  ;;  %965 = vmatpush.msrb.mxu1 %v2145_v22 }
 0x144   : > { %866 = vmatpush.msra.mxu3 %v2211_v37 }
 0x145   : > { %946 = vmatpush.msrb.mxu0 %v2155_v24  ;;  %966 = vmatpush.msrb.mxu1 %v2158_v25 }
 0x146   : > { %867 = vmatpush.msra.mxu3 %v2216_v38 }
 0x147   : > { %947 = vmatpush.msrb.mxu0 %v2168_v27  ;;  %967 = vmatpush.msrb.mxu1 %v2867_v28 }
 0x148   : > { %868 = vmatpush.msra.mxu3 %v2868_v34 }
 0x149   : > { %948 = vmatpush.msrb.mxu0 %v2869_v40  ;;  %968 = vmatpush.msrb.mxu1 %v2870_v43 }
 0x14a   : > { %869 = vmatpush.msra.mxu3 %v2871_v44 }
 0x14b   : > { %949 = vmatpush.msrb.mxu0 %v2872_v51  ;;  %969 = vmatpush.msrb.mxu1 %v2873_v52 }
 0x1a8   : > { %v611_v55 = vpop.f32.mrf.mxu0 }
 0x1a9   : > { %v612_v31 = vadd.f32 %v611_v55, %v2874_v30 }
 0x1ab   : > { %v657_v41 = vadd.f32 %v655_v54, %v612_v31 }
 0x1ad   : > { %v1616_v46 = vmul.f32 -1.442695, %v657_v41 }
 0x1ae   : > { %v591_v47 = vpop.f32.mrf.mxu3 }
 0x1af   : > { %1695 = vpow2.f32 %v1616_v46  ;;  %v592_v36 = vadd.f32 %v591_v47, %v2875_v48 }
 0x1b1   : > { %v634_v33 = vadd.f32 %v592_v36, %v573_v53  ;;  %v631_v36 = vpop.f32.mrf.mxu1 }
 0x1b3   : > { %v1615_v45 = vmul.f32 -1.442695, %v634_v33 }
 0x1b5   : > { %v1696_v42 = vpop.eup %1695  ;;  %1697 = vpow2.f32 %v1615_v45 }
 0x1b6   : > { %v661_v49 = vadd.f32 1.0, %v1696_v42  ;;  %v678_v42 = vrot.slane %v573_v53, 4 }
 0x1b8   : > { %1699 = vrcp.f32 %v661_v49  ;;  %vm667_vm13 = vweird.f32 %v661_v49  ;;  %v671_v28 = vand.u32 2147483647, %v661_v49 }
 0x1ba   : > { %vm672_vm15 = vcmp.eq.f32.partialorder %v671_v28, 8.507059e+37 }
 0x1bb   : > { %v1698_v52 = vpop.eup %1697 }
 0x1bc   : > { %v638_v51 = vadd.f32 1.0, %v1698_v52  ;;  %v632_v52 = vadd.f32 %v631_v36, %v2360_v39 }
 0x1be   : > { %1701 = vrcp.f32 %v638_v51  ;;  %v1700_v44 = vpop.eup %1699  ;;  %v650_v31 = vand.u32 2147483648, %v638_v51  ;;  %v648_v46 = vand.u32 2147483647, %v638_v51  ;;  %vm644_vm9 = vweird.f32 %v638_v51 }
 0x1bf   : > { %v663_v43 = vmul.f32 %v1700_v44, %v661_v49  ;;  %vm668_vm12 = vweird.f32 %v1700_v44 }
 0x1c0   : > { %v651_v45 = vor.u32 1.1754944e-38, %v650_v31  ;;  %vm649_vm11 = vcmp.eq.f32.partialorder %v648_v46, 8.507059e+37  ;;  %vm669_vm14 = vmor %vm667_vm13, %vm668_vm12 }
 0x1c1   : > { %v664_v55 = vsub.f32 1.0, %v663_v43 }
 0x1c3   : > { %v665_v47 = vmul.f32 %v1700_v44, %v664_v55 }
 0x1c4   : > { %v1702_v40 = vpop.eup %1701 }
 0x1c5   : > { %v640_v34 = vmul.f32 %v1702_v40, %v638_v51  ;;  %vm645_vm8 = vweird.f32 %v1702_v40  ;;  %v666_v43 = vadd.f32 %v1700_v44, %v665_v47 }
 0x1c6   : > { %vm646_vm10 = vmor %vm644_vm9, %vm645_vm8 }
 0x1c7   : > { %v641_v54 = vsub.f32 1.0, %v640_v34  ;;  %v673_v34 = vand.u32 2147483648, %v661_v49 }
 0x1c9   : > { %v642_v41 = vmul.f32 %v1702_v40, %v641_v54  ;;  %v674_v51 = vor.u32 1.1754944e-38, %v673_v34 }
 0x1cb   : > { %v643_v33 = vadd.f32 %v1702_v40, %v642_v41  ;;  %v670_v41 = vsel %vm669_vm14, %v1700_v44, %v666_v43 }
 0x1cc   : > { %v675_v53 = vsel %vm672_vm15, %v674_v51, %v670_v41 }
 0x1cd   : > { %v647_v30 = vsel %vm646_vm10, %v1702_v40, %v643_v33  ;;  %v682_v31 = vsub.f32 1.0, %v675_v53  ;;  %v684_v46 = vmul.f32 %v675_v53, %v2368_v50 }
 0x1ce   : > { %v652_v48 = vsel %vm649_vm11, %v651_v45, %v647_v30 }
 0x1cf   : > { %v677_v54 = vmul.f32 %v652_v48, %v632_v52 }
 0x1d1   : > { %v680_v55 = vadd.f32 %v678_v42, %v677_v54 }
 0x1d3   : > { %1703 = vtanh.f32 %v680_v55 }
 0x1d9   : > { %v1704_v40 = vpop.eup %1703 }
 0x1da   : > { %v683_v36 = vmul.f32 %v1704_v40, %v682_v31 }
 0x1dc   : > { %v2434_v30 = vadd.f32 %v684_v46, %v683_v36 }
 0x1de   : > { %688 = vst [vmem:[%s687_s7] sm:$0x3] %v2434_v30  ;;  %710 = vmatmul.f32.vlgmr.msrb.gmra.mxu2 %v2434_v30  ;;  %730 = vmatmul.f32.vlgmr.msrb.gmra.mxu3 %v2434_v30  ;;  %s1167_s7 = scalar_lea.vmem %s2365_s28, %s1633_s6 [#allocation4] }
 0x1df   : > { %750 = vmatmul.f32.vlgmr.msra.gmra.mxu0 %v2434_v30  ;;  %974 = vmatpush.msrb.mxu2 %v2068_v4 }
 0x1e0   : > { %1054 = vmatpush.msrb.mxu3 %v2021_v56  ;;  %1074 = vmatpush.msra.mxu0 %v2024_v57  ;;  %v2876_v56 = vld [vmem:[#allocation5_spill] sm:$0xff]  ;;  %v2877_v57 = vld [vmem:[#allocation10_spill] sm:$0xff] }
 0x1e1   : > { %975 = vmatpush.msrb.mxu2 %v2074_v5 }
 0x1e2   : > { %1055 = vmatpush.msrb.mxu3 %v2027_v58  ;;  %1075 = vmatpush.msra.mxu0 %v2032_v59  ;;  %v2878_v58 = vld [vmem:[#allocation6_spill] sm:$0xff]  ;;  %v2879_v59 = vld [vmem:[#allocation7_spill] sm:$0xff] }
 0x1e3   : > { %976 = vmatpush.msrb.mxu2 %v2087_v8 }
 0x1e4   : > { %1056 = vmatpush.msrb.mxu3 %v2035_v60  ;;  %1076 = vmatpush.msra.mxu0 %v2038_v61  ;;  %v2880_v60 = vld [vmem:[#allocation11_spill] sm:$0xff]  ;;  %v2881_v61 = vld [vmem:[#allocation8_spill] sm:$0xff] }
 0x1e5   : > { %977 = vmatpush.msrb.mxu2 %v2100_v11 }
 0x1e6   : > { %1057 = vmatpush.msrb.mxu3 %v2044_v62  ;;  %1077 = vmatpush.msra.mxu0 %v2047_v63  ;;  %v2882_v62 = vld [vmem:[#allocation9_spill] sm:$0xff] }
 0x1e7   : > { %978 = vmatpush.msrb.mxu2 %v2113_v14  ;;  %v693_v63 = vld [vmem:[%s692_s10] sm:$0x3f]  ;;  %s1172_s10 = scalar_lea.vmem %s2351_s24, %s1654_s9 [#allocation2] }
 0x1e8   : > { %1058 = vmatpush.msrb.mxu3 %v2053_v0  ;;  %1078 = vmatpush.msra.mxu0 %v2056_v1  ;;  %v775_v0 = vrot.slane %v693_v63, 2  ;;  %v798_v31 = vrot.slane %v693_v63, 4 }
 0x1e9   : > { %979 = vmatpush.msrb.mxu2 %v2126_v17 }
 0x1ea   : > { %1059 = vmatpush.msrb.mxu3 %v2062_v2  ;;  %1079 = vmatpush.msra.mxu0 %v2065_v3  ;;  %v2883_v3 = vld [vmem:[#allocation12_spill] sm:$0xff] }
 0x1eb   : > { %980 = vmatpush.msrb.mxu2 %v2139_v20 }
 0x1ec   : > { %1060 = vmatpush.msrb.mxu3 %v2077_v6  ;;  %1080 = vmatpush.msra.mxu0 %v2080_v7  ;;  %v2884_v6 = vld [vmem:[#allocation13_spill] sm:$0xff] }
 0x1ed   : > { %981 = vmatpush.msrb.mxu2 %v2152_v23 }
 0x1ee   : > { %1061 = vmatpush.msrb.mxu3 %v2090_v9  ;;  %1081 = vmatpush.msra.mxu0 %v2093_v10 }
 0x1ef   : > { %982 = vmatpush.msrb.mxu2 %v2165_v26 }
 0x1f0   : > { %1062 = vmatpush.msrb.mxu3 %v2103_v12  ;;  %1082 = vmatpush.msra.mxu0 %v2106_v13 }
 0x1f1   : > { %983 = vmatpush.msrb.mxu2 %v2178_v29 }
 0x1f2   : > { %1063 = vmatpush.msrb.mxu3 %v2116_v15  ;;  %1083 = vmatpush.msra.mxu0 %v2119_v16 }
 0x1f3   : > { %984 = vmatpush.msrb.mxu2 %v2191_v32 }
 0x1f4   : > { %1064 = vmatpush.msrb.mxu3 %v2129_v18  ;;  %1084 = vmatpush.msra.mxu0 %v2132_v19 }
 0x1f5   : > { %985 = vmatpush.msrb.mxu2 %v2205_v35 }
 0x1f6   : > { %1065 = vmatpush.msrb.mxu3 %v2142_v21  ;;  %1085 = vmatpush.msra.mxu0 %v2145_v22 }
 0x1f7   : > { %986 = vmatpush.msrb.mxu2 %v2211_v37 }
 0x1f8   : > { %1066 = vmatpush.msrb.mxu3 %v2155_v24  ;;  %1086 = vmatpush.msra.mxu0 %v2158_v25 }
 0x1f9   : > { %987 = vmatpush.msrb.mxu2 %v2216_v38 }
 0x1fa   : > { %1067 = vmatpush.msrb.mxu3 %v2168_v27  ;;  %1087 = vmatpush.msra.mxu0 %v2876_v56 }
 0x1fb   : > { %988 = vmatpush.msrb.mxu2 %v2877_v57 }
 0x1fc   : > { %1068 = vmatpush.msrb.mxu3 %v2878_v58  ;;  %1088 = vmatpush.msra.mxu0 %v2879_v59 }
 0x1fd   : > { %989 = vmatpush.msrb.mxu2 %v2880_v60 }
 0x1fe   : > { %1069 = vmatpush.msrb.mxu3 %v2881_v61  ;;  %1089 = vmatpush.msra.mxu0 %v2882_v62 }
 0x25c   : > { %v751_v34 = vpop.f32.mrf.mxu0 }
 0x25d   : > { %v752_v51 = vadd.f32 %v751_v34, %v2360_v39  ;;  %v2596_v34 = vld [vmem:[%s2018_s11 + $0x98] sm:$0xff] }
 0x261   : > { %v711_v1 = vpop.f32.mrf.mxu2  ;;  %v731_v2 = vpop.f32.mrf.mxu3 }
 0x262   : > { %v712_v4 = vadd.f32 %v711_v1, %v2883_v3  ;;  %v732_v7 = vadd.f32 %v731_v2, %v2884_v6 }
 0x264   : > { %v754_v9 = vadd.f32 %v712_v4, %v693_v63  ;;  %v777_v10 = vadd.f32 %v775_v0, %v732_v7 }
 0x266   : > { %v1619_v12 = vmul.f32 -1.442695, %v754_v9  ;;  %v1620_v13 = vmul.f32 -1.442695, %v777_v10 }
 0x268   : > { %1705 = vpow2.f32 %v1619_v12 }
 0x269   : > { %1707 = vpow2.f32 %v1620_v13 }
 0x26e   : > { %v1706_v15 = vpop.eup %1705 }
 0x26f   : > { %v1708_v16 = vpop.eup %1707  ;;  %v758_v50 = vadd.f32 1.0, %v1706_v15 }
 0x270   : > { %v781_v28 = vadd.f32 1.0, %v1708_v16  ;;  %v2507_v16 = vld [vmem:[%s2018_s11 + $0x178] sm:$0xff] }
 0x271   : > { %1709 = vrcp.f32 %v758_v50  ;;  %v770_v45 = vand.u32 2147483648, %v758_v50  ;;  %v768_v43 = vand.u32 2147483647, %v758_v50  ;;  %vm764_vm1 = vweird.f32 %v758_v50 }
 0x272   : > { %1711 = vrcp.f32 %v781_v28  ;;  %v793_v0 = vand.u32 2147483648, %v781_v28  ;;  %vm787_vm5 = vweird.f32 %v781_v28  ;;  %v791_v1 = vand.u32 2147483647, %v781_v28 }
 0x273   : > { %v771_v41 = vor.u32 1.1754944e-38, %v770_v45  ;;  %vm769_vm3 = vcmp.eq.f32.partialorder %v768_v43, 8.507059e+37  ;;  %v2560_v45 = vld [vmem:[%s2018_s11 + $0xf8] sm:$0xff]  ;;  %v2587_v43 = vld [vmem:[%s2018_s11 + $0xb0] sm:$0xff] }
 0x274   : > { %v794_v7 = vor.u32 1.1754944e-38, %v793_v0  ;;  %vm792_vm7 = vcmp.eq.f32.partialorder %v791_v1, 8.507059e+37 }
 0x277   : > { %v1710_v44 = vpop.eup %1709 }
 0x278   : > { %v1712_v48 = vpop.eup %1711  ;;  %v760_v49 = vmul.f32 %v1710_v44, %v758_v50  ;;  %vm765_vm0 = vweird.f32 %v1710_v44  ;;  %v2515_v50 = vld [vmem:[%s2018_s11 + $0x170] sm:$0xff] }
 0x279   : > { %v783_v47 = vmul.f32 %v1712_v48, %v781_v28  ;;  %vm766_vm2 = vmor %vm764_vm1, %vm765_vm0  ;;  %vm788_vm4 = vweird.f32 %v1712_v48  ;;  %v2520_v28 = vld [vmem:[%s2018_s11 + $0x150] sm:$0xff] }
 0x27a   : > { %v761_v33 = vsub.f32 1.0, %v760_v49  ;;  %vm789_vm6 = vmor %vm787_vm5, %vm788_vm4  ;;  %v2533_v49 = vld [vmem:[%s2018_s11 + $0x140] sm:$0xff] }
 0x27b   : > { %v784_v42 = vsub.f32 1.0, %v783_v47  ;;  %v2542_v47 = vld [vmem:[%s2018_s11 + $0x128] sm:$0xff] }
 0x27c   : > { %v762_v52 = vmul.f32 %v1710_v44, %v761_v33  ;;  %v2551_v33 = vld [vmem:[%s2018_s11 + $0x110] sm:$0xff] }
 0x27d   : > { %v785_v54 = vmul.f32 %v1712_v48, %v784_v42  ;;  %v2569_v42 = vld [vmem:[%s2018_s11 + $0xe0] sm:$0xff] }
 0x27e   : > { %v763_v55 = vadd.f32 %v1710_v44, %v762_v52  ;;  %v2578_v52 = vld [vmem:[%s2018_s11 + $0xc8] sm:$0xff] }
 0x27f   : > { %v786_v36 = vadd.f32 %v1712_v48, %v785_v54 }
 0x280   : > { %v767_v53 = vsel %vm766_vm2, %v1710_v44, %v763_v55  ;;  %v2524_v44 = vld [vmem:[%s2018_s11 + $0x158] sm:$0xff] }
 0x281   : > { %v772_v40 = vsel %vm769_vm3, %v771_v41, %v767_v53  ;;  %v790_v4 = vsel %vm789_vm6, %v1712_v48, %v786_v36  ;;  %v2529_v48 = vld [vmem:[%s2018_s11 + $0x138] sm:$0xff] }
 0x282   : > { %v797_v46 = vmul.f32 %v772_v40, %v752_v51  ;;  %v795_v9 = vsel %vm792_vm7, %v794_v7, %v790_v4 }
 0x283   : > { %v802_v63 = vsub.f32 1.0, %v795_v9  ;;  %v804_v13 = vmul.f32 %v795_v9, %v2434_v30  ;;  %v2511_v30 = vld [vmem:[%s2018_s11 + $0x168] sm:$0xff] }
 0x284   : > { %v800_v2 = vadd.f32 %v798_v31, %v797_v46 }
 0x286   : > { %1713 = vtanh.f32 %v800_v2 }
 0x28c   : > { %v1714_v10 = vpop.eup %1713 }
 0x28d   : > { %v803_v12 = vmul.f32 %v1714_v10, %v802_v63 }
 0x28f   : > { %v2500_v15 = vadd.f32 %v804_v13, %v803_v12 }
 0x291   : > { %808 = vst [vmem:[%s807_s14] sm:$0x3] %v2500_v15  ;;  %830 = vmatmul.f32.vlgmr.msra.gmra.mxu1 %v2500_v15  ;;  %850 = vmatmul.f32.vlgmr.msra.gmra.mxu2 %v2500_v15  ;;  %s1287_s14 = scalar_lea.vmem %s2365_s28, %s1637_s12 [#allocation4] }
 0x292   : > { %870 = vmatmul.f32.vlgmr.msra.gmra.mxu3 %v2500_v15  ;;  %1094 = vmatpush.msra.mxu1 %v2507_v16 }
 0x293   : > { %1174 = vmatpush.msra.mxu2 %v2511_v30  ;;  %1194 = vmatpush.msra.mxu3 %v2515_v50 }
 0x294   : > { %1095 = vmatpush.msra.mxu1 %v2074_v5  ;;  %v2538_v5 = vld [vmem:[%s2018_s11 + $0x120] sm:$0xff] }
 0x295   : > { %1175 = vmatpush.msra.mxu2 %v2520_v28  ;;  %1195 = vmatpush.msra.mxu3 %v2524_v44 }
 0x296   : > { %1096 = vmatpush.msra.mxu1 %v2087_v8  ;;  %v2547_v8 = vld [vmem:[%s2018_s11 + $0x108] sm:$0xff] }
 0x297   : > { %1176 = vmatpush.msra.mxu2 %v2529_v48  ;;  %1196 = vmatpush.msra.mxu3 %v2533_v49 }
 0x298   : > { %1097 = vmatpush.msra.mxu1 %v2100_v11  ;;  %v2556_v11 = vld [vmem:[%s2018_s11 + $0xf0] sm:$0xff] }
 0x299   : > { %1177 = vmatpush.msra.mxu2 %v2538_v5  ;;  %1197 = vmatpush.msra.mxu3 %v2542_v47 }
 0x29a   : > { %1098 = vmatpush.msra.mxu1 %v2113_v14  ;;  %v2565_v14 = vld [vmem:[%s2018_s11 + $0xd8] sm:$0xff] }
 0x29b   : > { %1178 = vmatpush.msra.mxu2 %v2547_v8  ;;  %1198 = vmatpush.msra.mxu3 %v2551_v33 }
 0x29c   : > { %1099 = vmatpush.msra.mxu1 %v2126_v17  ;;  %v2574_v17 = vld [vmem:[%s2018_s11 + $0xc0] sm:$0xff] }
 0x29d   : > { %1179 = vmatpush.msra.mxu2 %v2556_v11  ;;  %1199 = vmatpush.msra.mxu3 %v2560_v45 }
 0x29e   : > { %1100 = vmatpush.msra.mxu1 %v2139_v20  ;;  %v2583_v20 = vld [vmem:[%s2018_s11 + $0xa8] sm:$0xff] }
 0x29f   : > { %1180 = vmatpush.msra.mxu2 %v2565_v14  ;;  %1200 = vmatpush.msra.mxu3 %v2569_v42 }
 0x2a0   : > { %1101 = vmatpush.msra.mxu1 %v2152_v23  ;;  %v2592_v23 = vld [vmem:[%s2018_s11 + $0x90] sm:$0xff] }
 0x2a1   : > { %1181 = vmatpush.msra.mxu2 %v2574_v17  ;;  %1201 = vmatpush.msra.mxu3 %v2578_v52 }
 0x2a2   : > { %1102 = vmatpush.msra.mxu1 %v2165_v26 }
 0x2a3   : > { %1182 = vmatpush.msra.mxu2 %v2583_v20  ;;  %1202 = vmatpush.msra.mxu3 %v2587_v43 }
 0x2a4   : > { %1103 = vmatpush.msra.mxu1 %v2178_v29 }
 0x2a5   : > { %1183 = vmatpush.msra.mxu2 %v2592_v23  ;;  %1203 = vmatpush.msra.mxu3 %v2596_v34 }
 0x2a6   : > { %1104 = vmatpush.msra.mxu1 %v2191_v32 }
 0x2a7   : > { %1184 = vmatpush.msra.mxu2 %v2129_v18  ;;  %1204 = vmatpush.msra.mxu3 %v2132_v19  ;;  %v813_v18 = vld [vmem:[%s812_s20] sm:$0x3f]  ;;  %s1292_s20 = scalar_lea.vmem %s2351_s24, %s1655_s18 [#allocation2]  ;;  %s1641_s24 = sshll.u32 %s2800_s17, 1 }
 0x2a8   : > { %1105 = vmatpush.msra.mxu1 %v2205_v35  ;;  %v918_v31 = vrot.slane %v813_v18, 4  ;;  %s1407_s22 = scalar_lea.vmem %s2365_s28, %s1641_s24 [#allocation4] }
 0x2a9   : > { %1185 = vmatpush.msra.mxu2 %v2142_v21  ;;  %1205 = vmatpush.msra.mxu3 %v2145_v22 }
 0x2aa   : > { %1106 = vmatpush.msra.mxu1 %v2211_v37 }
 0x2ab   : > { %1186 = vmatpush.msra.mxu2 %v2155_v24  ;;  %1206 = vmatpush.msra.mxu3 %v2158_v25  ;;  %v895_v25 = vrot.slane %v813_v18, 2 }
 0x2ac   : > { %1107 = vmatpush.msra.mxu1 %v2216_v38 }
 0x2ad   : > { %1187 = vmatpush.msra.mxu2 %v2168_v27  ;;  %1207 = vmatpush.msra.mxu3 %v2876_v56 }
 0x2ae   : > { %1108 = vmatpush.msra.mxu1 %v2877_v57 }
 0x2af   : > { %1188 = vmatpush.msra.mxu2 %v2878_v58  ;;  %1208 = vmatpush.msra.mxu3 %v2879_v59 }
 0x2b0   : > { %1109 = vmatpush.msra.mxu1 %v2880_v60 }
 0x2b1   : > { %1189 = vmatpush.msra.mxu2 %v2881_v61  ;;  %1209 = vmatpush.msra.mxu3 %v2882_v62 }
 0x30e   : > { %v831_v19 = vpop.f32.mrf.mxu1 }
 0x30f   : > { %v832_v21 = vadd.f32 %v831_v19, %v2883_v3 }
 0x311   : > { %v874_v22 = vadd.f32 %v832_v21, %v813_v18 }
 0x313   : > { %v1623_v24 = vmul.f32 -1.442695, %v874_v22 }
 0x314   : > { %v851_v26 = vpop.f32.mrf.mxu2 }
 0x315   : > { %1715 = vpow2.f32 %v1623_v24  ;;  %v852_v27 = vadd.f32 %v851_v26, %v2884_v6  ;;  %v871_v55 = vpop.f32.mrf.mxu3  ;;  %v1808_v26 = vld [vmem:[%s2018_s11 + $0x18] sm:$0xff] }
 0x316   : > { %v872_v36 = vadd.f32 %v871_v55, %v2360_v39 }
 0x317   : > { %v897_v29 = vadd.f32 %v895_v25, %v852_v27  ;;  %v2645_v25 = vld [vmem:[%s2018_s11 + $0x148] sm:$0xff]  ;;  %v1809_v27 = vld [vmem:[%s2018_s11 + $0x20] sm:$0xff] }
 0x319   : > { %v1624_v32 = vmul.f32 -1.442695, %v897_v29  ;;  %v2723_v29 = vld [vmem:[%s2018_s11 + $0x10] sm:$0xff] }
 0x31b   : > { %v1716_v35 = vpop.eup %1715  ;;  %1717 = vpow2.f32 %v1624_v32  ;;  %v1811_v32 = vld [vmem:[%s2018_s11] sm:$0xff] }
 0x31c   : > { %v878_v37 = vadd.f32 1.0, %v1716_v35  ;;  %v1812_v35 = vld [vmem:[%s2018_s11 + $0x8] sm:$0xff] }
 0x31e   : > { %1719 = vrcp.f32 %v878_v37  ;;  %v890_v60 = vand.u32 2147483648, %v878_v37  ;;  %v888_v62 = vand.u32 2147483647, %v878_v37  ;;  %vm884_vm9 = vweird.f32 %v878_v37 }
 0x320   : > { %v891_v53 = vor.u32 1.1754944e-38, %v890_v60  ;;  %vm889_vm11 = vcmp.eq.f32.partialorder %v888_v62, 8.507059e+37 }
 0x321   : > { %v1718_v38 = vpop.eup %1717 }
 0x322   : > { %v901_v56 = vadd.f32 1.0, %v1718_v38 }
 0x324   : > { %v1720_v57 = vpop.eup %1719  ;;  %1721 = vrcp.f32 %v901_v56  ;;  %v913_v2 = vand.u32 2147483648, %v901_v56  ;;  %v911_v7 = vand.u32 2147483647, %v901_v56  ;;  %vm907_vm13 = vweird.f32 %v901_v56 }
 0x325   : > { %v880_v58 = vmul.f32 %v1720_v57, %v878_v37  ;;  %vm885_vm8 = vweird.f32 %v1720_v57  ;;  %v933_v37 = vld [vmem:[%s932_s27] sm:$0x3f] }
 0x326   : > { %vm886_vm10 = vmor %vm884_vm9, %vm885_vm8  ;;  %v914_v10 = vor.u32 1.1754944e-38, %v913_v2  ;;  %vm912_vm15 = vcmp.eq.f32.partialorder %v911_v7, 8.507059e+37  ;;  %v1015_v38 = vrot.slane %v933_v37, 2 }
 0x327   : > { %v881_v59 = vsub.f32 1.0, %v880_v58 }
 0x329   : > { %v882_v61 = vmul.f32 %v1720_v57, %v881_v59 }
 0x32a   : > { %v1722_v54 = vpop.eup %1721 }
 0x32b   : > { %v903_v41 = vmul.f32 %v1722_v54, %v901_v56  ;;  %v883_v51 = vadd.f32 %v1720_v57, %v882_v61  ;;  %vm908_vm12 = vweird.f32 %v1722_v54 }
 0x32c   : > { %vm909_vm14 = vmor %vm907_vm13, %vm908_vm12 }
 0x32d   : > { %v904_v40 = vsub.f32 1.0, %v903_v41  ;;  %v887_v46 = vsel %vm886_vm10, %v1720_v57, %v883_v51 }
 0x32e   : > { %v892_v0 = vsel %vm889_vm11, %v891_v53, %v887_v46 }
 0x32f   : > { %v905_v1 = vmul.f32 %v1722_v54, %v904_v40  ;;  %v917_v4 = vmul.f32 %v892_v0, %v872_v36 }
 0x331   : > { %v906_v9 = vadd.f32 %v1722_v54, %v905_v1  ;;  %v920_v63 = vadd.f32 %v918_v31, %v917_v4 }
 0x333   : > { %v910_v12 = vsel %vm909_vm14, %v1722_v54, %v906_v9  ;;  %1723 = vtanh.f32 %v920_v63 }
 0x334   : > { %v915_v13 = vsel %vm912_vm15, %v914_v10, %v910_v12 }
 0x335   : > { %v922_v18 = vsub.f32 1.0, %v915_v13  ;;  %v924_v22 = vmul.f32 %v915_v13, %v2500_v15  ;;  %v2639_v15 = vld [vmem:[%s2018_s11 + $0x160] sm:$0xff] }
 0x339   : > { %v1724_v19 = vpop.eup %1723 }
 0x33a   : > { %v923_v21 = vmul.f32 %v1724_v19, %v922_v18  ;;  %v1038_v19 = vrot.slane %v933_v37, 4 }
 0x33c   : > { %v2629_v24 = vadd.f32 %v924_v22, %v923_v21 }
 0x33e   : > { %928 = vst [vmem:[%s927_s23] sm:$0x3] %v2629_v24  ;;  %950 = vmatmul.f32.vlgmr.msrb.gmra.mxu0 %v2629_v24  ;;  %970 = vmatmul.f32.vlgmr.msrb.gmra.mxu1 %v2629_v24  ;;  %s1643_s23 = sshll.u32 (%p1893_p5), %s1874_s15, 1 }
 0x33f   : > { %990 = vmatmul.f32.vlgmr.msrb.gmra.mxu2 %v2629_v24  ;;  %1214 = vmatpush.msrb.mxu0 %v2507_v16  ;;  %s1417_s27 = scalar_lea.vmem (%p1893_p5), %s2837_s3, %s1643_s23 }
 0x340   : > { %1294 = vmatpush.msrb.mxu1 %v2511_v30  ;;  %1314 = vmatpush.msrb.mxu2 %v2515_v50  ;;  %v2651_v30 = vld [vmem:[%s2018_s11 + $0x130] sm:$0xff]  ;;  %v2657_v50 = vld [vmem:[%s2018_s11 + $0x118] sm:$0xff] }
 0x341   : > { %1215 = vmatpush.msrb.mxu0 %v2639_v15 }
 0x342   : > { %1295 = vmatpush.msrb.mxu1 %v2520_v28  ;;  %1315 = vmatpush.msrb.mxu2 %v2524_v44  ;;  %v2663_v28 = vld [vmem:[%s2018_s11 + $0x100] sm:$0xff]  ;;  %v2669_v44 = vld [vmem:[%s2018_s11 + $0xe8] sm:$0xff] }
 0x343   : > { %1216 = vmatpush.msrb.mxu0 %v2645_v25 }
 0x344   : > { %1296 = vmatpush.msrb.mxu1 %v2529_v48  ;;  %1316 = vmatpush.msrb.mxu2 %v2533_v49  ;;  %v2675_v48 = vld [vmem:[%s2018_s11 + $0xd0] sm:$0xff]  ;;  %v2681_v49 = vld [vmem:[%s2018_s11 + $0xb8] sm:$0xff] }
 0x345   : > { %1217 = vmatpush.msrb.mxu0 %v2651_v30 }
 0x346   : > { %1297 = vmatpush.msrb.mxu1 %v2538_v5  ;;  %1317 = vmatpush.msrb.mxu2 %v2542_v47  ;;  %v2687_v5 = vld [vmem:[%s2018_s11 + $0xa0] sm:$0xff]  ;;  %v2693_v47 = vld [vmem:[%s2018_s11 + $0x88] sm:$0xff] }
 0x347   : > { %1218 = vmatpush.msrb.mxu0 %v2657_v50 }
 0x348   : > { %1298 = vmatpush.msrb.mxu1 %v2547_v8  ;;  %1318 = vmatpush.msrb.mxu2 %v2551_v33  ;;  %v1796_v8 = vld [vmem:[%s2018_s11 + $0x78] sm:$0xff]  ;;  %v1797_v33 = vld [vmem:[%s2018_s11 + $0x80] sm:$0xff] }
 0x349   : > { %1219 = vmatpush.msrb.mxu0 %v2663_v28 }
 0x34a   : > { %1299 = vmatpush.msrb.mxu1 %v2556_v11  ;;  %1319 = vmatpush.msrb.mxu2 %v2560_v45  ;;  %v2699_v11 = vld [vmem:[%s2018_s11 + $0x70] sm:$0xff]  ;;  %v1799_v45 = vld [vmem:[%s2018_s11 + $0x60] sm:$0xff] }
 0x34b   : > { %1220 = vmatpush.msrb.mxu0 %v2669_v44 }
 0x34c   : > { %1300 = vmatpush.msrb.mxu1 %v2565_v14  ;;  %1320 = vmatpush.msrb.mxu2 %v2569_v42  ;;  %v1800_v14 = vld [vmem:[%s2018_s11 + $0x68] sm:$0xff]  ;;  %v2705_v42 = vld [vmem:[%s2018_s11 + $0x58] sm:$0xff] }
 0x34d   : > { %1221 = vmatpush.msrb.mxu0 %v2675_v48 }
 0x34e   : > { %1301 = vmatpush.msrb.mxu1 %v2574_v17  ;;  %1321 = vmatpush.msrb.mxu2 %v2578_v52  ;;  %v1802_v17 = vld [vmem:[%s2018_s11 + $0x48] sm:$0xff]  ;;  %v1803_v52 = vld [vmem:[%s2018_s11 + $0x50] sm:$0xff] }
 0x34f   : > { %1222 = vmatpush.msrb.mxu0 %v2681_v49 }
 0x350   : > { %1302 = vmatpush.msrb.mxu1 %v2583_v20  ;;  %1322 = vmatpush.msrb.mxu2 %v2587_v43  ;;  %v2711_v20 = vld [vmem:[%s2018_s11 + $0x40] sm:$0xff]  ;;  %v1805_v43 = vld [vmem:[%s2018_s11 + $0x30] sm:$0xff] }
 0x351   : > { %1223 = vmatpush.msrb.mxu0 %v2687_v5 }
 0x352   : > { %1303 = vmatpush.msrb.mxu1 %v2592_v23  ;;  %1323 = vmatpush.msrb.mxu2 %v2596_v34  ;;  %v1806_v23 = vld [vmem:[%s2018_s11 + $0x38] sm:$0xff]  ;;  %v2717_v34 = vld [vmem:[%s2018_s11 + $0x28] sm:$0xff]  ;;  %s1629_s11 = sshll.u32 %s2730_s25, 1 }
 0x353   : > { %1224 = vmatpush.msrb.mxu0 %v2693_v47  ;;  %s1047_s29 = scalar_lea.vmem %s2365_s28, %s1629_s11 [#allocation4] }
 0x354   : > { %1304 = vmatpush.msrb.mxu1 %v1796_v8  ;;  %1324 = vmatpush.msrb.mxu2 %v1797_v33 }
 0x355   : > { %1225 = vmatpush.msrb.mxu0 %v2699_v11 }
 0x356   : > { %1305 = vmatpush.msrb.mxu1 %v1799_v45  ;;  %1325 = vmatpush.msrb.mxu2 %v1800_v14 }
 0x357   : > { %1226 = vmatpush.msrb.mxu0 %v2705_v42 }
 0x358   : > { %1306 = vmatpush.msrb.mxu1 %v1802_v17  ;;  %1326 = vmatpush.msrb.mxu2 %v1803_v52 }
 0x359   : > { %1227 = vmatpush.msrb.mxu0 %v2711_v20 }
 0x35a   : > { %1307 = vmatpush.msrb.mxu1 %v1805_v43  ;;  %1327 = vmatpush.msrb.mxu2 %v1806_v23 }
 0x35b   : > { %1228 = vmatpush.msrb.mxu0 %v2717_v34 }
 0x35c   : > { %1308 = vmatpush.msrb.mxu1 %v1808_v26  ;;  %1328 = vmatpush.msrb.mxu2 %v1809_v27 }
 0x35d   : > { %1229 = vmatpush.msrb.mxu0 %v2723_v29 }
 0x35e   : > { %1309 = vmatpush.msrb.mxu1 %v1811_v32  ;;  %1329 = vmatpush.msrb.mxu2 %v1812_v35 }
 0x3bb   : > { %v951_v56 = vpop.f32.mrf.mxu0  ;;  %v971_v57 = vpop.f32.mrf.mxu1 }
 0x3bc   : > { %v952_v58 = vadd.f32 %v951_v56, %v2883_v3  ;;  %v972_v59 = vadd.f32 %v971_v57, %v2884_v6 }
 0x3be   : > { %v994_v60 = vadd.f32 %v952_v58, %v933_v37  ;;  %v1017_v61 = vadd.f32 %v1015_v38, %v972_v59 }
 0x3c0   : > { %v1627_v62 = vmul.f32 -1.442695, %v994_v60  ;;  %v1628_v54 = vmul.f32 -1.442695, %v1017_v61 }
 0x3c2   : > { %1725 = vpow2.f32 %v1627_v62  ;;  %v991_v63 = vpop.f32.mrf.mxu2 }
 0x3c3   : > { %1727 = vpow2.f32 %v1628_v54  ;;  %v992_v13 = vadd.f32 %v991_v63, %v2360_v39 }
 0x3c8   : > { %v1726_v55 = vpop.eup %1725 }
 0x3c9   : > { %v1728_v41 = vpop.eup %1727  ;;  %v998_v51 = vadd.f32 1.0, %v1726_v55 }
 0x3ca   : > { %v1021_v53 = vadd.f32 1.0, %v1728_v41 }
 0x3cb   : > { %1729 = vrcp.f32 %v998_v51  ;;  %v1010_v2 = vand.u32 2147483648, %v998_v51  ;;  %v1008_v7 = vand.u32 2147483647, %v998_v51  ;;  %vm1004_vm1 = vweird.f32 %v998_v51 }
 0x3cc   : > { %1731 = vrcp.f32 %v1021_v53  ;;  %v1033_v8 = vand.u32 2147483648, %v1021_v53  ;;  %vm1027_vm5 = vweird.f32 %v1021_v53  ;;  %v1031_v45 = vand.u32 2147483647, %v1021_v53 }
 0x3cd   : > { %v1011_v12 = vor.u32 1.1754944e-38, %v1010_v2  ;;  %vm1009_vm3 = vcmp.eq.f32.partialorder %v1008_v7, 8.507059e+37 }
 0x3ce   : > { %v1034_v52 = vor.u32 1.1754944e-38, %v1033_v8  ;;  %vm1032_vm7 = vcmp.eq.f32.partialorder %v1031_v45, 8.507059e+37 }
 0x3d1   : > { %v1730_v31 = vpop.eup %1729 }
 0x3d2   : > { %v1732_v40 = vpop.eup %1731  ;;  %v1000_v36 = vmul.f32 %v1730_v31, %v998_v51  ;;  %vm1005_vm0 = vweird.f32 %v1730_v31 }
 0x3d3   : > { %v1023_v46 = vmul.f32 %v1732_v40, %v1021_v53  ;;  %vm1006_vm2 = vmor %vm1004_vm1, %vm1005_vm0  ;;  %vm1028_vm4 = vweird.f32 %v1732_v40 }
 0x3d4   : > { %v1001_v0 = vsub.f32 1.0, %v1000_v36  ;;  %vm1029_vm6 = vmor %vm1027_vm5, %vm1028_vm4 }
 0x3d5   : > { %v1024_v1 = vsub.f32 1.0, %v1023_v46 }
 0x3d6   : > { %v1002_v4 = vmul.f32 %v1730_v31, %v1001_v0 }
 0x3d7   : > { %v1025_v9 = vmul.f32 %v1732_v40, %v1024_v1 }
 0x3d8   : > { %v1003_v10 = vadd.f32 %v1730_v31, %v1002_v4 }
 0x3d9   : > { %v1026_v22 = vadd.f32 %v1732_v40, %v1025_v9 }
 0x3da   : > { %v1007_v18 = vsel %vm1006_vm2, %v1730_v31, %v1003_v10 }
 0x3db   : > { %v1012_v21 = vsel %vm1009_vm3, %v1011_v12, %v1007_v18  ;;  %v1030_v17 = vsel %vm1029_vm6, %v1732_v40, %v1026_v22 }
 0x3dc   : > { %v1037_v33 = vmul.f32 %v1012_v21, %v992_v13  ;;  %v1035_v43 = vsel %vm1032_vm7, %v1034_v52, %v1030_v17  ;;  %v1173_v13 = vld [vmem:[%s1172_s10] sm:$0x3f] }
 0x3dd   : > { %v1042_v23 = vsub.f32 1.0, %v1035_v43  ;;  %v1044_v32 = vmul.f32 %v1035_v43, %v2629_v24  ;;  %v1255_v18 = vrot.slane %v1173_v13, 2 }
 0x3de   : > { %v1040_v14 = vadd.f32 %v1038_v19, %v1037_v33 }
 0x3e0   : > { %1733 = vtanh.f32 %v1040_v14 }
 0x3e6   : > { %v1734_v26 = vpop.eup %1733 }
 0x3e7   : > { %v1043_v27 = vmul.f32 %v1734_v26, %v1042_v23 }
 0x3e9   : > { %v2740_v35 = vadd.f32 %v1044_v32, %v1043_v27 }
 0x3eb   : > { %1048 = vst [vmem:[%s1047_s29] sm:$0x3] %v2740_v35  ;;  %1070 = vmatmul.f32.vlgmr.msrb.gmra.mxu3 %v2740_v35  ;;  %1090 = vmatmul.f32.vlgmr.msra.gmra.mxu0 %v2740_v35 }
 0x3ec   : > { %1110 = vmatmul.f32.vlgmr.msra.gmra.mxu1 %v2740_v35  ;;  %1334 = vmatpush.msrb.mxu3 %v2507_v16  ;;  %v1053_v16 = vld [vmem:[%s1052_s5] sm:$0x3f] }
 0x3ed   : > { %v1135_v24 = vrot.slane %v1053_v16, 2  ;;  %v1158_v55 = vrot.slane %v1053_v16, 4 }
 0x3ee   : > { %1335 = vmatpush.msrb.mxu3 %v2639_v15 }
 0x3f0   : > { %1336 = vmatpush.msrb.mxu3 %v2645_v25 }
 0x3f2   : > { %1337 = vmatpush.msrb.mxu3 %v2651_v30 }
 0x3f4   : > { %1338 = vmatpush.msrb.mxu3 %v2657_v50 }
 0x3f6   : > { %1339 = vmatpush.msrb.mxu3 %v2663_v28 }
 0x3f8   : > { %1340 = vmatpush.msrb.mxu3 %v2669_v44 }
 0x3fa   : > { %1341 = vmatpush.msrb.mxu3 %v2675_v48 }
 0x3fc   : > { %1342 = vmatpush.msrb.mxu3 %v2681_v49 }
 0x3fe   : > { %1343 = vmatpush.msrb.mxu3 %v2687_v5 }
 0x400   : > { %1344 = vmatpush.msrb.mxu3 %v2693_v47 }
 0x402   : > { %1345 = vmatpush.msrb.mxu3 %v2699_v11 }
 0x404   : > { %1346 = vmatpush.msrb.mxu3 %v2705_v42 }
 0x406   : > { %1347 = vmatpush.msrb.mxu3 %v2711_v20 }
 0x408   : > { %1348 = vmatpush.msrb.mxu3 %v2717_v34 }
 0x40a   : > { %1349 = vmatpush.msrb.mxu3 %v2723_v29 }
 0x468   : > { %v1091_v15 = vpop.f32.mrf.mxu0 }
 0x469   : > { %v1092_v25 = vadd.f32 %v1091_v15, %v2884_v6  ;;  %v1111_v61 = vpop.f32.mrf.mxu1 }
 0x46a   : > { %v1112_v41 = vadd.f32 %v1111_v61, %v2360_v39 }
 0x46b   : > { %v1137_v30 = vadd.f32 %v1135_v24, %v1092_v25 }
 0x46d   : > { %v1632_v50 = vmul.f32 -1.442695, %v1137_v30 }
 0x46e   : > { %v1071_v28 = vpop.f32.mrf.mxu3 }
 0x46f   : > { %1735 = vpow2.f32 %v1632_v50  ;;  %v1072_v44 = vadd.f32 %v1071_v28, %v2883_v3 }
 0x471   : > { %v1114_v48 = vadd.f32 %v1072_v44, %v1053_v16 }
 0x473   : > { %v1631_v49 = vmul.f32 -1.442695, %v1114_v48 }
 0x475   : > { %v1736_v5 = vpop.eup %1735  ;;  %1737 = vpow2.f32 %v1631_v49 }
 0x476   : > { %v1141_v47 = vadd.f32 1.0, %v1736_v5 }
 0x478   : > { %1739 = vrcp.f32 %v1141_v47  ;;  %v1153_v40 = vand.u32 2147483648, %v1141_v47  ;;  %vm1147_vm13 = vweird.f32 %v1141_v47  ;;  %v1151_v46 = vand.u32 2147483647, %v1141_v47 }
 0x47a   : > { %v1154_v2 = vor.u32 1.1754944e-38, %v1153_v40  ;;  %vm1152_vm15 = vcmp.eq.f32.partialorder %v1151_v46, 8.507059e+37 }
 0x47b   : > { %v1738_v11 = vpop.eup %1737 }
 0x47c   : > { %v1118_v42 = vadd.f32 1.0, %v1738_v11  ;;  %v1278_v11 = vrot.slane %v1173_v13, 4 }
 0x47e   : > { %1741 = vrcp.f32 %v1118_v42  ;;  %v1740_v20 = vpop.eup %1739  ;;  %v1130_v57 = vand.u32 2147483648, %v1118_v42  ;;  %v1128_v59 = vand.u32 2147483647, %v1118_v42  ;;  %vm1124_vm9 = vweird.f32 %v1118_v42 }
 0x47f   : > { %v1143_v34 = vmul.f32 %v1740_v20, %v1141_v47  ;;  %vm1148_vm12 = vweird.f32 %v1740_v20 }
 0x480   : > { %v1131_v54 = vor.u32 1.1754944e-38, %v1130_v57  ;;  %vm1129_vm11 = vcmp.eq.f32.partialorder %v1128_v59, 8.507059e+37  ;;  %vm1149_vm14 = vmor %vm1147_vm13, %vm1148_vm12 }
 0x481   : > { %v1144_v38 = vsub.f32 1.0, %v1143_v34 }
 0x483   : > { %v1145_v60 = vmul.f32 %v1740_v20, %v1144_v38 }
 0x484   : > { %v1742_v29 = vpop.eup %1741 }
 0x485   : > { %v1120_v37 = vmul.f32 %v1742_v29, %v1118_v42  ;;  %vm1125_vm8 = vweird.f32 %v1742_v29  ;;  %v1146_v31 = vadd.f32 %v1740_v20, %v1145_v60 }
 0x486   : > { %vm1126_vm10 = vmor %vm1124_vm9, %vm1125_vm8 }
 0x487   : > { %v1121_v56 = vsub.f32 1.0, %v1120_v37  ;;  %v1150_v1 = vsel %vm1149_vm14, %v1740_v20, %v1146_v31 }
 0x488   : > { %v1155_v4 = vsel %vm1152_vm15, %v1154_v2, %v1150_v1 }
 0x489   : > { %v1122_v58 = vmul.f32 %v1742_v29, %v1121_v56  ;;  %v1162_v7 = vsub.f32 1.0, %v1155_v4  ;;  %v1164_v10 = vmul.f32 %v1155_v4, %v2740_v35 }
 0x48b   : > { %v1123_v62 = vadd.f32 %v1742_v29, %v1122_v58 }
 0x48d   : > { %v1127_v51 = vsel %vm1126_vm10, %v1742_v29, %v1123_v62 }
 0x48e   : > { %v1132_v53 = vsel %vm1129_vm11, %v1131_v54, %v1127_v51 }
 0x48f   : > { %v1157_v36 = vmul.f32 %v1132_v53, %v1112_v41 }
 0x491   : > { %v1160_v0 = vadd.f32 %v1158_v55, %v1157_v36  ;;  %v1293_v55 = vld [vmem:[%s1292_s20] sm:$0x3f] }
 0x492   : > { %v1375_v40 = vrot.slane %v1293_v55, 2 }
 0x493   : > { %1743 = vtanh.f32 %v1160_v0 }
 0x499   : > { %v1744_v9 = vpop.eup %1743 }
 0x49a   : > { %v1163_v63 = vmul.f32 %v1744_v9, %v1162_v7 }
 0x49c   : > { %v2774_v12 = vadd.f32 %v1164_v10, %v1163_v63 }
 0x49e   : > { %1168 = vst [vmem:[%s1167_s7] sm:$0x3] %v2774_v12  ;;  %1190 = vmatmul.f32.vlgmr.msra.gmra.mxu2 %v2774_v12  ;;  %1210 = vmatmul.f32.vlgmr.msra.gmra.mxu3 %v2774_v12 }
 0x49f   : > { %1230 = vmatmul.f32.vlgmr.msrb.gmra.mxu0 %v2774_v12 }
 0x51c   : > { %v1231_v28 = vpop.f32.mrf.mxu0 }
 0x51d   : > { %v1232_v5 = vadd.f32 %v1231_v28, %v2360_v39 }
 0x521   : > { %v1191_v19 = vpop.f32.mrf.mxu2  ;;  %v1211_v21 = vpop.f32.mrf.mxu3 }
 0x522   : > { %v1192_v22 = vadd.f32 %v1191_v19, %v2883_v3  ;;  %v1212_v8 = vadd.f32 %v1211_v21, %v2884_v6 }
 0x524   : > { %v1234_v33 = vadd.f32 %v1192_v22, %v1173_v13  ;;  %v1257_v45 = vadd.f32 %v1255_v18, %v1212_v8 }
 0x526   : > { %v1635_v14 = vmul.f32 -1.442695, %v1234_v33  ;;  %v1636_v17 = vmul.f32 -1.442695, %v1257_v45  ;;  %v1398_v33 = vrot.slane %v1293_v55, 4 }
 0x528   : > { %1745 = vpow2.f32 %v1635_v14 }
 0x529   : > { %1747 = vpow2.f32 %v1636_v17 }
 0x52e   : > { %v1746_v52 = vpop.eup %1745 }
 0x52f   : > { %v1748_v43 = vpop.eup %1747  ;;  %v1238_v23 = vadd.f32 1.0, %v1746_v52 }
 0x530   : > { %v1261_v26 = vadd.f32 1.0, %v1748_v43 }
 0x531   : > { %1749 = vrcp.f32 %v1238_v23  ;;  %v1250_v15 = vand.u32 2147483648, %v1238_v23  ;;  %v1248_v50 = vand.u32 2147483647, %v1238_v23  ;;  %vm1244_vm1 = vweird.f32 %v1238_v23 }
 0x532   : > { %1751 = vrcp.f32 %v1261_v26  ;;  %v1273_v29 = vand.u32 2147483648, %v1261_v26  ;;  %vm1267_vm5 = vweird.f32 %v1261_v26  ;;  %v1271_v37 = vand.u32 2147483647, %v1261_v26 }
 0x533   : > { %v1251_v49 = vor.u32 1.1754944e-38, %v1250_v15  ;;  %vm1249_vm3 = vcmp.eq.f32.partialorder %v1248_v50, 8.507059e+37 }
 0x534   : > { %v1274_v57 = vor.u32 1.1754944e-38, %v1273_v29  ;;  %vm1272_vm7 = vcmp.eq.f32.partialorder %v1271_v37, 8.507059e+37 }
 0x537   : > { %v1750_v27 = vpop.eup %1749 }
 0x538   : > { %v1752_v32 = vpop.eup %1751  ;;  %v1240_v35 = vmul.f32 %v1750_v27, %v1238_v23  ;;  %vm1245_vm0 = vweird.f32 %v1750_v27 }
 0x539   : > { %v1263_v16 = vmul.f32 %v1752_v32, %v1261_v26  ;;  %vm1246_vm2 = vmor %vm1244_vm1, %vm1245_vm0  ;;  %vm1268_vm4 = vweird.f32 %v1752_v32 }
 0x53a   : > { %v1241_v24 = vsub.f32 1.0, %v1240_v35  ;;  %vm1269_vm6 = vmor %vm1267_vm5, %vm1268_vm4 }
 0x53b   : > { %v1264_v25 = vsub.f32 1.0, %v1263_v16 }
 0x53c   : > { %v1242_v30 = vmul.f32 %v1750_v27, %v1241_v24 }
 0x53d   : > { %v1265_v44 = vmul.f32 %v1752_v32, %v1264_v25 }
 0x53e   : > { %v1243_v48 = vadd.f32 %v1750_v27, %v1242_v30 }
 0x53f   : > { %v1266_v20 = vadd.f32 %v1752_v32, %v1265_v44 }
 0x540   : > { %v1247_v47 = vsel %vm1246_vm2, %v1750_v27, %v1243_v48 }
 0x541   : > { %v1252_v42 = vsel %vm1249_vm3, %v1251_v49, %v1247_v47  ;;  %v1270_v56 = vsel %vm1269_vm6, %v1752_v32, %v1266_v20 }
 0x542   : > { %v1277_v34 = vmul.f32 %v1252_v42, %v1232_v5  ;;  %v1275_v58 = vsel %vm1272_vm7, %v1274_v57, %v1270_v56 }
 0x543   : > { %v1282_v59 = vsub.f32 1.0, %v1275_v58  ;;  %v1284_v62 = vmul.f32 %v1275_v58, %v2774_v12 }
 0x544   : > { %v1280_v38 = vadd.f32 %v1278_v11, %v1277_v34 }
 0x546   : > { %1753 = vtanh.f32 %v1280_v38 }
 0x54c   : > { %v1754_v60 = vpop.eup %1753 }
 0x54d   : > { %v1283_v61 = vmul.f32 %v1754_v60, %v1282_v59 }
 0x54f   : > { %v2792_v54 = vadd.f32 %v1284_v62, %v1283_v61 }
 0x551   : > { %1288 = vst [vmem:[%s1287_s14] sm:$0x3] %v2792_v54  ;;  %1310 = vmatmul.f32.vlgmr.msrb.gmra.mxu1 %v2792_v54  ;;  %1330 = vmatmul.f32.vlgmr.msrb.gmra.mxu2 %v2792_v54 }
 0x552   : > { %1350 = vmatmul.f32.vlgmr.msrb.gmra.mxu3 %v2792_v54 }
 0x5ce   : > { %v1311_v41 = vpop.f32.mrf.mxu1 }
 0x5cf   : > { %v1312_v51 = vadd.f32 %v1311_v41, %v2883_v3 }
 0x5d1   : > { %v1354_v53 = vadd.f32 %v1312_v51, %v1293_v55 }
 0x5d3   : > { %v1639_v31 = vmul.f32 -1.442695, %v1354_v53 }
 0x5d4   : > { %v1331_v36 = vpop.f32.mrf.mxu2 }
 0x5d5   : > { %1755 = vpow2.f32 %v1639_v31  ;;  %v1332_v46 = vadd.f32 %v1331_v36, %v2884_v6  ;;  %v1351_v21 = vpop.f32.mrf.mxu3 }
 0x5d6   : > { %v1352_v14 = vadd.f32 %v1351_v21, %v2360_v39 }
 0x5d7   : > { %v1377_v0 = vadd.f32 %v1375_v40, %v1332_v46 }
 0x5d9   : > { %v1640_v1 = vmul.f32 -1.442695, %v1377_v0 }
 0x5db   : > { %v1756_v2 = vpop.eup %1755  ;;  %1757 = vpow2.f32 %v1640_v1 }
 0x5dc   : > { %v1358_v4 = vadd.f32 1.0, %v1756_v2 }
 0x5de   : > { %1759 = vrcp.f32 %v1358_v4  ;;  %v1370_v3 = vand.u32 2147483648, %v1358_v4  ;;  %v1368_v18 = vand.u32 2147483647, %v1358_v4  ;;  %vm1364_vm9 = vweird.f32 %v1358_v4 }
 0x5e0   : > { %v1371_v8 = vor.u32 1.1754944e-38, %v1370_v3  ;;  %vm1369_vm11 = vcmp.eq.f32.partialorder %v1368_v18, 8.507059e+37 }
 0x5e1   : > { %v1758_v7 = vpop.eup %1757 }
 0x5e2   : > { %v1381_v9 = vadd.f32 1.0, %v1758_v7 }
 0x5e4   : > { %v1760_v63 = vpop.eup %1759  ;;  %1761 = vrcp.f32 %v1381_v9  ;;  %v1393_v23 = vand.u32 2147483648, %v1381_v9  ;;  %v1391_v27 = vand.u32 2147483647, %v1381_v9  ;;  %vm1387_vm13 = vweird.f32 %v1381_v9 }
 0x5e5   : > { %v1360_v10 = vmul.f32 %v1760_v63, %v1358_v4  ;;  %vm1365_vm8 = vweird.f32 %v1760_v63 }
 0x5e6   : > { %vm1366_vm10 = vmor %vm1364_vm9, %vm1365_vm8  ;;  %v1394_v16 = vor.u32 1.1754944e-38, %v1393_v23  ;;  %vm1392_vm15 = vcmp.eq.f32.partialorder %v1391_v27, 8.507059e+37 }
 0x5e7   : > { %v1361_v12 = vsub.f32 1.0, %v1360_v10 }
 0x5e9   : > { %v1362_v13 = vmul.f32 %v1760_v63, %v1361_v12 }
 0x5ea   : > { %v1762_v19 = vpop.eup %1761 }
 0x5eb   : > { %v1383_v22 = vmul.f32 %v1762_v19, %v1381_v9  ;;  %v1363_v6 = vadd.f32 %v1760_v63, %v1362_v13  ;;  %vm1388_vm12 = vweird.f32 %v1762_v19 }
 0x5ec   : > { %vm1389_vm14 = vmor %vm1387_vm13, %vm1388_vm12 }
 0x5ed   : > { %v1384_v45 = vsub.f32 1.0, %v1383_v22  ;;  %v1367_v17 = vsel %vm1366_vm10, %v1760_v63, %v1363_v6 }
 0x5ee   : > { %v1372_v52 = vsel %vm1369_vm11, %v1371_v8, %v1367_v17 }
 0x5ef   : > { %v1385_v43 = vmul.f32 %v1762_v19, %v1384_v45  ;;  %v1397_v26 = vmul.f32 %v1372_v52, %v1352_v14 }
 0x5f1   : > { %v1386_v32 = vadd.f32 %v1762_v19, %v1385_v43  ;;  %v1400_v35 = vadd.f32 %v1398_v33, %v1397_v26 }
 0x5f3   : > { %v1390_v24 = vsel %vm1389_vm14, %v1762_v19, %v1386_v32  ;;  %1763 = vtanh.f32 %v1400_v35 }
 0x5f4   : > { %v1395_v15 = vsel %vm1392_vm15, %v1394_v16, %v1390_v24 }
 0x5f5   : > { %v1402_v39 = vsub.f32 1.0, %v1395_v15  ;;  %v1404_v50 = vmul.f32 %v1395_v15, %v2792_v54 }
 0x5f9   : > { %v1764_v25 = vpop.eup %1763 }
 0x5fa   : > { %v1403_v30 = vmul.f32 %v1764_v25, %v1402_v39  ;;  %1415 = sbr.rel (!%p1893_p5) target bundleno = 1550 (0x60e), region = 100 }
 0x5fc   : > { %v1405_v28 = vadd.f32 %v1404_v50, %v1403_v30 }
 0x5fe   : > { %1408 = vst [vmem:[%s1407_s22] sm:$0x3] %v1405_v28 }
 0x605   : > { %v1434_v44 = vld [vmem:[%s2365_s28] sm:$0x3]  ;;  %v1436_v48 = vld [vmem:[%s2365_s28 + $0x2] sm:$0x3]  ;;  %v1438_v49 = vld [vmem:[%s2365_s28 + $0x4] sm:$0x3] }
 0x606   : > { %1435 = vst [vmem:[%s1417_s27] sm:$0x3] %v1434_v44  ;;  %v1440_v5 = vld [vmem:[%s2365_s28 + $0x6] sm:$0x3]  ;;  %v1442_v47 = vld [vmem:[%s2365_s28 + $0x8] sm:$0x3] }
 0x607   : > { %1437 = vst [vmem:[%s1417_s27 + $0x4] sm:$0x3] %v1436_v48  ;;  %v1444_v11 = vld [vmem:[%s2365_s28 + $0xa] sm:$0x3]  ;;  %v1446_v42 = vld [vmem:[%s2365_s28 + $0xc] sm:$0x3] }
 0x608   : > { %1439 = vst [vmem:[%s1417_s27 + $0x8] sm:$0x3] %v1438_v49  ;;  %v1448_v20 = vld [vmem:[%s2365_s28 + $0xe] sm:$0x3] }
 0x609   : > { %1441 = vst [vmem:[%s1417_s27 + $0xc] sm:$0x3] %v1440_v5 }
 0x60a   : > { %1443 = vst [vmem:[%s1417_s27 + $0x10] sm:$0x3] %v1442_v47 }
 0x60b   : > { %1445 = vst [vmem:[%s1417_s27 + $0x14] sm:$0x3] %v1444_v11 }
 0x60c   : > { %1447 = vst [vmem:[%s1417_s27 + $0x18] sm:$0x3] %v1446_v42 }
 0x60d   : > { %1449 = vst [vmem:[%s1417_s27 + $0x1c] sm:$0x3] %v1448_v20 }
 0x60e PF: > { %p10_p12 = scmp.ge.s32.totalorder %s1877_s16, 4   ;;  %s2885_s12 = smov %s1831_s13 }
 0x60f   : > { %s2886_s13 = smov %s1887_s19  ;;  %s2887_s14 = smov %s1877_s16 }
 0x610   :  { %12 = sbr.rel (!%p10_p12) target bundleno = 2 (0x2), region = 199 }

// kernel: lipnet_forward.13
= control target key start
LH: loop header
LB: loop body
LE: loop exit
PB: predicated region body
PF: predicated region fallthrough
CT: control target
= control target key end

     0   :  { %s1461_s12 = smov 0   ;;  %s1463_s13 = smov 0   ;;  %s1807_s0 = inlined_call_operand.vmem [shape: bf16[16,256], index: 0, kind: input, shape index: {}]   ;;  %s1808_s1 = inlined_call_operand.vmem [shape: bf16[256,768], index: 1, kind: input, shape index: {}]   ;;  %s1809_s2 = inlined_call_operand.vmem [shape: f32[1,768], index: 2, kind: input, shape index: {}]   ;;  %s1810_s3 = inlined_call_operand.vmem [shape: f32[16,768], index: 3, kind: output, shape index: {}]  }
   0x1   :  { %s1465_s14 = smov 0   ;;  %s1467_s15 = smov 0  }
   0x2   :  { %s1469_s16 = smov 0  }
   0x3 LB: > { %s28_s17 = sadd.s32 1, %s1435_s15  ;;  %s1032_s18 = sadd.s32 4294967295, %s1439_s16   ;;  %s1439_s16 = sphi %s1469_s16, %s13_s16   ;;  %s1435_s15 = sphi %s1467_s15, %s1815_s15   ;;  %s1431_s14 = sphi %s1465_s14, %s1814_s14   ;;  %s1427_s13 = sphi %s1463_s13, %s1813_s13   ;;  %s1423_s12 = sphi %s1461_s12, %s1812_s12  }
   0x4   : > { %p30_p0 = scmp.ge.s32.totalorder %s28_s17, 2  ;;  %p76_p1 = scmp.ne.s32.totalorder %s1427_s13, %s1423_s12 }
   0x5   : > { %p77_p2 = scmp.eq.s32.totalorder %s1439_s16, 0  ;;  %p134_p4 = scmp.eq.s32.totalorder %s1032_s18, 1 }
   0x6   : > { %s1817_s17 = smov (%p30_p0, %s28_s17), 0  ;;  %s69_s20 = sadd.s32 1, %s1427_s13 }
   0x7   : > { %p78_p3 = por %p77_p2, %p76_p1  ;;  %s65_s19 = ssub.s32 %s1435_s15, %s1817_s17 }
   0x8   : > { %p67_p5 = scmp.eq.s32.totalorder %s65_s19, 0  ;;  %p1496_p6 = por %p134_p4, %p76_p1 }
   0x9   : > { %p1036_p7 = scmp.ge.s32.totalorder %s1439_s16, 2 }
   0xa   : > { %s1501_s22 = scalar_select %p67_p5, %s1427_s13, %s69_s20  }
   0xb   : > { %171 = sbr.rel (%p1036_p7) target bundleno = 85 (0x55), region = 20 }
  0x10   : > { %174 = sbr.rel (!%p78_p3) target bundleno = 85 (0x55), region = 24  ;;  %s176_s23 = sand.u32 (%p78_p3), 1, %s1427_s13  }
  0x11   : > { %s1306_s24 = smul.u32 (%p78_p3), 12, %s1435_s15 }
  0x12   : > { %s1358_s25 = smul.u32 (%p78_p3), 384, %s176_s23 }
  0x13   : > { %s1509_s28 = scalar_lea.vmem (%p78_p3), %s1808_s1, %s1306_s24 }
  0x14   : > { %v199_v0 = vld [vmem:[%s1509_s28] sm:$0xff] (%p78_p3)  ;;  %v201_v1 = vld [vmem:[%s1509_s28 + $0x18] sm:$0xff] (%p78_p3)  ;;  %v203_v2 = vld [vmem:[%s1509_s28 + $0x30] sm:$0xff] (%p78_p3)  ;;  %s1514_s29 = scalar_lea.vmem (%p78_p3), [#allocation3], %s1358_s25 }
  0x15   : > { %200 = vst [vmem:[%s1514_s29] sm:$0xff] %v199_v0  ;;  %v205_v3 = vld [vmem:[%s1509_s28 + $0x48] sm:$0xff]  ;;  %v207_v4 = vld [vmem:[%s1509_s28 + $0x60] sm:$0xff]  ;;  %v209_v5 = vld [vmem:[%s1509_s28 + $0x78] sm:$0xff] }
  0x16   : > { %202 = vst [vmem:[%s1514_s29 + $0xc] sm:$0xff] %v201_v1  ;;  %v211_v6 = vld [vmem:[%s1509_s28 + $0x90] sm:$0xff]  ;;  %v213_v7 = vld [vmem:[%s1509_s28 + $0xa8] sm:$0xff]  ;;  %v215_v8 = vld [vmem:[%s1509_s28 + $0xc0] sm:$0xff] }
  0x17   : > { %204 = vst [vmem:[%s1514_s29 + $0x18] sm:$0xff] %v203_v2  ;;  %v217_v9 = vld [vmem:[%s1509_s28 + $0xd8] sm:$0xff]  ;;  %v219_v10 = vld [vmem:[%s1509_s28 + $0xf0] sm:$0xff]  ;;  %v221_v11 = vld [vmem:[%s1509_s28 + $0x108] sm:$0xff] }
  0x18   : > { %206 = vst [vmem:[%s1514_s29 + $0x24] sm:$0xff] %v205_v3  ;;  %v223_v12 = vld [vmem:[%s1509_s28 + $0x120] sm:$0xff]  ;;  %v225_v13 = vld [vmem:[%s1509_s28 + $0x138] sm:$0xff]  ;;  %v227_v14 = vld [vmem:[%s1509_s28 + $0x150] sm:$0xff] }
  0x19   : > { %208 = vst [vmem:[%s1514_s29 + $0x30] sm:$0xff] %v207_v4  ;;  %v229_v15 = vld [vmem:[%s1509_s28 + $0x168] sm:$0xff]  ;;  %v231_v16 = vld [vmem:[%s1509_s28 + $0x180] sm:$0xff]  ;;  %v233_v17 = vld [vmem:[%s1509_s28 + $0x198] sm:$0xff] }
  0x1a   : > { %210 = vst [vmem:[%s1514_s29 + $0x3c] sm:$0xff] %v209_v5  ;;  %v235_v18 = vld [vmem:[%s1509_s28 + $0x1b0] sm:$0xff]  ;;  %v237_v19 = vld [vmem:[%s1509_s28 + $0x1c8] sm:$0xff]  ;;  %v239_v20 = vld [vmem:[%s1509_s28 + $0x1e0] sm:$0xff] }
  0x1b   : > { %212 = vst [vmem:[%s1514_s29 + $0x48] sm:$0xff] %v211_v6  ;;  %v241_v21 = vld [vmem:[%s1509_s28 + $0x1f8] sm:$0xff]  ;;  %v243_v22 = vld [vmem:[%s1509_s28 + $0x210] sm:$0xff]  ;;  %v245_v23 = vld [vmem:[%s1509_s28 + $0x228] sm:$0xff] }
  0x1c   : > { %214 = vst [vmem:[%s1514_s29 + $0x54] sm:$0xff] %v213_v7  ;;  %v247_v24 = vld [vmem:[%s1509_s28 + $0x240] sm:$0xff]  ;;  %v249_v25 = vld [vmem:[%s1509_s28 + $0x258] sm:$0xff]  ;;  %v251_v26 = vld [vmem:[%s1509_s28 + $0x270] sm:$0xff] }
  0x1d   : > { %216 = vst [vmem:[%s1514_s29 + $0x60] sm:$0xff] %v215_v8  ;;  %v253_v27 = vld [vmem:[%s1509_s28 + $0x288] sm:$0xff]  ;;  %v255_v28 = vld [vmem:[%s1509_s28 + $0x2a0] sm:$0xff]  ;;  %v257_v29 = vld [vmem:[%s1509_s28 + $0x2b8] sm:$0xff] }
  0x1e   : > { %218 = vst [vmem:[%s1514_s29 + $0x6c] sm:$0xff] %v217_v9  ;;  %v259_v30 = vld [vmem:[%s1509_s28 + $0x2d0] sm:$0xff]  ;;  %v261_v31 = vld [vmem:[%s1509_s28 + $0x2e8] sm:$0xff]  ;;  %v1040_v33 = vld [vmem:[%s1509_s28 + $0x20] sm:$0xf] }
  0x1f   : > { %220 = vst [vmem:[%s1514_s29 + $0x78] sm:$0xff] %v219_v10  ;;  %v1038_v32 = vld [vmem:[%s1509_s28 + $0x8] sm:$0xf]  ;;  %v1042_v34 = vld [vmem:[%s1509_s28 + $0x38] sm:$0xf] }
  0x20   : > { %222 = vst [vmem:[%s1514_s29 + $0x84] sm:$0xff] %v221_v11  ;;  %v1044_v35 = vld [vmem:[%s1509_s28 + $0x50] sm:$0xf]  ;;  %v1046_v36 = vld [vmem:[%s1509_s28 + $0x68] sm:$0xf] }
  0x21   : > { %224 = vst [vmem:[%s1514_s29 + $0x90] sm:$0xff] %v223_v12  ;;  %v1048_v37 = vld [vmem:[%s1509_s28 + $0x80] sm:$0xf]  ;;  %v1050_v38 = vld [vmem:[%s1509_s28 + $0x98] sm:$0xf] }
  0x22   : > { %226 = vst [vmem:[%s1514_s29 + $0x9c] sm:$0xff] %v225_v13  ;;  %v1052_v39 = vld [vmem:[%s1509_s28 + $0xb0] sm:$0xf]  ;;  %v1054_v40 = vld [vmem:[%s1509_s28 + $0xc8] sm:$0xf] }
  0x23   : > { %228 = vst [vmem:[%s1514_s29 + $0xa8] sm:$0xff] %v227_v14  ;;  %v1056_v41 = vld [vmem:[%s1509_s28 + $0xe0] sm:$0xf]  ;;  %v1058_v42 = vld [vmem:[%s1509_s28 + $0xf8] sm:$0xf] }
  0x24   : > { %230 = vst [vmem:[%s1514_s29 + $0xb4] sm:$0xff] %v229_v15  ;;  %v1060_v43 = vld [vmem:[%s1509_s28 + $0x110] sm:$0xf]  ;;  %v1062_v44 = vld [vmem:[%s1509_s28 + $0x128] sm:$0xf] }
  0x25   : > { %232 = vst [vmem:[%s1514_s29 + $0xc0] sm:$0xff] %v231_v16  ;;  %v1064_v45 = vld [vmem:[%s1509_s28 + $0x140] sm:$0xf]  ;;  %v1066_v46 = vld [vmem:[%s1509_s28 + $0x158] sm:$0xf] }
  0x26   : > { %234 = vst [vmem:[%s1514_s29 + $0xcc] sm:$0xff] %v233_v17  ;;  %v1068_v47 = vld [vmem:[%s1509_s28 + $0x170] sm:$0xf]  ;;  %v1070_v48 = vld [vmem:[%s1509_s28 + $0x188] sm:$0xf] }
  0x27   : > { %236 = vst [vmem:[%s1514_s29 + $0xd8] sm:$0xff] %v235_v18  ;;  %v1072_v49 = vld [vmem:[%s1509_s28 + $0x1a0] sm:$0xf]  ;;  %v1074_v50 = vld [vmem:[%s1509_s28 + $0x1b8] sm:$0xf] }
  0x28   : > { %238 = vst [vmem:[%s1514_s29 + $0xe4] sm:$0xff] %v237_v19  ;;  %v1076_v51 = vld [vmem:[%s1509_s28 + $0x1d0] sm:$0xf]  ;;  %v1078_v52 = vld [vmem:[%s1509_s28 + $0x1e8] sm:$0xf] }
  0x29   : > { %240 = vst [vmem:[%s1514_s29 + $0xf0] sm:$0xff] %v239_v20  ;;  %v1080_v53 = vld [vmem:[%s1509_s28 + $0x200] sm:$0xf]  ;;  %v1082_v54 = vld [vmem:[%s1509_s28 + $0x218] sm:$0xf] }
  0x2a   : > { %242 = vst [vmem:[%s1514_s29 + $0xfc] sm:$0xff] %v241_v21  ;;  %v1084_v55 = vld [vmem:[%s1509_s28 + $0x230] sm:$0xf]  ;;  %v1086_v56 = vld [vmem:[%s1509_s28 + $0x248] sm:$0xf] }
  0x2b   : > { %244 = vst [vmem:[%s1514_s29 + $0x108] sm:$0xff] %v243_v22  ;;  %v1088_v57 = vld [vmem:[%s1509_s28 + $0x260] sm:$0xf]  ;;  %v1090_v58 = vld [vmem:[%s1509_s28 + $0x278] sm:$0xf] }
  0x2c   : > { %246 = vst [vmem:[%s1514_s29 + $0x114] sm:$0xff] %v245_v23  ;;  %v1092_v59 = vld [vmem:[%s1509_s28 + $0x290] sm:$0xf]  ;;  %v1094_v60 = vld [vmem:[%s1509_s28 + $0x2a8] sm:$0xf] }
  0x2d   : > { %248 = vst [vmem:[%s1514_s29 + $0x120] sm:$0xff] %v247_v24  ;;  %v1096_v61 = vld [vmem:[%s1509_s28 + $0x2c0] sm:$0xf]  ;;  %v1098_v62 = vld [vmem:[%s1509_s28 + $0x2d8] sm:$0xf] }
  0x2e   : > { %250 = vst [vmem:[%s1514_s29 + $0x12c] sm:$0xff] %v249_v25  ;;  %v1100_v63 = vld [vmem:[%s1509_s28 + $0x2f0] sm:$0xf] }
  0x2f   : > { %252 = vst [vmem:[%s1514_s29 + $0x138] sm:$0xff] %v251_v26 }
  0x30   : > { %254 = vst [vmem:[%s1514_s29 + $0x144] sm:$0xff] %v253_v27 }
  0x31   : > { %256 = vst [vmem:[%s1514_s29 + $0x150] sm:$0xff] %v255_v28 }
  0x32   : > { %258 = vst [vmem:[%s1514_s29 + $0x15c] sm:$0xff] %v257_v29 }
  0x33   : > { %260 = vst [vmem:[%s1514_s29 + $0x168] sm:$0xff] %v259_v30 }
  0x34   : > { %262 = vst [vmem:[%s1514_s29 + $0x174] sm:$0xff] %v261_v31 }
  0x35   : > { %1039 = vst [vmem:[%s1514_s29 + $0x8] sm:$0xf] %v1038_v32 }
  0x36   : > { %1041 = vst [vmem:[%s1514_s29 + $0x14] sm:$0xf] %v1040_v33 }
  0x37   : > { %1043 = vst [vmem:[%s1514_s29 + $0x20] sm:$0xf] %v1042_v34 }
  0x38   : > { %1045 = vst [vmem:[%s1514_s29 + $0x2c] sm:$0xf] %v1044_v35 }
  0x39   : > { %1047 = vst [vmem:[%s1514_s29 + $0x38] sm:$0xf] %v1046_v36 }
  0x3a   : > { %1049 = vst [vmem:[%s1514_s29 + $0x44] sm:$0xf] %v1048_v37 }
  0x3b   : > { %1051 = vst [vmem:[%s1514_s29 + $0x50] sm:$0xf] %v1050_v38 }
  0x3c   : > { %1053 = vst [vmem:[%s1514_s29 + $0x5c] sm:$0xf] %v1052_v39 }
  0x3d   : > { %1055 = vst [vmem:[%s1514_s29 + $0x68] sm:$0xf] %v1054_v40 }
  0x3e   : > { %1057 = vst [vmem:[%s1514_s29 + $0x74] sm:$0xf] %v1056_v41 }
  0x3f   : > { %1059 = vst [vmem:[%s1514_s29 + $0x80] sm:$0xf] %v1058_v42 }
  0x40   : > { %1061 = vst [vmem:[%s1514_s29 + $0x8c] sm:$0xf] %v1060_v43 }
  0x41   : > { %1063 = vst [vmem:[%s1514_s29 + $0x98] sm:$0xf] %v1062_v44 }
  0x42   : > { %1065 = vst [vmem:[%s1514_s29 + $0xa4] sm:$0xf] %v1064_v45 }
  0x43   : > { %1067 = vst [vmem:[%s1514_s29 + $0xb0] sm:$0xf] %v1066_v46 }
  0x44   : > { %1069 = vst [vmem:[%s1514_s29 + $0xbc] sm:$0xf] %v1068_v47 }
  0x45   : > { %1071 = vst [vmem:[%s1514_s29 + $0xc8] sm:$0xf] %v1070_v48 }
  0x46   : > { %1073 = vst [vmem:[%s1514_s29 + $0xd4] sm:$0xf] %v1072_v49 }
  0x47   : > { %1075 = vst [vmem:[%s1514_s29 + $0xe0] sm:$0xf] %v1074_v50 }
  0x48   : > { %1077 = vst [vmem:[%s1514_s29 + $0xec] sm:$0xf] %v1076_v51 }
  0x49   : > { %1079 = vst [vmem:[%s1514_s29 + $0xf8] sm:$0xf] %v1078_v52 }
  0x4a   : > { %1081 = vst [vmem:[%s1514_s29 + $0x104] sm:$0xf] %v1080_v53 }
  0x4b   : > { %1083 = vst [vmem:[%s1514_s29 + $0x110] sm:$0xf] %v1082_v54 }
  0x4c   : > { %1085 = vst [vmem:[%s1514_s29 + $0x11c] sm:$0xf] %v1084_v55 }
  0x4d   : > { %1087 = vst [vmem:[%s1514_s29 + $0x128] sm:$0xf] %v1086_v56 }
  0x4e   : > { %1089 = vst [vmem:[%s1514_s29 + $0x134] sm:$0xf] %v1088_v57 }
  0x4f   : > { %1091 = vst [vmem:[%s1514_s29 + $0x140] sm:$0xf] %v1090_v58 }
  0x50   : > { %1093 = vst [vmem:[%s1514_s29 + $0x14c] sm:$0xf] %v1092_v59 }
  0x51   : > { %1095 = vst [vmem:[%s1514_s29 + $0x158] sm:$0xf] %v1094_v60 }
  0x52   : > { %1097 = vst [vmem:[%s1514_s29 + $0x164] sm:$0xf] %v1096_v61 }
  0x53   : > { %1099 = vst [vmem:[%s1514_s29 + $0x170] sm:$0xf] %v1098_v62 }
  0x54   : > { %1101 = vst [vmem:[%s1514_s29 + $0x17c] sm:$0xf] %v1100_v63 }
  0x55 PF: > { %p1102_p8 = scmp.ge.s32.totalorder %s1439_s16, 1  ;;  %p347_p9 = scmp.lt.s32.totalorder %s1439_s16, 3 }
  0x57   : > { %p348_p10 = pnand %p1102_p8, %p347_p9 }
  0x58   : > { %s354_s30 = sand.u32 (!%p348_p10), 1, %s1423_s12   ;;  %s404_s20 = smul.u32 (!%p348_p10), 3, %s1431_s14 }
  0x59   : > { %351 = sbr.rel (%p348_p10) target bundleno = 308 (0x134), region = 54 }
  0x5a   : > { %s1359_s4 = smul.u32 (!%p348_p10), 384, %s354_s30  ;;  %p405_p11 = scmp.lt.s32.totalorder (!%p348_p10), %s404_s20, 5 }
  0x5b   : > { %s1360_s26 = smul.u32 (!%p348_p10), 48, %s354_s30 }
  0x5c   : > { %s1646_s5 = scalar_lea.vmem (!%p348_p10), [#allocation3], %s1359_s4 }
  0x5d   : > { %s1772_s27 = scalar_lea.vmem (!%p348_p10), [#allocation4], %s1360_s26 }
  0x5e   : > { %v1197_v0 = vld [vmem:[%s1646_s5 + $0xa8] sm:$0xf]  ;;  %v1331_v1 = vld [vmem:[%s1646_s5 + $0xb0] sm:$0xf0]  ;;  %v1185_v5 = vld [vmem:[%s1646_s5 + $0x90] sm:$0xf] }
  0x5f   : > { %v1293_v2 = vld [vmem:[%s1646_s5 + $0x168] sm:$0xf]  ;;  %v1198_v3 = vor.u32 %v1331_v1, %v1197_v0  ;;  %v1355_v4 = vld [vmem:[%s1646_s5 + $0x170] sm:$0xf0]  ;;  %v1328_v6 = vld [vmem:[%s1646_s5 + $0x98] sm:$0xf0] }
  0x60   : > { %v1294_v7 = vor.u32 %v1355_v4, %v1293_v2  ;;  %v1281_v8 = vld [vmem:[%s1646_s5 + $0x150] sm:$0xf]  ;;  %v1352_v9 = vld [vmem:[%s1646_s5 + $0x158] sm:$0xf0]  ;;  %v1186_v10 = vor.u32 %v1328_v6, %v1185_v5  ;;  %v1173_v12 = vld [vmem:[%s1646_s5 + $0x78] sm:$0xf] }
  0x61   : > { %759 = vmatpush.bf16.msra.mxu0 %v1198_v3  ;;  %v1282_v11 = vor.u32 %v1352_v9, %v1281_v8  ;;  %v1325_v13 = vld [vmem:[%s1646_s5 + $0x80] sm:$0xf0]  ;;  %v1269_v14 = vld [vmem:[%s1646_s5 + $0x138] sm:$0xf]  ;;  %v1330_v16 = vld [vmem:[%s1646_s5 + $0xac] sm:$0xf] }
  0x62   : > { %773 = vmatpush.bf16.msra.mxu1 %v1294_v7  ;;  %v1349_v15 = vld [vmem:[%s1646_s5 + $0x140] sm:$0xf0]  ;;  %v1199_v17 = vld [vmem:[%s1646_s5 + $0xb4] sm:$0xf0]  ;;  %v1354_v19 = vld [vmem:[%s1646_s5 + $0x16c] sm:$0xf]  ;;  %v1174_v21 = vor.u32 %v1325_v13, %v1173_v12 }
  0x63   : > { %v1202_v18 = vor.u32 %v1330_v16, %v1199_v17  ;;  %v1295_v20 = vld [vmem:[%s1646_s5 + $0x174] sm:$0xf0]  ;;  %v1161_v22 = vld [vmem:[%s1646_s5 + $0x60] sm:$0xf]  ;;  %v1322_v23 = vld [vmem:[%s1646_s5 + $0x68] sm:$0xf0]  ;;  %v1270_v25 = vor.u32 %v1349_v15, %v1269_v14 }
  0x64   : > { %v1298_v24 = vor.u32 %v1354_v19, %v1295_v20  ;;  %v1327_v26 = vld [vmem:[%s1646_s5 + $0x94] sm:$0xf]  ;;  %v1187_v27 = vld [vmem:[%s1646_s5 + $0x9c] sm:$0xf0]  ;;  %v1346_v30 = vld [vmem:[%s1646_s5 + $0x128] sm:$0xf0]  ;;  %v1162_v35 = vor.u32 %v1322_v23, %v1161_v22 }
  0x65   : > { %760 = vmatpush.bf16.msra.mxu0 %v1186_v10  ;;  %787 = vmatpush.bf16.msra.mxu2 %v1202_v18  ;;  %v1351_v28 = vld [vmem:[%s1646_s5 + $0x154] sm:$0xf]  ;;  %v1257_v29 = vld [vmem:[%s1646_s5 + $0x120] sm:$0xf]  ;;  %v1190_v31 = vor.u32 %v1327_v26, %v1187_v27  ;;  %v1324_v34 = vld [vmem:[%s1646_s5 + $0x7c] sm:$0xf] }
  0x66   : > { %774 = vmatpush.bf16.msra.mxu1 %v1282_v11  ;;  %801 = vmatpush.bf16.msra.mxu3 %v1298_v24  ;;  %v1283_v32 = vld [vmem:[%s1646_s5 + $0x15c] sm:$0xf0]  ;;  %v1175_v36 = vld [vmem:[%s1646_s5 + $0x84] sm:$0xf0]  ;;  %v1348_v37 = vld [vmem:[%s1646_s5 + $0x13c] sm:$0xf]  ;;  %v1258_v39 = vor.u32 %v1346_v30, %v1257_v29 }
  0x67   : > { %v1286_v33 = vor.u32 %v1351_v28, %v1283_v32  ;;  %v1271_v38 = vld [vmem:[%s1646_s5 + $0x144] sm:$0xf0]  ;;  %v1319_v41 = vld [vmem:[%s1646_s5 + $0x50] sm:$0xf0]  ;;  %v1178_v43 = vor.u32 %v1324_v34, %v1175_v36  ;;  %v1321_v46 = vld [vmem:[%s1646_s5 + $0x64] sm:$0xf] }
  0x68   : > { %v1149_v40 = vld [vmem:[%s1646_s5 + $0x48] sm:$0xf]  ;;  %v1343_v44 = vld [vmem:[%s1646_s5 + $0x110] sm:$0xf0]  ;;  %v1274_v45 = vor.u32 %v1348_v37, %v1271_v38  ;;  %v1163_v47 = vld [vmem:[%s1646_s5 + $0x6c] sm:$0xf0] }
  0x69   : > { %761 = vmatpush.bf16.msra.mxu0 %v1174_v21  ;;  %v1245_v42 = vld [vmem:[%s1646_s5 + $0x108] sm:$0xf]  ;;  %788 = vmatpush.bf16.msra.mxu2 %v1190_v31  ;;  %v1345_v48 = vld [vmem:[%s1646_s5 + $0x124] sm:$0xf]  ;;  %v1259_v49 = vld [vmem:[%s1646_s5 + $0x12c] sm:$0xf0]  ;;  %v1150_v50 = vor.u32 %v1319_v41, %v1149_v40  ;;  %v1166_v55 = vor.u32 %v1321_v46, %v1163_v47 }
  0x6a   : > { %775 = vmatpush.bf16.msra.mxu1 %v1270_v25  ;;  %802 = vmatpush.bf16.msra.mxu3 %v1286_v33  ;;  %v1246_v51 = vor.u32 %v1343_v44, %v1245_v42  ;;  %v1137_v52 = vld [vmem:[%s1646_s5 + $0x30] sm:$0xf]  ;;  %v1316_v53 = vld [vmem:[%s1646_s5 + $0x38] sm:$0xf0]  ;;  %v1262_v57 = vor.u32 %v1345_v48, %v1259_v49  ;;  %v1318_v58 = vld [vmem:[%s1646_s5 + $0x4c] sm:$0xf] }
  0x6b   : > { %v1233_v54 = vld [vmem:[%s1646_s5 + $0xf0] sm:$0xf]  ;;  %v1340_v56 = vld [vmem:[%s1646_s5 + $0xf8] sm:$0xf0]  ;;  %v1151_v59 = vld [vmem:[%s1646_s5 + $0x54] sm:$0xf0]  ;;  %v1138_v62 = vor.u32 %v1316_v53, %v1137_v52 }
  0x6c   : > { %v1342_v60 = vld [vmem:[%s1646_s5 + $0x10c] sm:$0xf]  ;;  %v1247_v61 = vld [vmem:[%s1646_s5 + $0x114] sm:$0xf0]  ;;  %v1234_v63 = vor.u32 %v1340_v56, %v1233_v54  ;;  %v1313_v1 = vld [vmem:[%s1646_s5 + $0x20] sm:$0xf0]  ;;  %v1154_v3 = vor.u32 %v1318_v58, %v1151_v59 }
  0x6d   : > { %762 = vmatpush.bf16.msra.mxu0 %v1162_v35  ;;  %789 = vmatpush.bf16.msra.mxu2 %v1178_v43  ;;  %v1125_v0 = vld [vmem:[%s1646_s5 + $0x18] sm:$0xf]  ;;  %v1337_v4 = vld [vmem:[%s1646_s5 + $0xe0] sm:$0xf0]  ;;  %v1250_v5 = vor.u32 %v1342_v60, %v1247_v61  ;;  %v1315_v6 = vld [vmem:[%s1646_s5 + $0x34] sm:$0xf] }
  0x6e   : > { %776 = vmatpush.bf16.msra.mxu1 %v1258_v39  ;;  %803 = vmatpush.bf16.msra.mxu3 %v1274_v45  ;;  %v1221_v2 = vld [vmem:[%s1646_s5 + $0xd8] sm:$0xf]  ;;  %v1139_v7 = vld [vmem:[%s1646_s5 + $0x3c] sm:$0xf0]  ;;  %v1339_v8 = vld [vmem:[%s1646_s5 + $0xf4] sm:$0xf]  ;;  %v1126_v10 = vor.u32 %v1313_v1, %v1125_v0 }
  0x6f   : > { %v1235_v9 = vld [vmem:[%s1646_s5 + $0xfc] sm:$0xf0]  ;;  %v1310_v12 = vld [vmem:[%s1646_s5 + $0x8] sm:$0xf0]  ;;  %v1222_v13 = vor.u32 %v1337_v4, %v1221_v2  ;;  %v1205_v16 = vld [vmem:[%s1646_s5 + $0xb0] sm:$0xf]  ;;  %v1142_v17 = vor.u32 %v1315_v6, %v1139_v7 }
  0x70   : > { %v1113_v11 = vld [vmem:[%s1646_s5] sm:$0xf]  ;;  %v1334_v15 = vld [vmem:[%s1646_s5 + $0xc8] sm:$0xf0]  ;;  %v1332_v18 = vld [vmem:[%s1646_s5 + $0xb8] sm:$0xf0]  ;;  %v1238_v21 = vor.u32 %v1339_v8, %v1235_v9 }
  0x71   : > { %763 = vmatpush.bf16.msra.mxu0 %v1150_v50  ;;  %790 = vmatpush.bf16.msra.mxu2 %v1166_v55  ;;  %v1209_v14 = vld [vmem:[%s1646_s5 + $0xc0] sm:$0xf]  ;;  %v1301_v19 = vld [vmem:[%s1646_s5 + $0x170] sm:$0xf]  ;;  %v1356_v20 = vld [vmem:[%s1646_s5 + $0x178] sm:$0xf0]  ;;  %v1114_v25 = vor.u32 %v1310_v12, %v1113_v11  ;;  %v1206_v30 = vor.u32 %v1332_v18, %v1205_v16 }
  0x72   : > { %777 = vmatpush.bf16.msra.mxu1 %v1246_v51  ;;  %804 = vmatpush.bf16.msra.mxu3 %v1262_v57  ;;  %v1105_v22 = vld [vmem:[%s1807_s0] sm:$0xf]  ;;  %v1312_v23 = vld [vmem:[%s1646_s5 + $0x1c] sm:$0xf]  ;;  %v1127_v24 = vld [vmem:[%s1646_s5 + $0x24] sm:$0xf0]  ;;  %v1210_v29 = vor.u32 %v1334_v15, %v1209_v14  ;;  %v1302_v33 = vor.u32 %v1356_v20, %v1301_v19 }
  0x73   : > { %v1308_v26 = vld [vmem:[%s1807_s0 + $0x4] sm:$0xf0]  ;;  %v1336_v27 = vld [vmem:[%s1646_s5 + $0xdc] sm:$0xf]  ;;  %v1307_v31 = vld [vmem:[%s1807_s0 + $0x4] sm:$0xf]  ;;  %v1130_v37 = vor.u32 %v1312_v23, %v1127_v24 }
  0x74   : > { %v1223_v28 = vld [vmem:[%s1646_s5 + $0xe4] sm:$0xf0]  ;;  %v1107_v32 = vld [vmem:[%s1807_s0 + $0x8] sm:$0xf0]  ;;  %v1193_v34 = vld [vmem:[%s1646_s5 + $0x98] sm:$0xf]  ;;  %v1728_v39 = vor.u32 %v1308_v26, %v1105_v22 }
  0x75   : > { %764 = vmatpush.bf16.msra.mxu0 %v1138_v62  ;;  %791 = vmatpush.bf16.msra.mxu2 %v1154_v3  ;;  %v1329_v35 = vld [vmem:[%s1646_s5 + $0xa0] sm:$0xf0]  ;;  %v1289_v36 = vld [vmem:[%s1646_s5 + $0x158] sm:$0xf]  ;;  %v1226_v40 = vor.u32 %v1336_v27, %v1223_v28  ;;  %v1115_v42 = vld [vmem:[%s1646_s5 + $0xc] sm:$0xf0]  ;;  %v1732_v43 = vor.u32 %v1307_v31, %v1107_v32 }
  0x76   : > { %778 = vmatpush.bf16.msra.mxu1 %v1234_v63  ;;  %805 = vmatpush.bf16.msra.mxu3 %v1250_v5  ;;  %v1353_v38 = vld [vmem:[%s1646_s5 + $0x160] sm:$0xf0]  ;;  %v1211_v45 = vld [vmem:[%s1646_s5 + $0xcc] sm:$0xf0]  ;;  %v1194_v46 = vor.u32 %v1329_v35, %v1193_v34  ;;  %v1181_v48 = vld [vmem:[%s1646_s5 + $0x80] sm:$0xf] }
  0x77   : > { %v1309_v41 = vld [vmem:[%s1646_s5 + $0x4] sm:$0xf]  ;;  %v1290_v47 = vor.u32 %v1353_v38, %v1289_v36  ;;  %v1326_v49 = vld [vmem:[%s1646_s5 + $0x88] sm:$0xf0]  ;;  %v1277_v51 = vld [vmem:[%s1646_s5 + $0x140] sm:$0xf] }
  0x78   : > { %v1333_v44 = vld [vmem:[%s1646_s5 + $0xc4] sm:$0xf]  ;;  %v1118_v50 = vor.u32 %v1309_v41, %v1115_v42  ;;  %v1350_v52 = vld [vmem:[%s1646_s5 + $0x148] sm:$0xf0]  ;;  %v1182_v54 = vor.u32 %v1326_v49, %v1181_v48  ;;  %v1169_v56 = vld [vmem:[%s1646_s5 + $0x68] sm:$0xf] }
  0x79   : > { %765 = vmatpush.bf16.msra.mxu0 %v1126_v10  ;;  %792 = vmatpush.bf16.msra.mxu2 %v1142_v17  ;;  %v1214_v53 = vor.u32 %v1333_v44, %v1211_v45  ;;  %v1278_v55 = vor.u32 %v1350_v52, %v1277_v51  ;;  %v1323_v57 = vld [vmem:[%s1646_s5 + $0x70] sm:$0xf0]  ;;  %v1265_v58 = vld [vmem:[%s1646_s5 + $0x128] sm:$0xf]  ;;  %v1157_v62 = vld [vmem:[%s1646_s5 + $0x50] sm:$0xf] }
  0x7a   : > { %779 = vmatpush.bf16.msra.mxu1 %v1222_v13  ;;  %806 = vmatpush.bf16.msra.mxu3 %v1238_v21  ;;  %v1347_v59 = vld [vmem:[%s1646_s5 + $0x130] sm:$0xf0]  ;;  %v1170_v60 = vor.u32 %v1323_v57, %v1169_v56  ;;  %v1320_v63 = vld [vmem:[%s1646_s5 + $0x58] sm:$0xf0]  ;;  %v1253_v0 = vld [vmem:[%s1646_s5 + $0x110] sm:$0xf] }
  0x7b   : > { %v1266_v61 = vor.u32 %v1347_v59, %v1265_v58  ;;  %v1344_v1 = vld [vmem:[%s1646_s5 + $0x118] sm:$0xf0]  ;;  %v1158_v2 = vor.u32 %v1320_v63, %v1157_v62  ;;  %v1145_v4 = vld [vmem:[%s1646_s5 + $0x38] sm:$0xf]  ;;  %v1317_v5 = vld [vmem:[%s1646_s5 + $0x40] sm:$0xf0] }
  0x7c   : > { %v1254_v3 = vor.u32 %v1344_v1, %v1253_v0  ;;  %v1241_v6 = vld [vmem:[%s1646_s5 + $0xf8] sm:$0xf]  ;;  %v1341_v7 = vld [vmem:[%s1646_s5 + $0x100] sm:$0xf0]  ;;  %v1146_v8 = vor.u32 %v1317_v5, %v1145_v4  ;;  %v1133_v10 = vld [vmem:[%s1646_s5 + $0x20] sm:$0xf] }
  0x7d   : > { %766 = vmatpush.bf16.msra.mxu0 %v1114_v25  ;;  %793 = vmatpush.bf16.msra.mxu2 %v1130_v37  ;;  %v1242_v9 = vor.u32 %v1341_v7, %v1241_v6  ;;  %v1314_v11 = vld [vmem:[%s1646_s5 + $0x28] sm:$0xf0]  ;;  %v1229_v12 = vld [vmem:[%s1646_s5 + $0xe0] sm:$0xf]  ;;  %v1121_v16 = vld [vmem:[%s1646_s5 + $0x8] sm:$0xf] }
  0x7e   : > { %780 = vmatpush.bf16.msra.mxu1 %v1210_v29  ;;  %807 = vmatpush.bf16.msra.mxu3 %v1226_v40  ;;  %v1338_v13 = vld [vmem:[%s1646_s5 + $0xe8] sm:$0xf0]  ;;  %v1134_v14 = vor.u32 %v1314_v11, %v1133_v10  ;;  %v1311_v17 = vld [vmem:[%s1646_s5 + $0x10] sm:$0xf0]  ;;  %v1217_v18 = vld [vmem:[%s1646_s5 + $0xc8] sm:$0xf] }
  0x7f   : > { %v1230_v15 = vor.u32 %v1338_v13, %v1229_v12  ;;  %v1335_v19 = vld [vmem:[%s1646_s5 + $0xd0] sm:$0xf0]  ;;  %v1122_v20 = vor.u32 %v1311_v17, %v1121_v16  ;;  %s1819_s20 = smov (!%p405_p11, %s404_s20), 5  ;;  %s1357_s12 = smul.u32 (%p1496_p6), 24, %s1431_s14 }
  0x80   : > { %767 = vmatmul.bf16.vlgmr.msra.gmra.mxu0 %v1728_v39  ;;  %v1218_v21 = vor.u32 %v1335_v19, %v1217_v18  ;;  %s407_s25 = scalar_lea.vmem %s1809_s2, %s1819_s20 }
  0x81   : > { %815 = vmatpush.bf16.msrb.mxu0 %v1206_v30  ;;  %781 = vmatmul.bf16.vlgmr.msra.gmra.mxu1 %v1732_v43  ;;  %v864_v22 = vld [vmem:[%s407_s25] sm:$0x7]  ;;  %s896_s30 = scalar_lea.vmem (%p1496_p6), %s1810_s3, %s1357_s12 }
  0x82   : > { %829 = vmatpush.bf16.msrb.mxu1 %v1302_v33  ;;  %794 = vmatpush.bf16.msra.mxu2 %v1118_v50  ;;  %v866_v24 = vperm.slane %v864_v22, 0  ;;  %v867_v33 = vperm.slane %v864_v22, 1  ;;  %v868_v42 = vperm.slane %v864_v22, 2 }
  0x83   : > { %808 = vmatpush.bf16.msra.mxu3 %v1214_v53 }
  0x85   : > { %816 = vmatpush.bf16.msrb.mxu0 %v1194_v46  ;;  %795 = vmatmul.bf16.vlgmr.msra.gmra.mxu2 %v1728_v39 }
  0x86   : > { %830 = vmatpush.bf16.msrb.mxu1 %v1290_v47  ;;  %809 = vmatmul.bf16.vlgmr.msra.gmra.mxu3 %v1732_v43 }
  0x89   : > { %817 = vmatpush.bf16.msrb.mxu0 %v1182_v54 }
  0x8a   : > { %831 = vmatpush.bf16.msrb.mxu1 %v1278_v55 }
  0x8d   : > { %818 = vmatpush.bf16.msrb.mxu0 %v1170_v60 }
  0x8e   : > { %832 = vmatpush.bf16.msrb.mxu1 %v1266_v61 }
  0x91   : > { %819 = vmatpush.bf16.msrb.mxu0 %v1158_v2 }
  0x92   : > { %833 = vmatpush.bf16.msrb.mxu1 %v1254_v3 }
  0x95   : > { %820 = vmatpush.bf16.msrb.mxu0 %v1146_v8 }
  0x96   : > { %834 = vmatpush.bf16.msrb.mxu1 %v1242_v9 }
  0x99   : > { %821 = vmatpush.bf16.msrb.mxu0 %v1134_v14 }
  0x9a   : > { %835 = vmatpush.bf16.msrb.mxu1 %v1230_v15 }
  0x9d   : > { %822 = vmatpush.bf16.msrb.mxu0 %v1122_v20 }
  0x9e   : > { %836 = vmatpush.bf16.msrb.mxu1 %v1218_v21 }
  0xa0   : > { %823 = vmatmul.bf16.vlgmr.msrb.gmra.mxu0 %v1728_v39 }
  0xa1   : > { %837 = vmatmul.bf16.vlgmr.msrb.gmra.mxu1 %v1732_v43 }
  0xfd   : > { %v768_v23 = vpop.f32.mrf.mxu0 }
  0xfe   : > { %v782_v25 = vpop.f32.mrf.mxu1 }
  0xff   : > { %v783_v26 = vadd.f32 %v782_v25, %v768_v23 }
 0x101   : > { %v872_v27 = vadd.f32 %v866_v24, %v783_v26 }
 0x103   : > { %878 = vst [vmem:[%s1772_s27] sm:$0xff] %v872_v27 }
 0x105   : > { %v770_v28 = vpop.f32.mrf.mxu0 }
 0x106   : > { %v784_v29 = vpop.f32.mrf.mxu1 }
 0x107   : > { %v785_v30 = vadd.f32 %v784_v29, %v770_v28 }
 0x108   : > { %v796_v32 = vpop.f32.mrf.mxu2 }
 0x109   : > { %v875_v31 = vadd.f32 %v866_v24, %v785_v30  ;;  %v810_v34 = vpop.f32.mrf.mxu3 }
 0x10a   : > { %v811_v35 = vadd.f32 %v810_v34, %v796_v32  ;;  %v909_v50 = vld [vmem:[%s1772_s27] sm:$0xff] (%p1496_p6) }
 0x10b   : > { %881 = vst [vmem:[%s1772_s27 + $0x18] sm:$0xff] %v875_v31 }
 0x10c   : > { %v873_v36 = vadd.f32 %v867_v33, %v811_v35  ;;  %910 = vst [vmem:[%s896_s30] sm:$0xff] (%p1496_p6), %v909_v50 }
 0x10e   : > { %879 = vst [vmem:[%s1772_s27 + $0x8] sm:$0xff] %v873_v36 }
 0x110   : > { %v798_v37 = vpop.f32.mrf.mxu2 }
 0x111   : > { %v812_v38 = vpop.f32.mrf.mxu3 }
 0x112   : > { %v813_v39 = vadd.f32 %v812_v38, %v798_v37  ;;  %v915_v53 = vld [vmem:[%s1772_s27 + $0x18] sm:$0xff] (%p1496_p6) }
 0x113   : > { %916 = vst [vmem:[%s896_s30 + $0x30] sm:$0xff] (%p1496_p6), %v915_v53 }
 0x114   : > { %v876_v40 = vadd.f32 %v867_v33, %v813_v39 }
 0x115   : > { %v911_v51 = vld [vmem:[%s1772_s27 + $0x8] sm:$0xff] (%p1496_p6) }
 0x116   : > { %882 = vst [vmem:[%s1772_s27 + $0x20] sm:$0xff] %v876_v40 }
 0x117   : > { %912 = vst [vmem:[%s896_s30 + $0x8] sm:$0xff] (%p1496_p6), %v911_v51 }
 0x11d   : > { %v824_v41 = vpop.f32.mrf.mxu0  ;;  %v917_v54 = vld [vmem:[%s1772_s27 + $0x20] sm:$0xff] (%p1496_p6) }
 0x11e   : > { %v838_v43 = vpop.f32.mrf.mxu1  ;;  %918 = vst [vmem:[%s896_s30 + $0x38] sm:$0xff] (%p1496_p6), %v917_v54 }
 0x11f   : > { %v839_v44 = vadd.f32 %v838_v43, %v824_v41 }
 0x121   : > { %v874_v45 = vadd.f32 %v868_v42, %v839_v44 }
 0x123   : > { %880 = vst [vmem:[%s1772_s27 + $0x10] sm:$0xff] %v874_v45 }
 0x125   : > { %v826_v46 = vpop.f32.mrf.mxu0 }
 0x126   : > { %v840_v47 = vpop.f32.mrf.mxu1 }
 0x127   : > { %v841_v48 = vadd.f32 %v840_v47, %v826_v46  ;;  %890 = sbr.rel (!%p1496_p6) target bundleno = 308 (0x134), region = 70 }
 0x129   : > { %v877_v49 = vadd.f32 %v868_v42, %v841_v48 }
 0x12a   : > { %v913_v52 = vld [vmem:[%s1772_s27 + $0x10] sm:$0xff] (%p1496_p6) }
 0x12b   : > { %883 = vst [vmem:[%s1772_s27 + $0x28] sm:$0xff] %v877_v49 }
 0x12c   : > { %914 = vst [vmem:[%s896_s30 + $0x10] sm:$0xff] %v913_v52 }
 0x132   : > { %v919_v55 = vld [vmem:[%s1772_s27 + $0x28] sm:$0xff] }
 0x133   : > { %920 = vst [vmem:[%s896_s30 + $0x40] sm:$0xff] %v919_v55 }
 0x134 PF: > { %s13_s16 = sadd.s32 1, %s1439_s16   ;;  %s1812_s12 = smov %s1427_s13 }
 0x135   : > { %p10_p12 = scmp.ge.s32.totalorder %s13_s16, 4   ;;  %s1813_s13 = smov %s1501_s22 }
 0x136   : > { %s1814_s14 = smov %s1435_s15  ;;  %s1815_s15 = smov %s1817_s17 }
 0x137   :  { %12 = sbr.rel (!%p10_p12) target bundleno = 3 (0x3), region = 136 }

// kernel: lipnet_forward.15
= control target key start
LH: loop header
LB: loop body
LE: loop exit
PB: predicated region body
PF: predicated region fallthrough
CT: control target
= control target key end

     0   :  { %s391_s1 = inlined_call_operand.vmem [shape: bf16[256,128], index: 1, kind: input, shape index: {}]   ;;  %s392_s0 = inlined_call_operand.vmem [shape: bf16[16,256], index: 0, kind: input, shape index: {}]   ;;  %s393_s2 = inlined_call_operand.vmem [shape: f32[1,128], index: 2, kind: input, shape index: {}]   ;;  %s394_s3 = inlined_call_operand.vmem [shape: f32[16,128], index: 3, kind: output, shape index: {}]  }
   0x1   :  { %v292_v0 = vld [vmem:[%s391_s1 + $0x38] sm:$0xff]  ;;  %v291_v2 = vld [vmem:[%s391_s1 + $0x30] sm:$0xff]  ;;  %v290_v4 = vld [vmem:[%s391_s1 + $0x28] sm:$0xff] }
   0x2   :  { %v300_v1 = vld [vmem:[%s391_s1 + $0x78] sm:$0xff]  ;;  %162 = vmatpush.bf16.msra.mxu0 %v292_v0  ;;  %v299_v3 = vld [vmem:[%s391_s1 + $0x70] sm:$0xff]  ;;  %v298_v5 = vld [vmem:[%s391_s1 + $0x68] sm:$0xff] }
   0x3   :  { %176 = vmatpush.bf16.msra.mxu1 %v300_v1  ;;  %v289_v6 = vld [vmem:[%s391_s1 + $0x20] sm:$0xff]  ;;  %v288_v8 = vld [vmem:[%s391_s1 + $0x18] sm:$0xff]  ;;  %v287_v10 = vld [vmem:[%s391_s1 + $0x10] sm:$0xff] }
   0x4   :  { %v297_v7 = vld [vmem:[%s391_s1 + $0x60] sm:$0xff]  ;;  %v296_v9 = vld [vmem:[%s391_s1 + $0x58] sm:$0xff]  ;;  %v295_v11 = vld [vmem:[%s391_s1 + $0x50] sm:$0xff] }
   0x5   :  { %v286_v12 = vld [vmem:[%s391_s1 + $0x8] sm:$0xff]  ;;  %v285_v14 = vld [vmem:[%s391_s1] sm:$0xff] }
   0x6   :  { %163 = vmatpush.bf16.msra.mxu0 %v291_v2  ;;  %v294_v13 = vld [vmem:[%s391_s1 + $0x48] sm:$0xff]  ;;  %v293_v15 = vld [vmem:[%s391_s1 + $0x40] sm:$0xff] }
   0x7   :  { %177 = vmatpush.bf16.msra.mxu1 %v299_v3  ;;  %v213_v16 = vld [vmem:[%s392_s0] sm:$0xf]  ;;  %v284_v17 = vld [vmem:[%s392_s0 + $0x4] sm:$0xf0]  ;;  %v283_v18 = vld [vmem:[%s392_s0 + $0x4] sm:$0xf] }
   0x8   :  { %v215_v19 = vld [vmem:[%s392_s0 + $0x8] sm:$0xf0]  ;;  %v214_v20 = vor.u32 %v284_v17, %v213_v16  ;;  %v301_v22 = vld [vmem:[%s393_s2] ss:$0 sm:$0xff] }
   0x9   :  { %v218_v21 = vor.u32 %v283_v18, %v215_v19 }
   0xa   :  { %164 = vmatpush.bf16.msra.mxu0 %v290_v4 }
   0xb   :  { %178 = vmatpush.bf16.msra.mxu1 %v298_v5 }
   0xe   :  { %165 = vmatpush.bf16.msra.mxu0 %v289_v6 }
   0xf   :  { %179 = vmatpush.bf16.msra.mxu1 %v297_v7 }
  0x12   :  { %166 = vmatpush.bf16.msra.mxu0 %v288_v8 }
  0x13   :  { %180 = vmatpush.bf16.msra.mxu1 %v296_v9 }
  0x16   :  { %167 = vmatpush.bf16.msra.mxu0 %v287_v10 }
  0x17   :  { %181 = vmatpush.bf16.msra.mxu1 %v295_v11 }
  0x1a   :  { %168 = vmatpush.bf16.msra.mxu0 %v286_v12 }
  0x1b   :  { %182 = vmatpush.bf16.msra.mxu1 %v294_v13 }
  0x1e   :  { %169 = vmatpush.bf16.msra.mxu0 %v285_v14 }
  0x1f   :  { %183 = vmatpush.bf16.msra.mxu1 %v293_v15 }
  0x21   :  { %170 = vmatmul.bf16.vlgmr.msra.gmra.mxu0 %v214_v20 }
  0x22   :  { %184 = vmatmul.bf16.vlgmr.msra.gmra.mxu1 %v218_v21 }
  0x9e   :  { %v171_v23 = vpop.f32.mrf.mxu0 }
  0x9f   :  { %v185_v24 = vpop.f32.mrf.mxu1 }
  0xa0   :  { %v186_v25 = vadd.f32 %v185_v24, %v171_v23 }
  0xa2   :  { %v203_v26 = vadd.f32 %v301_v22, %v186_v25 }
  0xa4   :  { %205 = vst [vmem:[%s394_s3] sm:$0xff] %v203_v26 }
  0xa6   :  { %v173_v27 = vpop.f32.mrf.mxu0 }
  0xa7   :  { %v187_v28 = vpop.f32.mrf.mxu1 }
  0xa8   :  { %v188_v29 = vadd.f32 %v187_v28, %v173_v27 }
  0xaa   :  { %v204_v30 = vadd.f32 %v301_v22, %v188_v29 }
  0xac   :  { %206 = vst [vmem:[%s394_s3 + $0x8] sm:$0xff] %v204_v30 }

</bundles_post_ra>
